<compile_context>
chip_gen: v7x
topology: tpu7x:2x2x1
jax: 0.10.0
libtpu: 0.0.40
codegen_flags: <defaults>
</compile_context>

<pallas_src>
import jax
import jax.numpy as jnp
from jax.experimental import pallas as pl
from jax.experimental.pallas import tpu as pltpu


def _make_basic_block_kernel(Bt, Hn, Wn, Cin, Cout, mm_dtype):
    """Kernel factory; all shape constants are closed over (static)."""
    M = Bt * Hn * Wn

    def kernel(x_ref, w1_ref, b1_ref, w2_ref, b2_ref, o_ref, halo_ref):
        # ---- hoisted W-boundary masks (shared by all 2x9 taps) -------------
        col = jax.lax.broadcasted_iota(jnp.int32, (Bt, Hn, Wn, Cin), 2)
        left_edge = col == 0            # tap needs x[..., w-1, :] -> zero at w=0
        right_edge = col == Wn - 1      # tap needs x[..., w+1, :] -> zero at w=Wn-1

        def im2col():
            """Build the (M, 9*C) matmul operand from the halo scratch."""
            taps = []
            for dh in range(3):                        # dh <-> kh
                a_h = halo_ref[:, dh:dh + Hn, :, :]    # (Bt, Hn, Wn, C)
                for dw in range(3):                    # dw <-> kw
                    if dw == 1:
                        t = a_h
                    elif dw == 0:                      # source w-1
                        t = jnp.where(left_edge, 0.0,
                                      pltpu.roll(a_h, shift=1, axis=2))
                    else:                              # source w+1
                        t = jnp.where(right_edge, 0.0,
                                      pltpu.roll(a_h, shift=Wn - 1, axis=2))
                    taps.append(t)
            tap = jnp.concatenate(taps, axis=-1)       # (Bt, Hn, Wn, 9*C)
            return tap.reshape(M, 9 * Cin).astype(mm_dtype)

        # ---- zero the top/bottom halo rows; interior is overwritten --------
        zrow = jnp.zeros((Bt, 1, Wn, Cin), jnp.float32)
        halo_ref[:, 0:1, :, :] = zrow
        halo_ref[:, Hn + 1:Hn + 2, :, :] = zrow

        x = x_ref[...]                                  # (Bt, Hn, Wn, Cin) f32
        halo_ref[:, 1:Hn + 1, :, :] = x

        # ---- conv1 (+ folded bn1) + relu : one (M,9Cin)@(9Cin,Cout) matmul --
        y = jnp.dot(im2col(), w1_ref[...],
                    preferred_element_type=jnp.float32) + b1_ref[...]
        y = jnp.maximum(y, 0.0)

        # conv2 taps come from the relu output; reuse the same halo scratch.
        halo_ref[:, 1:Hn + 1, :, :] = y.reshape(Bt, Hn, Wn, Cout)

        # ---- conv2 (+ folded bn2) + residual add + relu ---------------------
        y = jnp.dot(im2col(), w2_ref[...],
                    preferred_element_type=jnp.float32) + b2_ref[...]
        y = jnp.maximum(y + x.reshape(M, Cin), 0.0)

        o_ref[...] = y.reshape(Bt, Hn, Wn, Cout).astype(o_ref.dtype)

    return kernel


def basic_block_forward(x, conv1_w, bn1, conv2_w, bn2, *, eps=1e-5,
                        matmul_dtype=jnp.float32, block_batch=None):
    """x: (B, Cin, H, W) NCHW f32.  conv*_w: (Cout, Cin, 3, 3) (bias=False).
    bn* = (gamma, beta, running_mean, running_var), each (Cout,).
    Returns (B, Cout, H, W), matching BasicBlock.forward (stride=1, no downsample).
    matmul_dtype=jnp.bfloat16 enables bf16 MXU inputs (f32 accumulate) on v6e/v7x."""
    B, Cin, Hn, Wn = x.shape
    Cout = conv1_w.shape[0]
    assert conv1_w.shape == (Cout, Cin, 3, 3)
    assert conv2_w.shape == (Cout, Cout, 3, 3)
    assert Cin == Cout, "stride=1 / downsample=None path requires inplanes == planes"

    mm_dtype = jnp.dtype(matmul_dtype)

    def fold(w, bn):
        gamma, beta, mean, var = bn
        s = (gamma / jnp.sqrt(var + eps)).astype(jnp.float32)            # (Cout,)
        # w_eff[(kh*3+kw)*Cin + ci, co] = w[co, ci, kh, kw] * s[co]
        w_eff = jnp.transpose(w, (2, 3, 1, 0)).astype(jnp.float32) * s
        w_eff = w_eff.reshape(9 * w.shape[1], w.shape[0]).astype(mm_dtype)
        b_eff = (beta - mean * s).astype(jnp.float32).reshape(1, -1)     # (1, Cout)
        return w_eff, b_eff

    w1_eff, b1_eff = fold(conv1_w, bn1)
    w2_eff, b2_eff = fold(conv2_w, bn2)
    x_nhwc = jnp.transpose(x, (0, 2, 3, 1)).astype(jnp.float32)          # (B,H,W,C)

    # ---- images per grid step (amortize ~0.35 us/step pipeline overhead) ----
    per_img = (Hn * Wn * Cin * 4 * 4                          # 2-deep x & out blocks
               + (Hn + 2) * Wn * Cin * 4                      # halo scratch
               + 2 * Hn * Wn * 9 * Cin * mm_dtype.itemsize)   # im2col tap tensors
    if block_batch is None:
        Bt = max(1, min(B, (8 << 20) // max(per_img, 1)))
        if B >= 2:
            Bt = min(Bt, max(1, B // 2))   # keep grid >= 2 (v7x: 2 TensorCores)
        while B % Bt:                      # require an exact batch tiling
            Bt -= 1
    else:
        Bt = block_batch
        assert B % Bt == 0
    grid = (B // Bt,)

    kernel = _make_basic_block_kernel(Bt, Hn, Wn, Cin, Cout, mm_dtype)

    flops = 2 * B * Hn * Wn * 9 * (Cin * Cout + Cout * Cout) + 4 * B * Hn * Wn * Cout
    bytes_accessed = (4 * (x_nhwc.size + B * Hn * Wn * Cout
                           + b1_eff.size + b2_eff.size)
                      + mm_dtype.itemsize * (w1_eff.size + w2_eff.size))

    act_bytes = Bt * per_img
    wgt_bytes = 2 * (mm_dtype.itemsize * (w1_eff.size + w2_eff.size)
                     + 4 * (b1_eff.size + b2_eff.size))
    vmem_limit = int(min(max(2 * (act_bytes + wgt_bytes), 16 << 20), 32 << 20))

    out = pl.pallas_call(
        kernel,
        out_shape=jax.ShapeDtypeStruct((B, Hn, Wn, Cout), jnp.float32),
        grid=grid,
        in_specs=[
            pl.BlockSpec((Bt, Hn, Wn, Cin), lambda b: (b, 0, 0, 0)),
            pl.BlockSpec((9 * Cin, Cout), lambda b: (0, 0)),
            pl.BlockSpec((1, Cout), lambda b: (0, 0)),
            pl.BlockSpec((9 * Cout, Cout), lambda b: (0, 0)),
            pl.BlockSpec((1, Cout), lambda b: (0, 0)),
        ],
        out_specs=pl.BlockSpec((Bt, Hn, Wn, Cout), lambda b: (b, 0, 0, 0)),
        scratch_shapes=[pltpu.VMEM((Bt, Hn + 2, Wn, Cin), jnp.float32)],
        compiler_params=pltpu.CompilerParams(
            dimension_semantics=("parallel",),
            vmem_limit_bytes=vmem_limit),
        cost_estimate=pl.CostEstimate(flops=flops, transcendentals=0,
                                      bytes_accessed=bytes_accessed),
    )(x_nhwc, w1_eff, b1_eff, w2_eff, b2_eff)

    return jnp.transpose(out, (0, 3, 1, 2))                              # NCHW


def basic_block_reference(x, conv1_w, bn1, conv2_w, bn2, *, eps=1e-5):
    """Pure-JAX (XLA) reference of BasicBlock.forward for validation."""
    def bn_apply(y, bn):
        gamma, beta, mean, var = bn
        s = gamma / jnp.sqrt(var + eps)
        return y * s[None, :, None, None] + (beta - mean * s)[None, :, None, None]

    def conv(y, w):
        return jax.lax.conv_general_dilated(
            y, w, window_strides=(1, 1), padding=((1, 1), (1, 1)),
            dimension_numbers=("NCHW", "OIHW", "NCHW"),
            precision=jax.lax.Precision.HIGHEST)

    out = jnp.maximum(bn_apply(conv(x, conv1_w), bn1), 0.0)
    out = bn_apply(conv(out, conv2_w), bn2) + x
    return jnp.maximum(out, 0.0)


if __name__ == "__main__":
    key = jax.random.PRNGKey(0)
    ks = jax.random.split(key, 11)

    B, C, H, W = 2, 4, 16, 16          # inplanes = planes = 4, stride = 1
    x = jax.random.normal(ks[0], (B, C, H, W), dtype=jnp.float32)

    conv1_w = jax.random.normal(ks[1], (C, C, 3, 3), dtype=jnp.float32) * 0.2
    conv2_w = jax.random.normal(ks[2], (C, C, 3, 3), dtype=jnp.float32) * 0.2

    bn1 = (jax.random.uniform(ks[3], (C,), minval=0.5, maxval=1.5),   # gamma
           jax.random.normal(ks[4], (C,)) * 0.1,                      # beta
           jax.random.normal(ks[5], (C,)) * 0.1,                      # running_mean
           jax.random.uniform(ks[6], (C,), minval=0.5, maxval=1.5))   # running_var
    bn2 = (jax.random.uniform(ks[7], (C,), minval=0.5, maxval=1.5),
           jax.random.normal(ks[8], (C,)) * 0.1,
           jax.random.normal(ks[9], (C,)) * 0.1,
           jax.random.uniform(ks[10], (C,), minval=0.5, maxval=1.5))

    out = basic_block_forward(x, conv1_w, bn1, conv2_w, bn2)
    out = jax.block_until_ready(out)

    ref = basic_block_reference(x, conv1_w, bn1, conv2_w, bn2)
    assert out.shape == ref.shape == (B, C, H, W)
    assert jnp.allclose(out, ref, atol=1e-3, rtol=1e-3), (
        float(jnp.max(jnp.abs(out - ref))))
    print("KERNEL_OK")
</pallas_src>

<mosaic_0001>
module attributes {stable_mosaic.version = 11 : i64} {
  func.func @kernel(%arg0: i32, %arg1: memref<1x16x16x4xf32, #tpu.memory_space<vmem>>, %arg2: memref<36x4xf32, #tpu.memory_space<vmem>>, %arg3: memref<1x4xf32, #tpu.memory_space<vmem>>, %arg4: memref<36x4xf32, #tpu.memory_space<vmem>>, %arg5: memref<1x4xf32, #tpu.memory_space<vmem>>, %arg6: memref<1x16x16x4xf32, #tpu.memory_space<vmem>>, %arg7: memref<1x18x16x4xf32, #tpu.memory_space<vmem>>) attributes {dimension_semantics = [#tpu.dimension_semantics<parallel>], iteration_bounds = array<i64: 2>, scalar_prefetch = 0 : i64, scratch_operands = 1 : i64, tpu.core_type = #tpu.core_type<tc>, window_params = [{transform_indices = @transform_0, window_bounds = array<i64: 1, 16, 16, 4>}, {pipeline_mode = #tpu.pipeline_mode<synchronous>, transform_indices = @transform_1, window_bounds = array<i64: 36, 4>}, {pipeline_mode = #tpu.pipeline_mode<synchronous>, transform_indices = @transform_2, window_bounds = array<i64: 1, 4>}, {pipeline_mode = #tpu.pipeline_mode<synchronous>, transform_indices = @transform_3, window_bounds = array<i64: 36, 4>}, {pipeline_mode = #tpu.pipeline_mode<synchronous>, transform_indices = @transform_4, window_bounds = array<i64: 1, 4>}, {transform_indices = @transform_5, window_bounds = array<i64: 1, 16, 16, 4>}]} {
    %0 = tpu.iota {dimensions = array<i32: 2>} : vector<1x16x16x4xi32>
    %c0_i32 = arith.constant 0 : i32
    %1 = vector.broadcast %c0_i32 : i32 to vector<1x16x16x4xi32>
    %2 = arith.cmpi eq, %0, %1 : vector<1x16x16x4xi32>
    %c15_i32 = arith.constant 15 : i32
    %3 = vector.broadcast %c15_i32 : i32 to vector<1x16x16x4xi32>
    %4 = arith.cmpi eq, %0, %3 : vector<1x16x16x4xi32>
    %cst = arith.constant 0.000000e+00 : f32
    %5 = vector.broadcast %cst : f32 to vector<1x1x16x4xf32>
    %c0 = arith.constant 0 : index
    %c0_0 = arith.constant 0 : index
    %c0_1 = arith.constant 0 : index
    %c0_2 = arith.constant 0 : index
    %6 = vector.load %arg7[%c0, %c0_0, %c0_1, %c0_2] : memref<1x18x16x4xf32, #tpu.memory_space<vmem>>, vector<1x1x16x4xf32>
    tpu.vector_store %arg7[%c0, %c0_0, %c0_1, %c0_2], %5 {strides = array<i32>} : memref<1x18x16x4xf32, #tpu.memory_space<vmem>>, vector<1x1x16x4xf32>,
    %c0_3 = arith.constant 0 : index
    %c17 = arith.constant 17 : index
    %c0_4 = arith.constant 0 : index
    %c0_5 = arith.constant 0 : index
    %7 = vector.load %arg7[%c0_3, %c17, %c0_4, %c0_5] : memref<1x18x16x4xf32, #tpu.memory_space<vmem>>, vector<1x1x16x4xf32>
    tpu.vector_store %arg7[%c0_3, %c17, %c0_4, %c0_5], %5 {strides = array<i32>} : memref<1x18x16x4xf32, #tpu.memory_space<vmem>>, vector<1x1x16x4xf32>,
    %c0_6 = arith.constant 0 : index
    %c0_7 = arith.constant 0 : index
    %c0_8 = arith.constant 0 : index
    %c0_9 = arith.constant 0 : index
    %8 = vector.load %arg1[%c0_6, %c0_7, %c0_8, %c0_9] : memref<1x16x16x4xf32, #tpu.memory_space<vmem>>, vector<1x16x16x4xf32>
    %c0_10 = arith.constant 0 : index
    %c1 = arith.constant 1 : index
    %c0_11 = arith.constant 0 : index
    %c0_12 = arith.constant 0 : index
    %9 = vector.load %arg7[%c0_10, %c1, %c0_11, %c0_12] : memref<1x18x16x4xf32, #tpu.memory_space<vmem>>, vector<1x16x16x4xf32>
    tpu.vector_store %arg7[%c0_10, %c1, %c0_11, %c0_12], %8 {strides = array<i32>} : memref<1x18x16x4xf32, #tpu.memory_space<vmem>>, vector<1x16x16x4xf32>,
    %c0_13 = arith.constant 0 : index
    %c0_14 = arith.constant 0 : index
    %c0_15 = arith.constant 0 : index
    %c0_16 = arith.constant 0 : index
    %10 = vector.load %arg7[%c0_13, %c0_14, %c0_15, %c0_16] : memref<1x18x16x4xf32, #tpu.memory_space<vmem>>, vector<1x16x16x4xf32>
    %c1_i32 = arith.constant 1 : i32
    %11 = tpu.dynamic_rotate %10 by %c1_i32 dim 2 : vector<1x16x16x4xf32>, i32 -> vector<1x16x16x4xf32>
    %cst_17 = arith.constant 0.000000e+00 : f32
    %12 = vector.broadcast %cst_17 : f32 to vector<1x16x16x4xf32>
    %13 = arith.select %2, %12, %11 : vector<1x16x16x4xi1>, vector<1x16x16x4xf32>
    %c15_i32_18 = arith.constant 15 : i32
    %14 = tpu.dynamic_rotate %10 by %c15_i32_18 dim 2 : vector<1x16x16x4xf32>, i32 -> vector<1x16x16x4xf32>
    %cst_19 = arith.constant 0.000000e+00 : f32
    %15 = vector.broadcast %cst_19 : f32 to vector<1x16x16x4xf32>
    %16 = arith.select %4, %15, %14 : vector<1x16x16x4xi1>, vector<1x16x16x4xf32>
    %c0_20 = arith.constant 0 : index
    %c1_21 = arith.constant 1 : index
    %c0_22 = arith.constant 0 : index
    %c0_23 = arith.constant 0 : index
    %17 = vector.load %arg7[%c0_20, %c1_21, %c0_22, %c0_23] : memref<1x18x16x4xf32, #tpu.memory_space<vmem>>, vector<1x16x16x4xf32>
    %c1_i32_24 = arith.constant 1 : i32
    %18 = tpu.dynamic_rotate %17 by %c1_i32_24 dim 2 : vector<1x16x16x4xf32>, i32 -> vector<1x16x16x4xf32>
    %cst_25 = arith.constant 0.000000e+00 : f32
    %19 = vector.broadcast %cst_25 : f32 to vector<1x16x16x4xf32>
    %20 = arith.select %2, %19, %18 : vector<1x16x16x4xi1>, vector<1x16x16x4xf32>
    %c15_i32_26 = arith.constant 15 : i32
    %21 = tpu.dynamic_rotate %17 by %c15_i32_26 dim 2 : vector<1x16x16x4xf32>, i32 -> vector<1x16x16x4xf32>
    %cst_27 = arith.constant 0.000000e+00 : f32
    %22 = vector.broadcast %cst_27 : f32 to vector<1x16x16x4xf32>
    %23 = arith.select %4, %22, %21 : vector<1x16x16x4xi1>, vector<1x16x16x4xf32>
    %c0_28 = arith.constant 0 : index
    %c2 = arith.constant 2 : index
    %c0_29 = arith.constant 0 : index
    %c0_30 = arith.constant 0 : index
    %24 = vector.load %arg7[%c0_28, %c2, %c0_29, %c0_30] : memref<1x18x16x4xf32, #tpu.memory_space<vmem>>, vector<1x16x16x4xf32>
    %c1_i32_31 = arith.constant 1 : i32
    %25 = tpu.dynamic_rotate %24 by %c1_i32_31 dim 2 : vector<1x16x16x4xf32>, i32 -> vector<1x16x16x4xf32>
    %cst_32 = arith.constant 0.000000e+00 : f32
    %26 = vector.broadcast %cst_32 : f32 to vector<1x16x16x4xf32>
    %27 = arith.select %2, %26, %25 : vector<1x16x16x4xi1>, vector<1x16x16x4xf32>
    %c15_i32_33 = arith.constant 15 : i32
    %28 = tpu.dynamic_rotate %24 by %c15_i32_33 dim 2 : vector<1x16x16x4xf32>, i32 -> vector<1x16x16x4xf32>
    %cst_34 = arith.constant 0.000000e+00 : f32
    %29 = vector.broadcast %cst_34 : f32 to vector<1x16x16x4xf32>
    %30 = arith.select %4, %29, %28 : vector<1x16x16x4xi1>, vector<1x16x16x4xf32>
    %31 = tpu.concatenate %13, %10, %16, %20, %17, %23, %27, %24, %30 in 3 : vector<1x16x16x4xf32>, vector<1x16x16x4xf32>, vector<1x16x16x4xf32>, vector<1x16x16x4xf32>, vector<1x16x16x4xf32>, vector<1x16x16x4xf32>, vector<1x16x16x4xf32>, vector<1x16x16x4xf32>, vector<1x16x16x4xf32> -> vector<1x16x16x36xf32>
    %32 = vector.shape_cast %31 : vector<1x16x16x36xf32> to vector<256x36xf32>
    %c0_35 = arith.constant 0 : index
    %c0_36 = arith.constant 0 : index
    %33 = vector.load %arg2[%c0_35, %c0_36] : memref<36x4xf32, #tpu.memory_space<vmem>>, vector<36x4xf32>
    %cst_37 = arith.constant dense<0.000000e+00> : vector<256x4xf32>
    %34 = tpu.matmul %32, %33, %cst_37 {dimension_numbers = #tpu.dot_dimension_numbers<[1], [0], [0], [1], [0, 0, 1, 1], [], []>} : vector<256x36xf32>, vector<36x4xf32>, vector<256x4xf32> -> vector<256x4xf32>
    %c0_38 = arith.constant 0 : index
    %c0_39 = arith.constant 0 : index
    %35 = vector.load %arg3[%c0_38, %c0_39] : memref<1x4xf32, #tpu.memory_space<vmem>>, vector<1x4xf32>
    %36 = vector.broadcast %35 : vector<1x4xf32> to vector<256x4xf32>
    %37 = arith.addf %34, %36 : vector<256x4xf32>
    %cst_40 = arith.constant 0.000000e+00 : f32
    %38 = vector.broadcast %cst_40 : f32 to vector<256x4xf32>
    %39 = arith.maximumf %37, %38 : vector<256x4xf32>
    %40 = vector.shape_cast %39 : vector<256x4xf32> to vector<1x16x16x4xf32>
    %c0_41 = arith.constant 0 : index
    %c1_42 = arith.constant 1 : index
    %c0_43 = arith.constant 0 : index
    %c0_44 = arith.constant 0 : index
    %41 = vector.load %arg7[%c0_41, %c1_42, %c0_43, %c0_44] : memref<1x18x16x4xf32, #tpu.memory_space<vmem>>, vector<1x16x16x4xf32>
    tpu.vector_store %arg7[%c0_41, %c1_42, %c0_43, %c0_44], %40 {strides = array<i32>} : memref<1x18x16x4xf32, #tpu.memory_space<vmem>>, vector<1x16x16x4xf32>,
    %c0_45 = arith.constant 0 : index
    %c0_46 = arith.constant 0 : index
    %c0_47 = arith.constant 0 : index
    %c0_48 = arith.constant 0 : index
    %42 = vector.load %arg7[%c0_45, %c0_46, %c0_47, %c0_48] : memref<1x18x16x4xf32, #tpu.memory_space<vmem>>, vector<1x16x16x4xf32>
    %c1_i32_49 = arith.constant 1 : i32
    %43 = tpu.dynamic_rotate %42 by %c1_i32_49 dim 2 : vector<1x16x16x4xf32>, i32 -> vector<1x16x16x4xf32>
    %cst_50 = arith.constant 0.000000e+00 : f32
    %44 = vector.broadcast %cst_50 : f32 to vector<1x16x16x4xf32>
    %45 = arith.select %2, %44, %43 : vector<1x16x16x4xi1>, vector<1x16x16x4xf32>
    %c15_i32_51 = arith.constant 15 : i32
    %46 = tpu.dynamic_rotate %42 by %c15_i32_51 dim 2 : vector<1x16x16x4xf32>, i32 -> vector<1x16x16x4xf32>
    %cst_52 = arith.constant 0.000000e+00 : f32
    %47 = vector.broadcast %cst_52 : f32 to vector<1x16x16x4xf32>
    %48 = arith.select %4, %47, %46 : vector<1x16x16x4xi1>, vector<1x16x16x4xf32>
    %c0_53 = arith.constant 0 : index
    %c1_54 = arith.constant 1 : index
    %c0_55 = arith.constant 0 : index
    %c0_56 = arith.constant 0 : index
    %49 = vector.load %arg7[%c0_53, %c1_54, %c0_55, %c0_56] : memref<1x18x16x4xf32, #tpu.memory_space<vmem>>, vector<1x16x16x4xf32>
    %c1_i32_57 = arith.constant 1 : i32
    %50 = tpu.dynamic_rotate %49 by %c1_i32_57 dim 2 : vector<1x16x16x4xf32>, i32 -> vector<1x16x16x4xf32>
    %cst_58 = arith.constant 0.000000e+00 : f32
    %51 = vector.broadcast %cst_58 : f32 to vector<1x16x16x4xf32>
    %52 = arith.select %2, %51, %50 : vector<1x16x16x4xi1>, vector<1x16x16x4xf32>
    %c15_i32_59 = arith.constant 15 : i32
    %53 = tpu.dynamic_rotate %49 by %c15_i32_59 dim 2 : vector<1x16x16x4xf32>, i32 -> vector<1x16x16x4xf32>
    %cst_60 = arith.constant 0.000000e+00 : f32
    %54 = vector.broadcast %cst_60 : f32 to vector<1x16x16x4xf32>
    %55 = arith.select %4, %54, %53 : vector<1x16x16x4xi1>, vector<1x16x16x4xf32>
    %c0_61 = arith.constant 0 : index
    %c2_62 = arith.constant 2 : index
    %c0_63 = arith.constant 0 : index
    %c0_64 = arith.constant 0 : index
    %56 = vector.load %arg7[%c0_61, %c2_62, %c0_63, %c0_64] : memref<1x18x16x4xf32, #tpu.memory_space<vmem>>, vector<1x16x16x4xf32>
    %c1_i32_65 = arith.constant 1 : i32
    %57 = tpu.dynamic_rotate %56 by %c1_i32_65 dim 2 : vector<1x16x16x4xf32>, i32 -> vector<1x16x16x4xf32>
    %cst_66 = arith.constant 0.000000e+00 : f32
    %58 = vector.broadcast %cst_66 : f32 to vector<1x16x16x4xf32>
    %59 = arith.select %2, %58, %57 : vector<1x16x16x4xi1>, vector<1x16x16x4xf32>
    %c15_i32_67 = arith.constant 15 : i32
    %60 = tpu.dynamic_rotate %56 by %c15_i32_67 dim 2 : vector<1x16x16x4xf32>, i32 -> vector<1x16x16x4xf32>
    %cst_68 = arith.constant 0.000000e+00 : f32
    %61 = vector.broadcast %cst_68 : f32 to vector<1x16x16x4xf32>
    %62 = arith.select %4, %61, %60 : vector<1x16x16x4xi1>, vector<1x16x16x4xf32>
    %63 = tpu.concatenate %45, %42, %48, %52, %49, %55, %59, %56, %62 in 3 : vector<1x16x16x4xf32>, vector<1x16x16x4xf32>, vector<1x16x16x4xf32>, vector<1x16x16x4xf32>, vector<1x16x16x4xf32>, vector<1x16x16x4xf32>, vector<1x16x16x4xf32>, vector<1x16x16x4xf32>, vector<1x16x16x4xf32> -> vector<1x16x16x36xf32>
    %64 = vector.shape_cast %63 : vector<1x16x16x36xf32> to vector<256x36xf32>
    %c0_69 = arith.constant 0 : index
    %c0_70 = arith.constant 0 : index
    %65 = vector.load %arg4[%c0_69, %c0_70] : memref<36x4xf32, #tpu.memory_space<vmem>>, vector<36x4xf32>
    %cst_71 = arith.constant dense<0.000000e+00> : vector<256x4xf32>
    %66 = tpu.matmul %64, %65, %cst_71 {dimension_numbers = #tpu.dot_dimension_numbers<[1], [0], [0], [1], [0, 0, 1, 1], [], []>} : vector<256x36xf32>, vector<36x4xf32>, vector<256x4xf32> -> vector<256x4xf32>
    %c0_72 = arith.constant 0 : index
    %c0_73 = arith.constant 0 : index
    %67 = vector.load %arg5[%c0_72, %c0_73] : memref<1x4xf32, #tpu.memory_space<vmem>>, vector<1x4xf32>
    %68 = vector.broadcast %67 : vector<1x4xf32> to vector<256x4xf32>
    %69 = arith.addf %66, %68 : vector<256x4xf32>
    %70 = vector.shape_cast %8 : vector<1x16x16x4xf32> to vector<256x4xf32>
    %71 = arith.addf %69, %70 : vector<256x4xf32>
    %cst_74 = arith.constant 0.000000e+00 : f32
    %72 = vector.broadcast %cst_74 : f32 to vector<256x4xf32>
    %73 = arith.maximumf %71, %72 : vector<256x4xf32>
    %74 = vector.shape_cast %73 : vector<256x4xf32> to vector<1x16x16x4xf32>
    %c0_75 = arith.constant 0 : index
    %c0_76 = arith.constant 0 : index
    %c0_77 = arith.constant 0 : index
    %c0_78 = arith.constant 0 : index
    %75 = vector.load %arg6[%c0_75, %c0_76, %c0_77, %c0_78] : memref<1x16x16x4xf32, #tpu.memory_space<vmem>>, vector<1x16x16x4xf32>
    tpu.vector_store %arg6[%c0_75, %c0_76, %c0_77, %c0_78], %74 {strides = array<i32>} : memref<1x16x16x4xf32, #tpu.memory_space<vmem>>, vector<1x16x16x4xf32>,
    return
  }
  func.func @transform_0(%arg0: i32) -> (i32, i32, i32, i32) {
    %c0_i32 = arith.constant 0 : i32
    %c0_i32_0 = arith.constant 0 : i32
    %c0_i32_1 = arith.constant 0 : i32
    %c0_i32_2 = arith.constant 0 : i32
    return %arg0, %c0_i32, %c0_i32_0, %c0_i32_1 : i32, i32, i32, i32
  }
  func.func @transform_1(%arg0: i32) -> (i32, i32) {
    %c0_i32 = arith.constant 0 : i32
    %c0_i32_0 = arith.constant 0 : i32
    %c0_i32_1 = arith.constant 0 : i32
    return %c0_i32, %c0_i32_0 : i32, i32
  }
  func.func @transform_2(%arg0: i32) -> (i32, i32) {
    %c0_i32 = arith.constant 0 : i32
    %c0_i32_0 = arith.constant 0 : i32
    %c0_i32_1 = arith.constant 0 : i32
    return %c0_i32, %c0_i32_0 : i32, i32
  }
  func.func @transform_3(%arg0: i32) -> (i32, i32) {
    %c0_i32 = arith.constant 0 : i32
    %c0_i32_0 = arith.constant 0 : i32
    %c0_i32_1 = arith.constant 0 : i32
    return %c0_i32, %c0_i32_0 : i32, i32
  }
  func.func @transform_4(%arg0: i32) -> (i32, i32) {
    %c0_i32 = arith.constant 0 : i32
    %c0_i32_0 = arith.constant 0 : i32
    %c0_i32_1 = arith.constant 0 : i32
    return %c0_i32, %c0_i32_0 : i32, i32
  }
  func.func @transform_5(%arg0: i32) -> (i32, i32, i32, i32) {
    %c0_i32 = arith.constant 0 : i32
    %c0_i32_0 = arith.constant 0 : i32
    %c0_i32_1 = arith.constant 0 : i32
    %c0_i32_2 = arith.constant 0 : i32
    return %arg0, %c0_i32, %c0_i32_0, %c0_i32_1 : i32, i32, i32, i32
  }
}

</mosaic_0001>

<bundles_post_ra>
// kernel: tpu_custom_call.1
= control target key start
LH: loop header
LB: loop body
LE: loop exit
PB: predicated region body
PF: predicated region fallthrough
CT: control target
= control target key end

     0   :  { %s5471_s18 = smov 0   ;;  %s9677_s0 = inlined_call_operand.vmem [shape: f32[2,16,16,4], index: 0, kind: input, shape index: {}]   ;;  %s9678_s1 = inlined_call_operand.vmem [shape: f32[36,4], index: 1, kind: input, shape index: {}]   ;;  %s9679_s2 = inlined_call_operand.vmem [shape: f32[1,4], index: 2, kind: input, shape index: {}]   ;;  %s9680_s3 = inlined_call_operand.vmem [shape: f32[36,4], index: 3, kind: input, shape index: {}]   ;;  %s9681_s4 = inlined_call_operand.vmem [shape: f32[1,4], index: 4, kind: input, shape index: {}]   ;;  %s9682_s5 = inlined_call_operand.vmem [shape: f32[2,16,16,4], index: 5, kind: output, shape index: {}]  }
   0x1 LB: > { %s5106_s19 = sadd.s32 4294967295, %s5430_s18   ;;  %p5110_p0 = scmp.ge.s32.totalorder %s5430_s18, 1  ;;  %s5430_s18 = sphi %s5471_s18, %s15_s18  }
   0x2   : > { %p187_p1 = scmp.lt.s32.totalorder %s5430_s18, 3 }
   0x4   : > { %p188_p2 = pnand %p5110_p0, %p187_p1 }
   0x6   : > { %191 = sbr.rel (%p188_p2) target bundleno = 1656 (0x678), region = 40 }
   0xd   : > { %vm232_vm0 = vcmask 31744   ;;  %p215_p3 = scmp.lt.s32.totalorder %s5106_s19, 1  ;;  %v5432_v0 = vmov 0.0   ;;  %v225_v1 = vlaneseq  ;;  %s5433_s24 = smov 4   ;;  %vm2374_vm5 = vcmask 1043456  }
   0xe   : > { %233 = vst.msk [vmem:[#allocation2] sm:$0xff] %vm232_vm0, %v5432_v0  ;;  %236 = vst.msk [vmem:[#allocation2 + $0x110] sm:$0xff] %vm232_vm0, %v5432_v0  ;;  %s5434_s25 = smov 8   ;;  %s5435_s26 = smov 12   ;;  %vm2034_vm6 = vcmask 64512   ;;  %vm2067_vm7 = vcmask 97280  }
   0xf   : > { %237 = vst.msk [vmem:[#allocation2 + $0x118] sm:$0xff] %vm232_vm0, %v5432_v0  ;;  %234 = vst.msk [vmem:[#allocation2 + $0x8] sm:$0xff] %vm232_vm0, %v5432_v0  ;;  %s10385_s19 = smov (!%p215_p3, %s5106_s19), 1  ;;  %v5502_v5 = vshrl.u32 %v225_v1, 7  ;;  %s5436_s27 = smov 16   ;;  %vm2100_vm8 = vcmask 130048  }
  0x10   : > { %s5185_s20 = sshll.u32 %s10385_s19, 8  ;;  %s5437_s28 = smov 20   ;;  %vm2133_vm9 = vcmask 162816   ;;  %vm2166_vm10 = vcmask 195584   ;;  %vm2199_vm11 = vcmask 228352   ;;  %vm2232_vm12 = vcmask 261120  }
  0x11   : > { %s5491_s23 = scalar_lea.vmem %s9677_s0, %s5185_s20  ;;  %vm367_vm1 = vcmp.lt.s32.totalorder %v5502_v5, 1  ;;  %vm464_vm2 = vcmp.lt.s32.totalorder %v5502_v5, 7  ;;  %vm228_vm4 = vcmp.eq.s32.totalorder %v5502_v5, 0  ;;  %s5438_s29 = smov 24   ;;  %vm2277_vm13 = vcmask 293888  }
  0x12   : > { %v5494_v2 = vld [vmem:[%s5491_s23] sm:$0xff]  ;;  %v5497_v3 = vld [vmem:[%s5491_s23 + $0x10] sm:$0xff]  ;;  %v5500_v4 = vld [vmem:[%s5491_s23 + $0x8] sm:$0xff]  ;;  %s5439_s15 = smov 28   ;;  %s5440_s16 = smov 32  }
  0x13   : > { %9776 = vst [vmem:[#allocation3_spill] sm:$0xff] %v5494_v2  ;;  %9777 = vst [vmem:[#allocation4_spill] sm:$0xff] %v5497_v3  ;;  %v5511_v6 = vld [vmem:[%s5491_s23 + $0x20] sm:$0xff]  ;;  %v5514_v7 = vld [vmem:[%s5491_s23 + $0x18] sm:$0xff]  ;;  %s9418_s11 = scalar_lea.vmem %s9682_s5, %s5185_s20 }
  0x14   : > { %9778 = vst [vmem:[#allocation5_spill] sm:$0xff] %v5500_v4  ;;  %271 = vst.msk [vmem:[#allocation2 + $0x10] sm:$0xff] %vm232_vm0, %v5494_v2  ;;  %v5517_v8 = vld [vmem:[%s5491_s23 + $0x30] sm:$0xff]  ;;  %v5530_v11 = vld [vmem:[%s5491_s23 + $0x28] sm:$0xff] }
  0x15   : > { %273 = vst.msk [vmem:[#allocation2 + $0x20] sm:$0xff] %vm232_vm0, %v5497_v3  ;;  %272 = vst.msk [vmem:[#allocation2 + $0x18] sm:$0xff] %vm232_vm0, %v5500_v4  ;;  %v5519_v9 = vld [vmem:[#allocation2] sm:$0xff]  ;;  %v5543_v15 = vld [vmem:[%s5491_s23 + $0x38] sm:$0xff] }
  0x16   : > { %9779 = vst [vmem:[#allocation6_spill] sm:$0xff] %v5511_v6  ;;  %9780 = vst [vmem:[#allocation7_spill] sm:$0xff] %v5514_v7  ;;  %v5521_v10 = vld [vmem:[#allocation2 + $0x8] sm:$0xff]  ;;  %1010 = vrot.lane.b32.xlu0 %v5519_v9, %s5433_s24  ;;  %v335_v12 = vrot.slane %v5519_v9, 7  ;;  %v5540_v14 = vld [vmem:[%s5491_s23 + $0x40] sm:$0xff] }
  0x17   : > { %9781 = vst [vmem:[#allocation8_spill] sm:$0xff] %v5517_v8  ;;  %275 = vst.msk [vmem:[#allocation2 + $0x30] sm:$0xff] %vm232_vm0, %v5511_v6  ;;  %v351_v13 = vrot.slane %v5521_v10, 7  ;;  %v5550_v16 = vld [vmem:[%s5491_s23 + $0x50] sm:$0xff]  ;;  %v5553_v17 = vld [vmem:[%s5491_s23 + $0x48] sm:$0xff] }
  0x18   : > { %274 = vst.msk [vmem:[#allocation2 + $0x28] sm:$0xff] %vm232_vm0, %v5514_v7  ;;  %277 = vst.msk [vmem:[#allocation2 + $0x40] sm:$0xff] %vm232_vm0, %v5517_v8  ;;  %v5556_v18 = vld [vmem:[%s5491_s23 + $0x60] sm:$0xff]  ;;  %v5565_v19 = vld [vmem:[%s5491_s23 + $0x58] sm:$0xff] }
  0x19   : > { %9782 = vst [vmem:[#allocation9_spill] sm:$0xff] %v5530_v11  ;;  %276 = vst.msk [vmem:[#allocation2 + $0x38] sm:$0xff] %vm232_vm0, %v5530_v11  ;;  %v5568_v20 = vld [vmem:[%s5491_s23 + $0x70] sm:$0xff]  ;;  %v5571_v21 = vld [vmem:[%s5491_s23 + $0x68] sm:$0xff]  ;;  %v5575_v22 = vsel %vm367_vm1, %v351_v13, %v335_v12  ;;  %v5579_v23 = vsel %vm367_vm1, %v335_v12, %v351_v13 }
  0x1a   : > { %9783 = vst [vmem:[#allocation10_spill] sm:$0xff] %v5540_v14  ;;  %9784 = vst [vmem:[#allocation11_spill] sm:$0xff] %v5543_v15  ;;  %v5588_v24 = vld [vmem:[%s5491_s23 + $0x80] sm:$0xff]  ;;  %v5591_v25 = vld [vmem:[%s5491_s23 + $0x78] sm:$0xff]  ;;  %1012 = vrot.lane.b32.xlu0 %v5521_v10, %s5433_s24 }
  0x1b   : > { %279 = vst.msk [vmem:[#allocation2 + $0x50] sm:$0xff] %vm232_vm0, %v5540_v14  ;;  %278 = vst.msk [vmem:[#allocation2 + $0x48] sm:$0xff] %vm232_vm0, %v5543_v15  ;;  %v5594_v26 = vld [vmem:[%s5491_s23 + $0x90] sm:$0xff]  ;;  %v5605_v27 = vld [vmem:[%s5491_s23 + $0x88] sm:$0xff] }
  0x1c   : > { %9785 = vst [vmem:[#allocation12_spill] sm:$0xff] %v5550_v16  ;;  %9786 = vst [vmem:[#allocation13_spill] sm:$0xff] %v5553_v17  ;;  %v5608_v28 = vld [vmem:[%s5491_s23 + $0xa0] sm:$0xff]  ;;  %v5611_v29 = vld [vmem:[%s5491_s23 + $0x98] sm:$0xff] }
  0x1d   : > { %9787 = vst [vmem:[#allocation14_spill] sm:$0xff] %v5556_v18  ;;  %281 = vst.msk [vmem:[#allocation2 + $0x60] sm:$0xff] %vm232_vm0, %v5550_v16  ;;  %v5613_v30 = vld [vmem:[#allocation2 + $0x10] sm:$0xff]  ;;  %v5615_v31 = vld [vmem:[#allocation2 + $0x20] sm:$0xff] }
  0x1e   : > { %280 = vst.msk [vmem:[#allocation2 + $0x58] sm:$0xff] %vm232_vm0, %v5553_v17  ;;  %283 = vst.msk [vmem:[#allocation2 + $0x70] sm:$0xff] %vm232_vm0, %v5556_v18  ;;  %1014 = vrot.lane.b32.xlu1 %v5613_v30, %s5433_s24  ;;  %v5625_v32 = vld [vmem:[#allocation2 + $0x18] sm:$0xff]  ;;  %v5628_v33 = vld [vmem:[%s5491_s23 + $0xb0] sm:$0xff]  ;;  %1018 = vrot.lane.b32.xlu0 %v5615_v31, %s5433_s24 }
  0x1f   : > { %9788 = vst [vmem:[#allocation15_spill] sm:$0xff] %v5565_v19  ;;  %9789 = vst [vmem:[#allocation16_spill] sm:$0xff] %v5568_v20  ;;  %v5631_v34 = vld [vmem:[%s5491_s23 + $0xa8] sm:$0xff]  ;;  %v5640_v35 = vld [vmem:[%s5491_s23 + $0xc0] sm:$0xff] }
  0x20   : > { %9790 = vst [vmem:[#allocation17_spill] sm:$0xff] %v5571_v21  ;;  %9791 = vst [vmem:[#allocation18_spill] sm:$0xff] %v5575_v22  ;;  %v5642_v36 = vld [vmem:[#allocation2 + $0x30] sm:$0xff]  ;;  %v5648_v37 = vld [vmem:[#allocation2 + $0x28] sm:$0xff] }
  0x21   : > { %9792 = vst [vmem:[#allocation19_spill] sm:$0xff] %v5579_v23  ;;  %282 = vst.msk [vmem:[#allocation2 + $0x68] sm:$0xff] %vm232_vm0, %v5565_v19  ;;  %v5652_v38 = vld [vmem:[#allocation2 + $0x40] sm:$0xff]  ;;  %v5655_v39 = vld [vmem:[%s5491_s23 + $0xb8] sm:$0xff] }
  0x22   : > { %285 = vst.msk [vmem:[#allocation2 + $0x80] sm:$0xff] %vm232_vm0, %v5568_v20  ;;  %284 = vst.msk [vmem:[#allocation2 + $0x78] sm:$0xff] %vm232_vm0, %v5571_v21  ;;  %1016 = vrot.lane.b32.xlu1 %v5625_v32, %s5433_s24  ;;  %1022 = vrot.lane.b32.xlu0 %v5642_v36, %s5433_s24  ;;  %v5658_v40 = vld [vmem:[%s5491_s23 + $0xd0] sm:$0xff]  ;;  %v5661_v41 = vld [vmem:[%s5491_s23 + $0xc8] sm:$0xff] }
  0x23   : > { %9793 = vst [vmem:[#allocation20_spill] sm:$0xff] %v5588_v24  ;;  %9794 = vst [vmem:[#allocation21_spill] sm:$0xff] %v5591_v25  ;;  %v5672_v42 = vld [vmem:[%s5491_s23 + $0xe0] sm:$0xff]  ;;  %v5675_v43 = vld [vmem:[%s5491_s23 + $0xd8] sm:$0xff] }
  0x24   : > { %9795 = vst [vmem:[#allocation22_spill] sm:$0xff] %v5594_v26  ;;  %287 = vst.msk [vmem:[#allocation2 + $0x90] sm:$0xff] %vm232_vm0, %v5588_v24  ;;  %v5678_v44 = vld [vmem:[%s5491_s23 + $0xe8] sm:$0xff]  ;;  %v5680_v45 = vld [vmem:[#allocation2 + $0x38] sm:$0xff] }
  0x25   : > { %286 = vst.msk [vmem:[#allocation2 + $0x88] sm:$0xff] %vm232_vm0, %v5591_v25  ;;  %289 = vst.msk [vmem:[#allocation2 + $0xa0] sm:$0xff] %vm232_vm0, %v5594_v26  ;;  %v5690_v46 = vld [vmem:[#allocation2 + $0x50] sm:$0xff]  ;;  %v5694_v47 = vld [vmem:[#allocation2 + $0x48] sm:$0xff]  ;;  %v451_v26 = vrot.slane %v5680_v45, 1 }
  0x26   : > { %9796 = vst [vmem:[#allocation23_spill] sm:$0xff] %v5605_v27  ;;  %9797 = vst [vmem:[#allocation24_spill] sm:$0xff] %v5608_v28  ;;  %1020 = vrot.lane.b32.xlu1 %v5648_v37, %s5433_s24  ;;  %1026 = vrot.lane.b32.xlu0 %v5652_v38, %s5433_s24  ;;  %v5698_v48 = vld [vmem:[#allocation2 + $0x60] sm:$0xff]  ;;  %v5702_v49 = vld [vmem:[#allocation2 + $0x58] sm:$0xff]  ;;  %v452_v24 = vrot.slane %v5694_v47, 1 }
  0x27   : > { %9798 = vst [vmem:[#allocation25_spill] sm:$0xff] %v5611_v29  ;;  %288 = vst.msk [vmem:[#allocation2 + $0x98] sm:$0xff] %vm232_vm0, %v5605_v27  ;;  %v5706_v50 = vld [vmem:[#allocation2 + $0x70] sm:$0xff]  ;;  %v5756_v63 = vld [vmem:[%s5491_s23 + $0xf8] sm:$0xff]  ;;  %v453_v27 = vrot.slane %v5702_v49, 1  ;;  %v438_v20 = vrot.slane %v5698_v48, 1 }
  0x28   : > { %291 = vst.msk [vmem:[#allocation2 + $0xb0] sm:$0xff] %vm232_vm0, %v5608_v28  ;;  %290 = vst.msk [vmem:[#allocation2 + $0xa8] sm:$0xff] %vm232_vm0, %v5611_v29  ;;  %v5710_v51 = vld [vmem:[#allocation2 + $0x68] sm:$0xff]  ;;  %v5753_v62 = vld [vmem:[%s5491_s23 + $0xf0] sm:$0xff]  ;;  %v450_v28 = vrot.slane %v5648_v37, 1  ;;  %v439_v18 = vrot.slane %v5706_v50, 1 }
  0x29   : > { %9799 = vst [vmem:[#allocation26_spill] sm:$0xff] %v5628_v33  ;;  %9800 = vst [vmem:[#allocation27_spill] sm:$0xff] %v5631_v34  ;;  %v5714_v52 = vld [vmem:[#allocation2 + $0x80] sm:$0xff]  ;;  %v5718_v53 = vld [vmem:[#allocation2 + $0x78] sm:$0xff]  ;;  %v454_v25 = vrot.slane %v5710_v51, 1 }
  0x2a   : > { %293 = vst.msk [vmem:[#allocation2 + $0xc0] sm:$0xff] %vm232_vm0, %v5628_v33  ;;  %292 = vst.msk [vmem:[#allocation2 + $0xb8] sm:$0xff] %vm232_vm0, %v5631_v34  ;;  %1024 = vrot.lane.b32.xlu1 %v5680_v45, %s5433_s24  ;;  %1030 = vrot.lane.b32.xlu0 %v5690_v46, %s5433_s24  ;;  %v455_v21 = vrot.slane %v5718_v53, 1  ;;  %v440_v16 = vrot.slane %v5714_v52, 1 }
  0x2b   : > { %9801 = vst [vmem:[#allocation28_spill] sm:$0xff] %v5640_v35  ;;  %295 = vst.msk [vmem:[#allocation2 + $0xd0] sm:$0xff] %vm232_vm0, %v5640_v35  ;;  %v5722_v54 = vld [vmem:[#allocation2 + $0x90] sm:$0xff] }
  0x2c   : > { %9802 = vst [vmem:[#allocation29_spill] sm:$0xff] %v5655_v39  ;;  %9803 = vst [vmem:[#allocation30_spill] sm:$0xff] %v5658_v40  ;;  %v5726_v55 = vld [vmem:[#allocation2 + $0x88] sm:$0xff]  ;;  %v5730_v56 = vld [vmem:[#allocation2 + $0xa0] sm:$0xff]  ;;  %v441_v14 = vrot.slane %v5722_v54, 1 }
  0x2d   : > { %9804 = vst [vmem:[#allocation31_spill] sm:$0xff] %v5661_v41  ;;  %294 = vst.msk [vmem:[#allocation2 + $0xc8] sm:$0xff] %vm232_vm0, %v5655_v39  ;;  %v434_v39 = vrot.slane %v5615_v31, 1  ;;  %v456_v19 = vrot.slane %v5726_v55, 1  ;;  %v442_v8 = vrot.slane %v5730_v56, 1 }
  0x2e   : > { %297 = vst.msk [vmem:[#allocation2 + $0xe0] sm:$0xff] %vm232_vm0, %v5658_v40  ;;  %296 = vst.msk [vmem:[#allocation2 + $0xd8] sm:$0xff] %vm232_vm0, %v5661_v41  ;;  %1028 = vrot.lane.b32.xlu1 %v5694_v47, %s5433_s24  ;;  %1034 = vrot.lane.b32.xlu0 %v5698_v48, %s5433_s24  ;;  %v5734_v57 = vld [vmem:[#allocation2 + $0x98] sm:$0xff]  ;;  %v5792_v40 = vadd.s32 8, %v5502_v5 }
  0x2f   : > { %9805 = vst [vmem:[#allocation32_spill] sm:$0xff] %v5672_v42  ;;  %9806 = vst [vmem:[#allocation33_spill] sm:$0xff] %v5675_v43  ;;  %v5738_v58 = vld [vmem:[#allocation2 + $0xb0] sm:$0xff]  ;;  %v5742_v59 = vld [vmem:[#allocation2 + $0xa8] sm:$0xff]  ;;  %v457_v17 = vrot.slane %v5734_v57, 1 }
  0x30   : > { %9807 = vst [vmem:[#allocation34_spill] sm:$0xff] %v5678_v44  ;;  %299 = vst.msk [vmem:[#allocation2 + $0xf0] sm:$0xff] %vm232_vm0, %v5672_v42  ;;  %vm231_vm3 = vcmp.eq.s32.totalorder %v5792_v40, 15  ;;  %v458_v15 = vrot.slane %v5742_v59, 1  ;;  %v443_v6 = vrot.slane %v5738_v58, 1 }
  0x31   : > { %298 = vst.msk [vmem:[#allocation2 + $0xe8] sm:$0xff] %vm232_vm0, %v5675_v43  ;;  %300 = vst.msk [vmem:[#allocation2 + $0xf8] sm:$0xff] %vm232_vm0, %v5678_v44  ;;  %v5746_v60 = vld [vmem:[#allocation2 + $0xc0] sm:$0xff]  ;;  %v5750_v61 = vld [vmem:[#allocation2 + $0xb8] sm:$0xff]  ;;  %v449_v43 = vrot.slane %v5625_v32, 1 }
  0x32   : > { %1032 = vrot.lane.b32.xlu1 %v5702_v49, %s5433_s24  ;;  %1038 = vrot.lane.b32.xlu0 %v5706_v50, %s5433_s24  ;;  %9808 = vst [vmem:[#allocation35_spill] sm:$0xff] %v5753_v62  ;;  %9809 = vst [vmem:[#allocation36_spill] sm:$0xff] %v5756_v63  ;;  %v5764_v0 = vld [vmem:[#allocation2 + $0xd0] sm:$0xff]  ;;  %v459_v11 = vrot.slane %v5750_v61, 1  ;;  %v444_v3 = vrot.slane %v5746_v60, 1 }
  0x33   : > { %301 = vst.msk [vmem:[#allocation2 + $0x100] sm:$0xff] %vm232_vm0, %v5753_v62  ;;  %302 = vst.msk [vmem:[#allocation2 + $0x108] sm:$0xff] %vm232_vm0, %v5756_v63  ;;  %v432_v62 = vrot.slane %v5519_v9, 1  ;;  %v448_v63 = vrot.slane %v5521_v10, 1  ;;  %v433_v10 = vrot.slane %v5613_v30, 1  ;;  %v445_v2 = vrot.slane %v5764_v0, 1 }
  0x34   : > { %v5768_v1 = vld [vmem:[#allocation2 + $0xc8] sm:$0xff]  ;;  %9810 = vst [vmem:[#allocation37_spill] sm:$0xff] %v5792_v40  ;;  %v355_v40 = vrot.slane %v5694_v47, 7 }
  0x35   : > { %v5772_v12 = vld [vmem:[#allocation2 + $0xe0] sm:$0xff]  ;;  %v5776_v13 = vld [vmem:[#allocation2 + $0xd8] sm:$0xff]  ;;  %v465_v9 = vsel %vm464_vm2, %v432_v62, %v448_v63  ;;  %v481_v41 = vsel %vm464_vm2, %v448_v63, %v432_v62  ;;  %v5808_v33 = vsel %vm464_vm2, %v433_v10, %v449_v43  ;;  %v482_v62 = vsel %vm464_vm2, %v449_v43, %v433_v10 }
  0x36   : > { %1036 = vrot.lane.b32.xlu1 %v5710_v51, %s5433_s24  ;;  %1042 = vrot.lane.b32.xlu0 %v5714_v52, %s5433_s24  ;;  %v498_v34 = vsel %vm231_vm3, 0.0, %v481_v41  ;;  %v5822_v63 = vsel %vm464_vm2, %v434_v39, %v450_v28  ;;  %v5829_v29 = vsel %vm231_vm3, 0.0, %v482_v62  ;;  %v483_v41 = vsel %vm464_vm2, %v450_v28, %v434_v39 }
  0x37   : > { %v5782_v42 = vld [vmem:[#allocation2 + $0xf0] sm:$0xff]  ;;  %v436_v10 = vrot.slane %v5652_v38, 1  ;;  %v437_v62 = vrot.slane %v5690_v46, 1  ;;  %v460_v7 = vrot.slane %v5768_v1, 1  ;;  %v461_v4 = vrot.slane %v5776_v13, 1 }
  0x38   : > { %v5787_v44 = vld [vmem:[#allocation2 + $0xe8] sm:$0xff]  ;;  %v5800_v35 = vld [vmem:[#allocation2 + $0xf8] sm:$0xff]  ;;  %v446_v23 = vrot.slane %v5772_v12, 1 }
  0x39   : > { %v5853_v39 = vsel %vm464_vm2, %v436_v10, %v452_v24  ;;  %v462_v22 = vrot.slane %v5787_v44, 1 }
  0x3a   : > { %1040 = vrot.lane.b32.xlu1 %v5718_v53, %s5433_s24  ;;  %1046 = vrot.lane.b32.xlu0 %v5722_v54, %s5433_s24 }
  0x3e   : > { %1044 = vrot.lane.b32.xlu1 %v5726_v55, %s5433_s24  ;;  %1050 = vrot.lane.b32.xlu0 %v5730_v56, %s5433_s24 }
  0x42   : > { %1048 = vrot.lane.b32.xlu1 %v5734_v57, %s5433_s24  ;;  %1054 = vrot.lane.b32.xlu0 %v5738_v58, %s5433_s24 }
  0x46   : > { %1052 = vrot.lane.b32.xlu1 %v5742_v59, %s5433_s24  ;;  %1058 = vrot.lane.b32.xlu0 %v5746_v60, %s5433_s24 }
  0x4a   : > { %1056 = vrot.lane.b32.xlu1 %v5750_v61, %s5433_s24  ;;  %1062 = vrot.lane.b32.xlu0 %v5764_v0, %s5433_s24 }
  0x4e   : > { %1060 = vrot.lane.b32.xlu1 %v5768_v1, %s5433_s24  ;;  %1066 = vrot.lane.b32.xlu0 %v5772_v12, %s5433_s24 }
  0x52   : > { %1064 = vrot.lane.b32.xlu1 %v5776_v13, %s5433_s24  ;;  %1070 = vrot.lane.b32.xlu0 %v5782_v42, %s5433_s24 }
  0x56   : > { %1068 = vrot.lane.b32.xlu1 %v5787_v44, %s5433_s24  ;;  %1138 = vrot.lane.b32.xlu0 %v465_v9, %s5434_s25  ;;  %v435_v9 = vrot.slane %v5642_v36, 1 }
  0x58   : > { %v5837_v43 = vsel %vm464_vm2, %v435_v9, %v451_v26  ;;  %v484_v28 = vsel %vm464_vm2, %v451_v26, %v435_v9  ;;  %v485_v26 = vsel %vm464_vm2, %v452_v24, %v436_v10  ;;  %v5869_v9 = vsel %vm464_vm2, %v437_v62, %v453_v27 }
  0x59   : > { %v486_v24 = vsel %vm464_vm2, %v453_v27, %v437_v62  ;;  %v5885_v10 = vsel %vm464_vm2, %v438_v20, %v454_v25  ;;  %v487_v27 = vsel %vm464_vm2, %v454_v25, %v438_v20  ;;  %v5901_v62 = vsel %vm464_vm2, %v439_v18, %v455_v21 }
  0x5a   : > { %1072 = vrot.lane.b32.xlu1 %v5800_v35, %s5433_s24  ;;  %1142 = vrot.lane.b32.xlu0 %v5808_v33, %s5434_s25  ;;  %v488_v20 = vsel %vm464_vm2, %v455_v21, %v439_v18  ;;  %v5917_v25 = vsel %vm464_vm2, %v440_v16, %v456_v19  ;;  %v489_v18 = vsel %vm464_vm2, %v456_v19, %v440_v16 }
  0x5b   : > { %v5933_v21 = vsel %vm464_vm2, %v441_v14, %v457_v17  ;;  %v490_v16 = vsel %vm464_vm2, %v457_v17, %v441_v14  ;;  %v5949_v19 = vsel %vm464_vm2, %v442_v8, %v458_v15  ;;  %v491_v14 = vsel %vm464_vm2, %v458_v15, %v442_v8 }
  0x5c   : > { %9811 = vst [vmem:[#allocation38_spill] sm:$0xff] %v5933_v21  ;;  %9813 = vst [vmem:[#allocation40_spill] sm:$0xff] %v5949_v19  ;;  %v5965_v17 = vsel %vm464_vm2, %v443_v6, %v459_v11  ;;  %v492_v8 = vsel %vm464_vm2, %v459_v11, %v443_v6  ;;  %v5981_v15 = vsel %vm464_vm2, %v444_v3, %v460_v7 }
  0x5d   : > { %9815 = vst [vmem:[#allocation42_spill] sm:$0xff] %v5965_v17  ;;  %9817 = vst [vmem:[#allocation44_spill] sm:$0xff] %v5981_v15  ;;  %v493_v6 = vsel %vm464_vm2, %v460_v7, %v444_v3  ;;  %v5997_v11 = vsel %vm464_vm2, %v445_v2, %v461_v4  ;;  %v494_v3 = vsel %vm464_vm2, %v461_v4, %v445_v2  ;;  %v352_v2 = vrot.slane %v5625_v32, 7 }
  0x5e   : > { %1140 = vrot.lane.b32.xlu1 %v498_v34, %s5434_s25  ;;  %1146 = vrot.lane.b32.xlu0 %v5822_v63, %s5434_s25  ;;  %v5845_v34 = vsel %vm231_vm3, 0.0, %v483_v41  ;;  %v5861_v41 = vsel %vm231_vm3, 0.0, %v484_v28  ;;  %v5877_v28 = vsel %vm231_vm3, 0.0, %v485_v26  ;;  %v5893_v26 = vsel %vm231_vm3, 0.0, %v486_v24  ;;  %9819 = vst [vmem:[#allocation46_spill] sm:$0xff] %v5997_v11 }
  0x5f   : > { %v5909_v24 = vsel %vm231_vm3, 0.0, %v487_v27  ;;  %v5925_v27 = vsel %vm231_vm3, 0.0, %v488_v20  ;;  %v5941_v20 = vsel %vm231_vm3, 0.0, %v489_v18  ;;  %v5957_v18 = vsel %vm231_vm3, 0.0, %v490_v16 }
  0x60   : > { %9812 = vst [vmem:[#allocation39_spill] sm:$0xff] %v5941_v20  ;;  %9814 = vst [vmem:[#allocation41_spill] sm:$0xff] %v5957_v18  ;;  %v5973_v16 = vsel %vm231_vm3, 0.0, %v491_v14  ;;  %v5989_v14 = vsel %vm231_vm3, 0.0, %v492_v8  ;;  %v6007_v8 = vsel %vm231_vm3, 0.0, %v493_v6  ;;  %v6015_v7 = vsel %vm464_vm2, %v446_v23, %v462_v22 }
  0x61   : > { %9816 = vst [vmem:[#allocation43_spill] sm:$0xff] %v5973_v16  ;;  %9818 = vst [vmem:[#allocation45_spill] sm:$0xff] %v5989_v14  ;;  %v6025_v6 = vsel %vm231_vm3, 0.0, %v494_v3 }
  0x62   : > { %1144 = vrot.lane.b32.xlu1 %v5829_v29, %s5434_s25  ;;  %1150 = vrot.lane.b32.xlu0 %v5837_v43, %s5434_s25  ;;  %9821 = vst [vmem:[#allocation48_spill] sm:$0xff] %v6007_v8  ;;  %9822 = vst [vmem:[#allocation49_spill] sm:$0xff] %v6015_v7 }
  0x63   : > { %9824 = vst [vmem:[#allocation51_spill] sm:$0xff] %v6025_v6 }
  0x66   : > { %1148 = vrot.lane.b32.xlu1 %v5845_v34, %s5434_s25  ;;  %1154 = vrot.lane.b32.xlu0 %v5853_v39, %s5434_s25 }
  0x6a   : > { %1152 = vrot.lane.b32.xlu1 %v5861_v41, %s5434_s25  ;;  %1158 = vrot.lane.b32.xlu0 %v5869_v9, %s5434_s25 }
  0x6e   : > { %1156 = vrot.lane.b32.xlu1 %v5877_v28, %s5434_s25  ;;  %1162 = vrot.lane.b32.xlu0 %v5885_v10, %s5434_s25 }
  0x72   : > { %1160 = vrot.lane.b32.xlu1 %v5893_v26, %s5434_s25  ;;  %1166 = vrot.lane.b32.xlu0 %v5901_v62, %s5434_s25 }
  0x76   : > { %1164 = vrot.lane.b32.xlu1 %v5909_v24, %s5434_s25  ;;  %1170 = vrot.lane.b32.xlu0 %v5917_v25, %s5434_s25 }
  0x7a   : > { %1168 = vrot.lane.b32.xlu1 %v5925_v27, %s5434_s25  ;;  %1174 = vrot.lane.b32.xlu0 %v5933_v21, %s5434_s25 }
  0x7e   : > { %1172 = vrot.lane.b32.xlu1 %v5941_v20, %s5434_s25  ;;  %1178 = vrot.lane.b32.xlu0 %v5949_v19, %s5434_s25 }
  0x82   : > { %1176 = vrot.lane.b32.xlu1 %v5957_v18, %s5434_s25  ;;  %1182 = vrot.lane.b32.xlu0 %v5965_v17, %s5434_s25 }
  0x86   : > { %1180 = vrot.lane.b32.xlu1 %v5973_v16, %s5434_s25  ;;  %1186 = vrot.lane.b32.xlu0 %v5981_v15, %s5434_s25  ;;  %v447_v15 = vrot.slane %v5782_v42, 1 }
  0x88   : > { %v6001_v17 = vpop.permute.xlu0 %1010 }
  0x89   : > { %9820 = vst [vmem:[#allocation47_spill] sm:$0xff] %v6001_v17  ;;  %v463_v17 = vrot.slane %v5800_v35, 1 }
  0x8a   : > { %1184 = vrot.lane.b32.xlu1 %v5989_v14, %s5434_s25  ;;  %1190 = vrot.lane.b32.xlu0 %v5997_v11, %s5434_s25  ;;  %v336_v11 = vrot.slane %v5613_v30, 7  ;;  %v495_v14 = vsel %vm464_vm2, %v462_v22, %v446_v23 }
  0x8b   : > { %v6046_v3 = vsel %vm231_vm3, 0.0, %v495_v14 }
  0x8c   : > { %v6019_v16 = vpop.permute.xlu0 %1012  ;;  %9828 = vst [vmem:[#allocation55_spill] sm:$0xff] %v6046_v3  ;;  %v385_v22 = vsel %vm367_vm1, %v352_v2, %v336_v11 }
  0x8d   : > { %9823 = vst [vmem:[#allocation50_spill] sm:$0xff] %v6019_v16  ;;  %v6037_v16 = vsel %vm464_vm2, %v447_v15, %v463_v17  ;;  %v6064_v14 = vsel %vm228_vm4, 0.0, %v385_v22  ;;  %v339_v22 = vrot.slane %v5652_v38, 7 }
  0x8e   : > { %1188 = vrot.lane.b32.xlu1 %v6007_v8, %s5434_s25  ;;  %1194 = vrot.lane.b32.xlu0 %v6015_v7, %s5434_s25  ;;  %9826 = vst [vmem:[#allocation53_spill] sm:$0xff] %v6037_v16  ;;  %v353_v7 = vrot.slane %v5648_v37, 7  ;;  %9831 = vst [vmem:[#allocation58_spill] sm:$0xff] %v6064_v14 }
  0x90   : > { %v6029_v4 = vpop.permute.xlu1 %1014  ;;  %v6039_v8 = vpop.permute.xlu0 %1018 }
  0x91   : > { %9825 = vst [vmem:[#allocation52_spill] sm:$0xff] %v6029_v4  ;;  %9827 = vst [vmem:[#allocation54_spill] sm:$0xff] %v6039_v8  ;;  %v337_v4 = vrot.slane %v5615_v31, 7  ;;  %v496_v8 = vsel %vm464_vm2, %v463_v17, %v447_v15 }
  0x92   : > { %1192 = vrot.lane.b32.xlu1 %v6025_v6, %s5434_s25  ;;  %1198 = vrot.lane.b32.xlu0 %v6037_v16, %s5434_s25  ;;  %v6068_v18 = vsel %vm231_vm3, 0.0, %v496_v8  ;;  %v354_v16 = vrot.slane %v5680_v45, 7 }
  0x93   : > { %9832 = vst [vmem:[#allocation59_spill] sm:$0xff] %v6068_v18  ;;  %v386_v17 = vsel %vm367_vm1, %v353_v7, %v337_v4 }
  0x94   : > { %v6052_v23 = vpop.permute.xlu1 %1016  ;;  %v6058_v6 = vpop.permute.xlu0 %1022  ;;  %v6084_v8 = vsel %vm228_vm4, 0.0, %v386_v17 }
  0x95   : > { %9829 = vst [vmem:[#allocation56_spill] sm:$0xff] %v6052_v23  ;;  %9830 = vst [vmem:[#allocation57_spill] sm:$0xff] %v6058_v6  ;;  %v338_v23 = vrot.slane %v5642_v36, 7 }
  0x96   : > { %1196 = vrot.lane.b32.xlu1 %v6046_v3, %s5434_s25  ;;  %1266 = vrot.lane.b32.xlu0 %v6064_v14, %s5435_s26  ;;  %9835 = vst [vmem:[#allocation62_spill] sm:$0xff] %v6084_v8 }
  0x98   : > { %v6074_v15 = vpop.permute.xlu1 %1020  ;;  %v6078_v6 = vpop.permute.xlu0 %1026 }
  0x99   : > { %9833 = vst [vmem:[#allocation60_spill] sm:$0xff] %v6074_v15  ;;  %9834 = vst [vmem:[#allocation61_spill] sm:$0xff] %v6078_v6  ;;  %v387_v15 = vsel %vm367_vm1, %v354_v16, %v338_v23  ;;  %v6096_v6 = vsel %vm367_vm1, %v336_v11, %v352_v2  ;;  %v6116_v11 = vsel %vm367_vm1, %v337_v4, %v353_v7 }
  0x9a   : > { %1200 = vrot.lane.b32.xlu1 %v6068_v18, %s5434_s25  ;;  %1270 = vrot.lane.b32.xlu0 %v6084_v8, %s5435_s26  ;;  %9837 = vst [vmem:[#allocation64_spill] sm:$0xff] %v6096_v6  ;;  %v6104_v17 = vsel %vm228_vm4, 0.0, %v387_v15  ;;  %v340_v18 = vrot.slane %v5690_v46, 7  ;;  %v388_v8 = vsel %vm367_vm1, %v355_v40, %v339_v22  ;;  %9841 = vst [vmem:[#allocation68_spill] sm:$0xff] %v6116_v11 }
  0x9b   : > { %9839 = vst [vmem:[#allocation66_spill] sm:$0xff] %v6104_v17  ;;  %v6124_v15 = vsel %vm228_vm4, 0.0, %v388_v8  ;;  %v6136_v7 = vsel %vm367_vm1, %v338_v23, %v354_v16  ;;  %v6156_v16 = vsel %vm367_vm1, %v339_v22, %v355_v40 }
  0x9c   : > { %v6090_v3 = vpop.permute.xlu1 %1024  ;;  %v6098_v14 = vpop.permute.xlu0 %1030  ;;  %9843 = vst [vmem:[#allocation70_spill] sm:$0xff] %v6124_v15  ;;  %9845 = vst [vmem:[#allocation72_spill] sm:$0xff] %v6136_v7 }
  0x9d   : > { %9836 = vst [vmem:[#allocation63_spill] sm:$0xff] %v6090_v3  ;;  %9838 = vst [vmem:[#allocation65_spill] sm:$0xff] %v6098_v14  ;;  %v356_v3 = vrot.slane %v5702_v49, 7  ;;  %v341_v14 = vrot.slane %v5698_v48, 7 }
  0x9e   : > { %1268 = vrot.lane.b32.xlu1 %v6096_v6, %s5435_s26  ;;  %1274 = vrot.lane.b32.xlu0 %v6104_v17, %s5435_s26  ;;  %9849 = vst [vmem:[#allocation76_spill] sm:$0xff] %v6156_v16 }
  0x9f   : > { %v389_v17 = vsel %vm367_vm1, %v356_v3, %v340_v18  ;;  %v6176_v40 = vsel %vm367_vm1, %v340_v18, %v356_v3 }
  0xa0   : > { %v6110_v19 = vpop.permute.xlu1 %1028  ;;  %v6118_v2 = vpop.permute.xlu0 %1034  ;;  %v6144_v8 = vsel %vm228_vm4, 0.0, %v389_v17  ;;  %9853 = vst [vmem:[#allocation80_spill] sm:$0xff] %v6176_v40 }
  0xa1   : > { %9840 = vst [vmem:[#allocation67_spill] sm:$0xff] %v6110_v19  ;;  %9842 = vst [vmem:[#allocation69_spill] sm:$0xff] %v6118_v2  ;;  %v357_v19 = vrot.slane %v5710_v51, 7  ;;  %v342_v2 = vrot.slane %v5706_v50, 7 }
  0xa2   : > { %1272 = vrot.lane.b32.xlu1 %v6116_v11, %s5435_s26  ;;  %1278 = vrot.lane.b32.xlu0 %v6124_v15, %s5435_s26  ;;  %9847 = vst [vmem:[#allocation74_spill] sm:$0xff] %v6144_v8 }
  0xa3   : > { %v390_v15 = vsel %vm367_vm1, %v357_v19, %v341_v14  ;;  %v6196_v18 = vsel %vm367_vm1, %v341_v14, %v357_v19 }
  0xa4   : > { %v6130_v6 = vpop.permute.xlu1 %1032  ;;  %v6138_v4 = vpop.permute.xlu0 %1038  ;;  %v6164_v17 = vsel %vm228_vm4, 0.0, %v390_v15  ;;  %9857 = vst [vmem:[#allocation84_spill] sm:$0xff] %v6196_v18 }
  0xa5   : > { %9844 = vst [vmem:[#allocation71_spill] sm:$0xff] %v6130_v6  ;;  %9846 = vst [vmem:[#allocation73_spill] sm:$0xff] %v6138_v4  ;;  %v358_v6 = vrot.slane %v5718_v53, 7  ;;  %v343_v4 = vrot.slane %v5714_v52, 7 }
  0xa6   : > { %1276 = vrot.lane.b32.xlu1 %v6136_v7, %s5435_s26  ;;  %1282 = vrot.lane.b32.xlu0 %v6144_v8, %s5435_s26  ;;  %9851 = vst [vmem:[#allocation78_spill] sm:$0xff] %v6164_v17 }
  0xa7   : > { %v391_v8 = vsel %vm367_vm1, %v358_v6, %v342_v2  ;;  %v6216_v19 = vsel %vm367_vm1, %v342_v2, %v358_v6 }
  0xa8   : > { %v6150_v11 = vpop.permute.xlu1 %1036  ;;  %v6158_v23 = vpop.permute.xlu0 %1042  ;;  %v6184_v15 = vsel %vm228_vm4, 0.0, %v391_v8  ;;  %9861 = vst [vmem:[#allocation88_spill] sm:$0xff] %v6216_v19 }
  0xa9   : > { %9848 = vst [vmem:[#allocation75_spill] sm:$0xff] %v6150_v11  ;;  %9850 = vst [vmem:[#allocation77_spill] sm:$0xff] %v6158_v23  ;;  %v359_v11 = vrot.slane %v5726_v55, 7  ;;  %v344_v23 = vrot.slane %v5722_v54, 7 }
  0xaa   : > { %1280 = vrot.lane.b32.xlu1 %v6156_v16, %s5435_s26  ;;  %1286 = vrot.lane.b32.xlu0 %v6164_v17, %s5435_s26  ;;  %9855 = vst [vmem:[#allocation82_spill] sm:$0xff] %v6184_v15 }
  0xab   : > { %v392_v17 = vsel %vm367_vm1, %v359_v11, %v343_v4  ;;  %v6236_v6 = vsel %vm367_vm1, %v343_v4, %v359_v11 }
  0xac   : > { %v6170_v7 = vpop.permute.xlu1 %1040  ;;  %v6178_v22 = vpop.permute.xlu0 %1046  ;;  %v6204_v8 = vsel %vm228_vm4, 0.0, %v392_v17  ;;  %9865 = vst [vmem:[#allocation92_spill] sm:$0xff] %v6236_v6 }
  0xad   : > { %9852 = vst [vmem:[#allocation79_spill] sm:$0xff] %v6170_v7  ;;  %9854 = vst [vmem:[#allocation81_spill] sm:$0xff] %v6178_v22  ;;  %v360_v7 = vrot.slane %v5734_v57, 7  ;;  %v345_v22 = vrot.slane %v5730_v56, 7 }
  0xae   : > { %1284 = vrot.lane.b32.xlu1 %v6176_v40, %s5435_s26  ;;  %1290 = vrot.lane.b32.xlu0 %v6184_v15, %s5435_s26  ;;  %9859 = vst [vmem:[#allocation86_spill] sm:$0xff] %v6204_v8 }
  0xaf   : > { %v393_v15 = vsel %vm367_vm1, %v360_v7, %v344_v23  ;;  %v6256_v11 = vsel %vm367_vm1, %v344_v23, %v360_v7 }
  0xb0   : > { %v6190_v16 = vpop.permute.xlu1 %1044  ;;  %v6198_v3 = vpop.permute.xlu0 %1050  ;;  %v6224_v17 = vsel %vm228_vm4, 0.0, %v393_v15  ;;  %9869 = vst [vmem:[#allocation96_spill] sm:$0xff] %v6256_v11 }
  0xb1   : > { %9856 = vst [vmem:[#allocation83_spill] sm:$0xff] %v6190_v16  ;;  %9858 = vst [vmem:[#allocation85_spill] sm:$0xff] %v6198_v3  ;;  %v361_v16 = vrot.slane %v5742_v59, 7  ;;  %v346_v3 = vrot.slane %v5738_v58, 7 }
  0xb2   : > { %1288 = vrot.lane.b32.xlu1 %v6196_v18, %s5435_s26  ;;  %1294 = vrot.lane.b32.xlu0 %v6204_v8, %s5435_s26  ;;  %9863 = vst [vmem:[#allocation90_spill] sm:$0xff] %v6224_v17 }
  0xb3   : > { %v394_v8 = vsel %vm367_vm1, %v361_v16, %v345_v22  ;;  %v6276_v7 = vsel %vm367_vm1, %v345_v22, %v361_v16 }
  0xb4   : > { %v6210_v40 = vpop.permute.xlu1 %1048  ;;  %v6218_v14 = vpop.permute.xlu0 %1054  ;;  %v6244_v15 = vsel %vm228_vm4, 0.0, %v394_v8  ;;  %9873 = vst [vmem:[#allocation100_spill] sm:$0xff] %v6276_v7 }
  0xb5   : > { %9860 = vst [vmem:[#allocation87_spill] sm:$0xff] %v6210_v40  ;;  %9862 = vst [vmem:[#allocation89_spill] sm:$0xff] %v6218_v14  ;;  %v362_v40 = vrot.slane %v5750_v61, 7  ;;  %v347_v14 = vrot.slane %v5746_v60, 7 }
  0xb6   : > { %1292 = vrot.lane.b32.xlu1 %v6216_v19, %s5435_s26  ;;  %1298 = vrot.lane.b32.xlu0 %v6224_v17, %s5435_s26  ;;  %9867 = vst [vmem:[#allocation94_spill] sm:$0xff] %v6244_v15 }
  0xb7   : > { %v395_v17 = vsel %vm367_vm1, %v362_v40, %v346_v3  ;;  %v6296_v16 = vsel %vm367_vm1, %v346_v3, %v362_v40 }
  0xb8   : > { %v6230_v18 = vpop.permute.xlu1 %1052  ;;  %v6238_v2 = vpop.permute.xlu0 %1058  ;;  %v6264_v8 = vsel %vm228_vm4, 0.0, %v395_v17  ;;  %9877 = vst [vmem:[#allocation104_spill] sm:$0xff] %v6296_v16 }
  0xb9   : > { %9864 = vst [vmem:[#allocation91_spill] sm:$0xff] %v6230_v18  ;;  %9866 = vst [vmem:[#allocation93_spill] sm:$0xff] %v6238_v2  ;;  %v363_v18 = vrot.slane %v5768_v1, 7  ;;  %v348_v2 = vrot.slane %v5764_v0, 7 }
  0xba   : > { %1296 = vrot.lane.b32.xlu1 %v6236_v6, %s5435_s26  ;;  %1302 = vrot.lane.b32.xlu0 %v6244_v15, %s5435_s26  ;;  %9871 = vst [vmem:[#allocation98_spill] sm:$0xff] %v6264_v8 }
  0xbb   : > { %v396_v15 = vsel %vm367_vm1, %v363_v18, %v347_v14 }
  0xbc   : > { %v6250_v19 = vpop.permute.xlu1 %1056  ;;  %v6258_v4 = vpop.permute.xlu0 %1062  ;;  %v6284_v17 = vsel %vm228_vm4, 0.0, %v396_v15 }
  0xbd   : > { %9868 = vst [vmem:[#allocation95_spill] sm:$0xff] %v6250_v19  ;;  %9870 = vst [vmem:[#allocation97_spill] sm:$0xff] %v6258_v4  ;;  %v364_v19 = vrot.slane %v5776_v13, 7  ;;  %v349_v4 = vrot.slane %v5772_v12, 7 }
  0xbe   : > { %1300 = vrot.lane.b32.xlu1 %v6256_v11, %s5435_s26  ;;  %1306 = vrot.lane.b32.xlu0 %v6264_v8, %s5435_s26  ;;  %9875 = vst [vmem:[#allocation102_spill] sm:$0xff] %v6284_v17 }
  0xbf   : > { %v397_v8 = vsel %vm367_vm1, %v364_v19, %v348_v2 }
  0xc0   : > { %v6270_v6 = vpop.permute.xlu1 %1060  ;;  %v6278_v23 = vpop.permute.xlu0 %1066  ;;  %v6304_v15 = vsel %vm228_vm4, 0.0, %v397_v8  ;;  %v6320_v8 = vsel %vm367_vm1, %v347_v14, %v363_v18  ;;  %v6340_v18 = vsel %vm367_vm1, %v348_v2, %v364_v19 }
  0xc1   : > { %9872 = vst [vmem:[#allocation99_spill] sm:$0xff] %v6270_v6  ;;  %9874 = vst [vmem:[#allocation101_spill] sm:$0xff] %v6278_v23  ;;  %v365_v6 = vrot.slane %v5787_v44, 7  ;;  %v6306_v23 = vld [vmem:[#allocation2 + $0x100] sm:$0xff] }
  0xc2   : > { %1304 = vrot.lane.b32.xlu1 %v6276_v7, %s5435_s26  ;;  %1310 = vrot.lane.b32.xlu0 %v6284_v17, %s5435_s26  ;;  %9879 = vst [vmem:[#allocation106_spill] sm:$0xff] %v6304_v15  ;;  %v6308_v7 = vld [vmem:[#allocation2 + $0x108] sm:$0xff]  ;;  %v366_v17 = vrot.slane %v5800_v35, 7  ;;  %9881 = vst [vmem:[#allocation108_spill] sm:$0xff] %v6320_v8 }
  0xc3   : > { %v398_v40 = vsel %vm367_vm1, %v365_v6, %v349_v4  ;;  %v592_v20 = vrot.slane %v6308_v7, 7  ;;  %9884 = vst [vmem:[#allocation111_spill] sm:$0xff] %v6340_v18  ;;  %v6358_v19 = vsel %vm367_vm1, %v349_v4, %v365_v6 }
  0xc4   : > { %v6290_v11 = vpop.permute.xlu1 %1064  ;;  %v6298_v22 = vpop.permute.xlu0 %1070  ;;  %v6330_v21 = vsel %vm228_vm4, 0.0, %v398_v40  ;;  %9886 = vst [vmem:[#allocation113_spill] sm:$0xff] %v6358_v19 }
  0xc5   : > { %9876 = vst [vmem:[#allocation103_spill] sm:$0xff] %v6290_v11  ;;  %9878 = vst [vmem:[#allocation105_spill] sm:$0xff] %v6298_v22  ;;  %v350_v11 = vrot.slane %v5782_v42, 7 }
  0xc6   : > { %1308 = vrot.lane.b32.xlu1 %v6296_v16, %s5435_s26  ;;  %1314 = vrot.lane.b32.xlu0 %v6304_v15, %s5435_s26  ;;  %v576_v16 = vrot.slane %v6306_v23, 7  ;;  %9882 = vst [vmem:[#allocation109_spill] sm:$0xff] %v6330_v21 }
  0xc8   : > { %v6314_v3 = vpop.permute.xlu1 %1068  ;;  %v6322_v22 = vpop.permute.xlu0 %1138  ;;  %v624_v40 = vsel %vm367_vm1, %v592_v20, %v576_v16  ;;  %v6382_v4 = vsel %vm367_vm1, %v576_v16, %v592_v20 }
  0xc9   : > { %9880 = vst [vmem:[#allocation107_spill] sm:$0xff] %v6314_v3  ;;  %v399_v3 = vsel %vm367_vm1, %v366_v17, %v350_v11  ;;  %v6362_v2 = vsel %vm228_vm4, 0.0, %v624_v40 }
  0xca   : > { %1312 = vrot.lane.b32.xlu1 %v6320_v8, %s5435_s26  ;;  %1318 = vrot.lane.b32.xlu0 %v6330_v21, %s5435_s26  ;;  %v6350_v8 = vsel %vm228_vm4, 0.0, %v399_v3 }
  0xcb   : > { %9885 = vst [vmem:[#allocation112_spill] sm:$0xff] %v6350_v8 }
  0xcc   : > { %v6334_v15 = vpop.permute.xlu1 %1072  ;;  %v6344_v14 = vpop.permute.xlu0 %1142 }
  0xcd   : > { %9883 = vst [vmem:[#allocation110_spill] sm:$0xff] %v6334_v15 }
  0xce   : > { %1316 = vrot.lane.b32.xlu1 %v6340_v18, %s5435_s26  ;;  %1322 = vrot.lane.b32.xlu0 %v6350_v8, %s5435_s26  ;;  %v6374_v8 = vsel %vm367_vm1, %v350_v11, %v366_v17  ;;  %v9942_v18 = vld [vmem:[#allocation42_spill] sm:$0xff] }
  0xcf   : > { %9887 = vst [vmem:[#allocation114_spill] sm:$0xff] %v6374_v8 }
  0xd0   : > { %v6352_v15 = vpop.permute.xlu1 %1140  ;;  %v6366_v21 = vpop.permute.xlu0 %1146 }
  0xd2   : > { %1320 = vrot.lane.b32.xlu1 %v6358_v19, %s5435_s26  ;;  %1326 = vrot.lane.b32.xlu0 %v6362_v2, %s5435_s26 }
  0xd4   : > { %v6368_v3 = vpop.permute.xlu1 %1144  ;;  %v6378_v6 = vpop.permute.xlu0 %1150 }
  0xd5   : > { %9888 = vst [vmem:[#allocation115_spill] sm:$0xff] %v6378_v6 }
  0xd6   : > { %1324 = vrot.lane.b32.xlu1 %v6374_v8, %s5435_s26  ;;  %1394 = vrot.lane.b32.xlu0 %v5613_v30, %s5436_s27 }
  0xd8   : > { %v6384_v40 = vpop.permute.xlu1 %1148  ;;  %v6390_v11 = vpop.permute.xlu0 %1154 }
  0xd9   : > { %9889 = vst [vmem:[#allocation116_spill] sm:$0xff] %v6384_v40  ;;  %9890 = vst [vmem:[#allocation117_spill] sm:$0xff] %v6390_v11 }
  0xda   : > { %1328 = vrot.lane.b32.xlu1 %v6382_v4, %s5435_s26  ;;  %1398 = vrot.lane.b32.xlu0 %v5615_v31, %s5436_s27 }
  0xdc   : > { %v6392_v17 = vpop.permute.xlu1 %1152  ;;  %v6398_v20 = vpop.permute.xlu0 %1158 }
  0xdd   : > { %9891 = vst [vmem:[#allocation118_spill] sm:$0xff] %v6392_v17  ;;  %9892 = vst [vmem:[#allocation119_spill] sm:$0xff] %v6398_v20 }
  0xde   : > { %1396 = vrot.lane.b32.xlu1 %v5625_v32, %s5436_s27  ;;  %1402 = vrot.lane.b32.xlu0 %v5642_v36, %s5436_s27 }
  0xe0   : > { %v6400_v16 = vpop.permute.xlu1 %1156  ;;  %v6406_v30 = vpop.permute.xlu0 %1162 }
  0xe1   : > { %9893 = vst [vmem:[#allocation120_spill] sm:$0xff] %v6400_v16  ;;  %9894 = vst [vmem:[#allocation121_spill] sm:$0xff] %v6406_v30 }
  0xe2   : > { %1400 = vrot.lane.b32.xlu1 %v5648_v37, %s5436_s27  ;;  %1406 = vrot.lane.b32.xlu0 %v5652_v38, %s5436_s27 }
  0xe4   : > { %v6408_v8 = vpop.permute.xlu1 %1160  ;;  %v6414_v31 = vpop.permute.xlu0 %1166 }
  0xe5   : > { %9895 = vst [vmem:[#allocation122_spill] sm:$0xff] %v6408_v8  ;;  %9896 = vst [vmem:[#allocation123_spill] sm:$0xff] %v6414_v31  ;;  %v6695_v31 = vld [vmem:[#allocation2 + $0x60] sm:$0xff] }
  0xe6   : > { %1404 = vrot.lane.b32.xlu1 %v5680_v45, %s5436_s27  ;;  %1410 = vrot.lane.b32.xlu0 %v5690_v46, %s5436_s27 }
  0xe8   : > { %v6416_v32 = vpop.permute.xlu1 %1164  ;;  %v6422_v36 = vpop.permute.xlu0 %1170 }
  0xe9   : > { %9897 = vst [vmem:[#allocation124_spill] sm:$0xff] %v6416_v32  ;;  %9898 = vst [vmem:[#allocation125_spill] sm:$0xff] %v6422_v36 }
  0xea   : > { %1408 = vrot.lane.b32.xlu1 %v5694_v47, %s5436_s27  ;;  %1414 = vrot.lane.b32.xlu0 %v5698_v48, %s5436_s27 }
  0xec   : > { %v6424_v37 = vpop.permute.xlu1 %1168  ;;  %v6430_v38 = vpop.permute.xlu0 %1174 }
  0xed   : > { %9899 = vst [vmem:[#allocation126_spill] sm:$0xff] %v6424_v37  ;;  %9900 = vst [vmem:[#allocation127_spill] sm:$0xff] %v6430_v38 }
  0xee   : > { %1412 = vrot.lane.b32.xlu1 %v5702_v49, %s5436_s27  ;;  %1418 = vrot.lane.b32.xlu0 %v5706_v50, %s5436_s27 }
  0xf0   : > { %v6432_v45 = vpop.permute.xlu1 %1172  ;;  %v6438_v46 = vpop.permute.xlu0 %1178 }
  0xf1   : > { %9901 = vst [vmem:[#allocation128_spill] sm:$0xff] %v6432_v45  ;;  %9902 = vst [vmem:[#allocation129_spill] sm:$0xff] %v6438_v46 }
  0xf2   : > { %1416 = vrot.lane.b32.xlu1 %v5710_v51, %s5436_s27  ;;  %1422 = vrot.lane.b32.xlu0 %v5714_v52, %s5436_s27 }
  0xf4   : > { %v6440_v47 = vpop.permute.xlu1 %1176  ;;  %v6446_v48 = vpop.permute.xlu0 %1182 }
  0xf5   : > { %9903 = vst [vmem:[#allocation130_spill] sm:$0xff] %v6440_v47  ;;  %9904 = vst [vmem:[#allocation131_spill] sm:$0xff] %v6446_v48 }
  0xf6   : > { %1420 = vrot.lane.b32.xlu1 %v5718_v53, %s5436_s27  ;;  %1426 = vrot.lane.b32.xlu0 %v5722_v54, %s5436_s27 }
  0xf8   : > { %v6448_v49 = vpop.permute.xlu1 %1180  ;;  %v6454_v50 = vpop.permute.xlu0 %1186 }
  0xf9   : > { %9905 = vst [vmem:[#allocation132_spill] sm:$0xff] %v6448_v49  ;;  %9906 = vst [vmem:[#allocation133_spill] sm:$0xff] %v6454_v50  ;;  %v6652_v49 = vld [vmem:[#allocation2 + $0x40] sm:$0xff] }
  0xfa   : > { %1424 = vrot.lane.b32.xlu1 %v5726_v55, %s5436_s27  ;;  %1430 = vrot.lane.b32.xlu0 %v5730_v56, %s5436_s27  ;;  %v788_v38 = vrot.slane %v6652_v49, 7 }
  0xfc   : > { %v6456_v51 = vpop.permute.xlu1 %1184  ;;  %v6462_v52 = vpop.permute.xlu0 %1190 }
  0xfd   : > { %9907 = vst [vmem:[#allocation134_spill] sm:$0xff] %v6456_v51  ;;  %9908 = vst [vmem:[#allocation135_spill] sm:$0xff] %v6462_v52  ;;  %v6634_v51 = vld [vmem:[#allocation2 + $0x38] sm:$0xff] }
  0xfe   : > { %1428 = vrot.lane.b32.xlu1 %v5734_v57, %s5436_s27  ;;  %1434 = vrot.lane.b32.xlu0 %v5738_v58, %s5436_s27 }
 0x100   : > { %v6464_v53 = vpop.permute.xlu1 %1188  ;;  %v6470_v54 = vpop.permute.xlu0 %1194 }
 0x101   : > { %9909 = vst [vmem:[#allocation136_spill] sm:$0xff] %v6464_v53  ;;  %9910 = vst [vmem:[#allocation137_spill] sm:$0xff] %v6470_v54  ;;  %v9938_v54 = vld [vmem:[#allocation40_spill] sm:$0xff] }
 0x102   : > { %1432 = vrot.lane.b32.xlu1 %v5742_v59, %s5436_s27  ;;  %1438 = vrot.lane.b32.xlu0 %v5746_v60, %s5436_s27  ;;  %v9946_v53 = vld [vmem:[#allocation44_spill] sm:$0xff] }
 0x104   : > { %v6472_v55 = vpop.permute.xlu1 %1192  ;;  %v6478_v56 = vpop.permute.xlu0 %1198 }
 0x105   : > { %9911 = vst [vmem:[#allocation138_spill] sm:$0xff] %v6472_v55  ;;  %9912 = vst [vmem:[#allocation139_spill] sm:$0xff] %v6478_v56 }
 0x106   : > { %1436 = vrot.lane.b32.xlu1 %v5750_v61, %s5436_s27  ;;  %1442 = vrot.lane.b32.xlu0 %v5764_v0, %s5436_s27 }
 0x108   : > { %v6480_v57 = vpop.permute.xlu1 %1196  ;;  %v6486_v58 = vpop.permute.xlu0 %1266 }
 0x109   : > { %9913 = vst [vmem:[#allocation140_spill] sm:$0xff] %v6480_v57  ;;  %v9934_v57 = vld [vmem:[#allocation38_spill] sm:$0xff] }
 0x10a   : > { %1440 = vrot.lane.b32.xlu1 %v5768_v1, %s5436_s27  ;;  %1446 = vrot.lane.b32.xlu0 %v5772_v12, %s5436_s27 }
 0x10c   : > { %v6488_v59 = vpop.permute.xlu1 %1200  ;;  %v6494_v60 = vpop.permute.xlu0 %1270 }
 0x10d   : > { %9914 = vst [vmem:[#allocation141_spill] sm:$0xff] %v6488_v59 }
 0x10e   : > { %1444 = vrot.lane.b32.xlu1 %v5776_v13, %s5436_s27  ;;  %1450 = vrot.lane.b32.xlu0 %v5782_v42, %s5436_s27 }
 0x110   : > { %v6496_v61 = vpop.permute.xlu1 %1268  ;;  %v6502_v0 = vpop.permute.xlu0 %1274 }
 0x111   : > { %9915 = vst [vmem:[#allocation142_spill] sm:$0xff] %v6502_v0  ;;  %v6887_v0 = vld [vmem:[#allocation2 + $0x110] sm:$0xff] }
 0x112   : > { %1448 = vrot.lane.b32.xlu1 %v5787_v44, %s5436_s27  ;;  %1454 = vrot.lane.b32.xlu0 %v6306_v23, %s5436_s27 }
 0x114   : > { %v6504_v1 = vpop.permute.xlu1 %1272  ;;  %v6510_v12 = vpop.permute.xlu0 %1278 }
 0x115   : > { %9916 = vst [vmem:[#allocation143_spill] sm:$0xff] %v6510_v12 }
 0x116   : > { %1452 = vrot.lane.b32.xlu1 %v5800_v35, %s5436_s27  ;;  %1522 = vrot.lane.b32.xlu0 %v5808_v33, %s5437_s28 }
 0x118   : > { %v6512_v13 = vpop.permute.xlu1 %1276  ;;  %v6518_v42 = vpop.permute.xlu0 %1282 }
 0x119   : > { %9917 = vst [vmem:[#allocation144_spill] sm:$0xff] %v6512_v13  ;;  %9918 = vst [vmem:[#allocation145_spill] sm:$0xff] %v6518_v42 }
 0x11a   : > { %1456 = vrot.lane.b32.xlu1 %v6308_v7, %s5436_s27  ;;  %1526 = vrot.lane.b32.xlu0 %v5822_v63, %s5437_s28 }
 0x11c   : > { %v6520_v44 = vpop.permute.xlu1 %1280  ;;  %v6526_v35 = vpop.permute.xlu0 %1286 }
 0x11d   : > { %9919 = vst [vmem:[#allocation146_spill] sm:$0xff] %v6520_v44  ;;  %9920 = vst [vmem:[#allocation147_spill] sm:$0xff] %v6526_v35 }
 0x11e   : > { %1524 = vrot.lane.b32.xlu1 %v5829_v29, %s5437_s28  ;;  %1530 = vrot.lane.b32.xlu0 %v5837_v43, %s5437_s28 }
 0x120   : > { %v6528_v59 = vpop.permute.xlu1 %1284  ;;  %v6534_v33 = vpop.permute.xlu0 %1290 }
 0x121   : > { %9921 = vst [vmem:[#allocation148_spill] sm:$0xff] %v6528_v59  ;;  %9922 = vst [vmem:[#allocation149_spill] sm:$0xff] %v6534_v33 }
 0x122   : > { %1528 = vrot.lane.b32.xlu1 %v5845_v34, %s5437_s28  ;;  %1534 = vrot.lane.b32.xlu0 %v5853_v39, %s5437_s28 }
 0x124   : > { %v6536_v56 = vpop.permute.xlu1 %1288  ;;  %v6542_v29 = vpop.permute.xlu0 %1294 }
 0x125   : > { %9923 = vst [vmem:[#allocation150_spill] sm:$0xff] %v6536_v56  ;;  %9924 = vst [vmem:[#allocation151_spill] sm:$0xff] %v6542_v29  ;;  %v6713_v56 = vld [vmem:[#allocation2 + $0x70] sm:$0xff] }
 0x126   : > { %1532 = vrot.lane.b32.xlu1 %v5861_v41, %s5437_s28  ;;  %1538 = vrot.lane.b32.xlu0 %v5869_v9, %s5437_s28 }
 0x128   : > { %v6544_v63 = vpop.permute.xlu1 %1292  ;;  %v6550_v43 = vpop.permute.xlu0 %1298 }
 0x129   : > { %9925 = vst [vmem:[#allocation152_spill] sm:$0xff] %v6544_v63  ;;  %9926 = vst [vmem:[#allocation153_spill] sm:$0xff] %v6550_v43 }
 0x12a   : > { %1536 = vrot.lane.b32.xlu1 %v5877_v28, %s5437_s28  ;;  %1542 = vrot.lane.b32.xlu0 %v5885_v10, %s5437_s28 }
 0x12c   : > { %v6552_v34 = vpop.permute.xlu1 %1296  ;;  %v6558_v39 = vpop.permute.xlu0 %1302 }
 0x12d   : > { %9927 = vst [vmem:[#allocation154_spill] sm:$0xff] %v6552_v34  ;;  %9928 = vst [vmem:[#allocation155_spill] sm:$0xff] %v6558_v39 }
 0x12e   : > { %1540 = vrot.lane.b32.xlu1 %v5893_v26, %s5437_s28  ;;  %1546 = vrot.lane.b32.xlu0 %v5901_v62, %s5437_s28  ;;  %v9935_v62 = vld [vmem:[#allocation39_spill] sm:$0xff] }
 0x130   : > { %v6560_v41 = vpop.permute.xlu1 %1300  ;;  %v6566_v9 = vpop.permute.xlu0 %1306 }
 0x131   : > { %9929 = vst [vmem:[#allocation156_spill] sm:$0xff] %v6560_v41  ;;  %9930 = vst [vmem:[#allocation157_spill] sm:$0xff] %v6566_v9  ;;  %v6654_v9 = vld [vmem:[#allocation2 + $0x48] sm:$0xff] }
 0x132   : > { %1544 = vrot.lane.b32.xlu1 %v5909_v24, %s5437_s28  ;;  %1550 = vrot.lane.b32.xlu0 %v5917_v25, %s5437_s28  ;;  %v9939_v25 = vld [vmem:[#allocation41_spill] sm:$0xff]  ;;  %v804_v41 = vrot.slane %v6654_v9, 7 }
 0x134   : > { %v6568_v28 = vpop.permute.xlu1 %1304  ;;  %v6574_v10 = vpop.permute.xlu0 %1310  ;;  %v820_v35 = vsel %vm367_vm1, %v788_v38, %v804_v41 }
 0x135   : > { %9931 = vst [vmem:[#allocation158_spill] sm:$0xff] %v6568_v28  ;;  %9932 = vst [vmem:[#allocation159_spill] sm:$0xff] %v6574_v10  ;;  %v9959_v28 = vld [vmem:[#allocation59_spill] sm:$0xff] }
 0x136   : > { %1548 = vrot.lane.b32.xlu1 %v5925_v27, %s5437_s28  ;;  %1554 = vrot.lane.b32.xlu0 %v9934_v57, %s5437_s28  ;;  %v9943_v57 = vld [vmem:[#allocation43_spill] sm:$0xff] }
 0x138   : > { %v6576_v26 = vpop.permute.xlu1 %1308  ;;  %v6582_v24 = vpop.permute.xlu0 %1314 }
 0x139   : > { %9933 = vst [vmem:[#allocation160_spill] sm:$0xff] %v6576_v26  ;;  %9936 = vst [vmem:[#allocation38_spill] sm:$0xff] %v6582_v24  ;;  %v803_v26 = vrot.slane %v6634_v51, 7 }
 0x13a   : > { %1552 = vrot.lane.b32.xlu1 %v9935_v62, %s5437_s28  ;;  %1558 = vrot.lane.b32.xlu0 %v9938_v54, %s5437_s28  ;;  %v9947_v54 = vld [vmem:[#allocation45_spill] sm:$0xff] }
 0x13c   : > { %v6584_v19 = vpop.permute.xlu1 %1312  ;;  %v6590_v27 = vpop.permute.xlu0 %1318 }
 0x13d   : > { %9937 = vst [vmem:[#allocation39_spill] sm:$0xff] %v6584_v19  ;;  %9940 = vst [vmem:[#allocation40_spill] sm:$0xff] %v6590_v27  ;;  %v6632_v19 = vld [vmem:[#allocation2 + $0x30] sm:$0xff] }
 0x13e   : > { %1556 = vrot.lane.b32.xlu1 %v9939_v25, %s5437_s28  ;;  %1562 = vrot.lane.b32.xlu0 %v9942_v18, %s5437_s28  ;;  %v9951_v18 = vld [vmem:[#allocation48_spill] sm:$0xff]  ;;  %v787_v48 = vrot.slane %v6632_v19, 7 }
 0x140   : > { %v6592_v55 = vpop.permute.xlu1 %1316  ;;  %v6598_v62 = vpop.permute.xlu0 %1322  ;;  %v835_v39 = vsel %vm367_vm1, %v803_v26, %v787_v48  ;;  %v819_v30 = vsel %vm367_vm1, %v787_v48, %v803_v26  ;;  %v791_v48 = vrot.slane %v6713_v56, 7 }
 0x141   : > { %9941 = vst [vmem:[#allocation41_spill] sm:$0xff] %v6592_v55  ;;  %9944 = vst [vmem:[#allocation42_spill] sm:$0xff] %v6598_v62  ;;  %v9950_v55 = vld [vmem:[#allocation46_spill] sm:$0xff]  ;;  %v6616_v62 = vld [vmem:[#allocation2 + $0x20] sm:$0xff] }
 0x142   : > { %1560 = vrot.lane.b32.xlu1 %v9943_v57, %s5437_s28  ;;  %1566 = vrot.lane.b32.xlu0 %v9946_v53, %s5437_s28 }
 0x144   : > { %v6600_v52 = vpop.permute.xlu1 %1320  ;;  %v6606_v25 = vpop.permute.xlu0 %1326 }
 0x145   : > { %9945 = vst [vmem:[#allocation43_spill] sm:$0xff] %v6600_v52  ;;  %9948 = vst [vmem:[#allocation44_spill] sm:$0xff] %v6606_v25  ;;  %v6618_v52 = vld [vmem:[#allocation2 + $0x28] sm:$0xff]  ;;  %v672_v25 = vrot.slane %v6306_v23, 1  ;;  %v9956_v23 = vld [vmem:[#allocation55_spill] sm:$0xff] }
 0x146   : > { %1564 = vrot.lane.b32.xlu1 %v9947_v54, %s5437_s28  ;;  %1570 = vrot.lane.b32.xlu0 %v9950_v55, %s5437_s28  ;;  %v9953_v54 = vld [vmem:[#allocation49_spill] sm:$0xff]  ;;  %v9954_v55 = vld [vmem:[#allocation51_spill] sm:$0xff]  ;;  %v802_v50 = vrot.slane %v6618_v52, 7 }
 0x148   : > { %v6608_v27 = vpop.permute.xlu1 %1324  ;;  %v6614_v57 = vpop.permute.xlu0 %1394 }
 0x149   : > { %9949 = vst [vmem:[#allocation45_spill] sm:$0xff] %v6608_v27  ;;  %v688_v27 = vrot.slane %v6308_v7, 1 }
 0x14a   : > { %1568 = vrot.lane.b32.xlu1 %v9951_v18, %s5437_s28  ;;  %1574 = vrot.lane.b32.xlu0 %v9953_v54, %s5437_s28  ;;  %v786_v18 = vrot.slane %v6616_v62, 7  ;;  %v9955_v54 = vld [vmem:[#allocation53_spill] sm:$0xff] }
 0x14b   : > { %v6642_v7 = vsel %vm464_vm2, %v672_v25, %v688_v27 }
 0x14c   : > { %v6620_v53 = vpop.permute.xlu1 %1328  ;;  %v6628_v24 = vpop.permute.xlu0 %1398  ;;  %v834_v10 = vsel %vm367_vm1, %v802_v50, %v786_v18  ;;  %v818_v29 = vsel %vm367_vm1, %v786_v18, %v802_v50  ;;  %v790_v50 = vrot.slane %v6695_v31, 7 }
 0x14d   : > { %9952 = vst [vmem:[#allocation46_spill] sm:$0xff] %v6620_v53  ;;  %v850_v46 = vsel %vm228_vm4, 0.0, %v834_v10 }
 0x14e   : > { %1572 = vrot.lane.b32.xlu1 %v9954_v55, %s5437_s28  ;;  %1578 = vrot.lane.b32.xlu0 %v9955_v54, %s5437_s28 }
 0x150   : > { %v6636_v53 = vpop.permute.xlu1 %1396  ;;  %v6646_v55 = vpop.permute.xlu0 %1402 }
 0x151   : > { %9957 = vst [vmem:[#allocation48_spill] sm:$0xff] %v6646_v55 }
 0x152   : > { %1576 = vrot.lane.b32.xlu1 %v9956_v23, %s5437_s28  ;;  %1582 = vrot.lane.b32.xlu0 %v6642_v7, %s5437_s28  ;;  %v720_v23 = vsel %vm464_vm2, %v688_v27, %v672_v25  ;;  %v6676_v27 = vld [vmem:[#allocation2 + $0x50] sm:$0xff]  ;;  %v6678_v25 = vld [vmem:[#allocation2 + $0x58] sm:$0xff] }
 0x153   : > { %v6674_v43 = vsel %vm231_vm3, 0.0, %v720_v23  ;;  %v836_v23 = vsel %vm367_vm1, %v804_v41, %v788_v38  ;;  %v789_v34 = vrot.slane %v6676_v27, 7  ;;  %v805_v37 = vrot.slane %v6678_v25, 7 }
 0x154   : > { %v6656_v54 = vpop.permute.xlu1 %1400  ;;  %v6666_v47 = vpop.permute.xlu0 %1406  ;;  %v854_v63 = vsel %vm228_vm4, 0.0, %v836_v23 }
 0x155   : > { %9958 = vst [vmem:[#allocation49_spill] sm:$0xff] %v6656_v54  ;;  %9960 = vst [vmem:[#allocation51_spill] sm:$0xff] %v6666_v47  ;;  %v837_v33 = vsel %vm367_vm1, %v805_v37, %v789_v34  ;;  %v821_v59 = vsel %vm367_vm1, %v789_v34, %v805_v37  ;;  %v2267_v54 = vld [vmem:[%s9678_s1 + $0x10] sm:$0xff] }
 0x156   : > { %1580 = vrot.lane.b32.xlu1 %v9959_v28, %s5437_s28  ;;  %1650 = vrot.lane.b32.xlu0 %v850_v46, %s5438_s29  ;;  %v852_v28 = vsel %vm228_vm4, 0.0, %v835_v39  ;;  %v6697_v46 = vld [vmem:[#allocation2 + $0x68] sm:$0xff] }
 0x157   : > { %v806_v18 = vrot.slane %v6697_v46, 7 }
 0x158   : > { %v6680_v10 = vpop.permute.xlu1 %1404  ;;  %v6687_v36 = vpop.permute.xlu0 %1410 }
 0x159   : > { %9962 = vst [vmem:[#allocation53_spill] sm:$0xff] %v6680_v10  ;;  %9963 = vst [vmem:[#allocation55_spill] sm:$0xff] %v6687_v36  ;;  %v822_v36 = vsel %vm367_vm1, %v790_v50, %v806_v18 }
 0x15a   : > { %1584 = vrot.lane.b32.xlu1 %v6674_v43, %s5437_s28  ;;  %1654 = vrot.lane.b32.xlu0 %v852_v28, %s5438_s29  ;;  %v6715_v28 = vld [vmem:[#allocation2 + $0x78] sm:$0xff] }
 0x15b   : > { %v807_v26 = vrot.slane %v6715_v28, 7 }
 0x15c   : > { %v6699_v39 = vpop.permute.xlu1 %1408  ;;  %v6705_v32 = vpop.permute.xlu0 %1414 }
 0x15d   : > { %9964 = vst [vmem:[#allocation59_spill] sm:$0xff] %v6699_v39  ;;  %9965 = vst [vmem:[#allocation37_spill] sm:$0xff] %v6705_v32  ;;  %v838_v32 = vsel %vm367_vm1, %v806_v18, %v790_v50  ;;  %v823_v39 = vsel %vm367_vm1, %v791_v48, %v807_v26 }
 0x15e   : > { %1652 = vrot.lane.b32.xlu1 %v818_v29, %s5438_s29  ;;  %1658 = vrot.lane.b32.xlu0 %v854_v63, %s5438_s29  ;;  %v856_v29 = vsel %vm228_vm4, 0.0, %v837_v33  ;;  %v6733_v63 = vld [vmem:[#allocation2 + $0x88] sm:$0xff] }
 0x15f   : > { %v808_v41 = vrot.slane %v6733_v63, 7 }
 0x160   : > { %v6717_v8 = vpop.permute.xlu1 %1412  ;;  %v6723_v23 = vpop.permute.xlu0 %1418 }
 0x161   : > { %9966 = vst [vmem:[#allocation161_spill] sm:$0xff] %v6717_v8  ;;  %9967 = vst [vmem:[#allocation162_spill] sm:$0xff] %v6723_v23  ;;  %v6731_v8 = vld [vmem:[#allocation2 + $0x80] sm:$0xff]  ;;  %v839_v23 = vsel %vm367_vm1, %v807_v26, %v791_v48 }
 0x162   : > { %1656 = vrot.lane.b32.xlu1 %v819_v30, %s5438_s29  ;;  %1662 = vrot.lane.b32.xlu0 %v856_v29, %s5438_s29  ;;  %v858_v30 = vsel %vm228_vm4, 0.0, %v838_v32  ;;  %v792_v38 = vrot.slane %v6731_v8, 7  ;;  %v6751_v29 = vld [vmem:[#allocation2 + $0x98] sm:$0xff]  ;;  %v860_v32 = vsel %vm228_vm4, 0.0, %v839_v23 }
 0x163   : > { %v809_v34 = vrot.slane %v6751_v29, 7 }
 0x164   : > { %v6735_v20 = vpop.permute.xlu1 %1416  ;;  %v6741_v33 = vpop.permute.xlu0 %1422  ;;  %v824_v44 = vsel %vm367_vm1, %v792_v38, %v808_v41 }
 0x165   : > { %9968 = vst [vmem:[#allocation163_spill] sm:$0xff] %v6735_v20  ;;  %9969 = vst [vmem:[#allocation164_spill] sm:$0xff] %v6741_v33  ;;  %v6749_v20 = vld [vmem:[#allocation2 + $0x90] sm:$0xff]  ;;  %v840_v33 = vsel %vm367_vm1, %v808_v41, %v792_v38 }
 0x166   : > { %1660 = vrot.lane.b32.xlu1 %v820_v35, %s5438_s29  ;;  %1666 = vrot.lane.b32.xlu0 %v858_v30, %s5438_s29  ;;  %v793_v37 = vrot.slane %v6749_v20, 7  ;;  %v6769_v30 = vld [vmem:[#allocation2 + $0xa8] sm:$0xff] }
 0x167   : > { %v810_v18 = vrot.slane %v6769_v30, 7 }
 0x168   : > { %v6753_v16 = vpop.permute.xlu1 %1420  ;;  %v6759_v35 = vpop.permute.xlu0 %1426  ;;  %v825_v47 = vsel %vm367_vm1, %v793_v37, %v809_v34 }
 0x169   : > { %9970 = vst [vmem:[#allocation165_spill] sm:$0xff] %v6753_v16  ;;  %9971 = vst [vmem:[#allocation166_spill] sm:$0xff] %v6759_v35  ;;  %v6767_v16 = vld [vmem:[#allocation2 + $0xa0] sm:$0xff]  ;;  %v841_v35 = vsel %vm367_vm1, %v809_v34, %v793_v37 }
 0x16a   : > { %1664 = vrot.lane.b32.xlu1 %v821_v59, %s5438_s29  ;;  %1670 = vrot.lane.b32.xlu0 %v860_v32, %s5438_s29  ;;  %v862_v59 = vsel %vm228_vm4, 0.0, %v840_v33  ;;  %v794_v50 = vrot.slane %v6767_v16, 7  ;;  %v6787_v32 = vld [vmem:[#allocation2 + $0xb8] sm:$0xff] }
 0x16b   : > { %v811_v26 = vrot.slane %v6787_v32, 7 }
 0x16c   : > { %v6771_v42 = vpop.permute.xlu1 %1424  ;;  %v6777_v23 = vpop.permute.xlu0 %1430  ;;  %v826_v10 = vsel %vm367_vm1, %v794_v50, %v810_v18 }
 0x16d   : > { %9972 = vst [vmem:[#allocation167_spill] sm:$0xff] %v6771_v42  ;;  %9973 = vst [vmem:[#allocation168_spill] sm:$0xff] %v6777_v23  ;;  %v6785_v42 = vld [vmem:[#allocation2 + $0xb0] sm:$0xff]  ;;  %v842_v23 = vsel %vm367_vm1, %v810_v18, %v794_v50 }
 0x16e   : > { %1668 = vrot.lane.b32.xlu1 %v822_v36, %s5438_s29  ;;  %1674 = vrot.lane.b32.xlu0 %v862_v59, %s5438_s29  ;;  %v864_v36 = vsel %vm228_vm4, 0.0, %v841_v35  ;;  %v795_v48 = vrot.slane %v6785_v42, 7  ;;  %v6805_v59 = vld [vmem:[#allocation2 + $0xc8] sm:$0xff] }
 0x16f   : > { %v812_v41 = vrot.slane %v6805_v59, 7 }
 0x170   : > { %v6789_v11 = vpop.permute.xlu1 %1428  ;;  %v6795_v33 = vpop.permute.xlu0 %1434  ;;  %v827_v13 = vsel %vm367_vm1, %v795_v48, %v811_v26 }
 0x171   : > { %9974 = vst [vmem:[#allocation169_spill] sm:$0xff] %v6789_v11  ;;  %9975 = vst [vmem:[#allocation170_spill] sm:$0xff] %v6795_v33  ;;  %v6803_v11 = vld [vmem:[#allocation2 + $0xc0] sm:$0xff]  ;;  %v843_v33 = vsel %vm367_vm1, %v811_v26, %v795_v48 }
 0x172   : > { %1672 = vrot.lane.b32.xlu1 %v823_v39, %s5438_s29  ;;  %1678 = vrot.lane.b32.xlu0 %v864_v36, %s5438_s29  ;;  %v866_v39 = vsel %vm228_vm4, 0.0, %v842_v23  ;;  %v796_v38 = vrot.slane %v6803_v11, 7  ;;  %v6823_v36 = vld [vmem:[#allocation2 + $0xd8] sm:$0xff] }
 0x173   : > { %v813_v34 = vrot.slane %v6823_v36, 7 }
 0x174   : > { %v6807_v17 = vpop.permute.xlu1 %1432  ;;  %v6813_v35 = vpop.permute.xlu0 %1438  ;;  %v828_v55 = vsel %vm367_vm1, %v796_v38, %v812_v41 }
 0x175   : > { %9976 = vst [vmem:[#allocation171_spill] sm:$0xff] %v6807_v17  ;;  %9977 = vst [vmem:[#allocation172_spill] sm:$0xff] %v6813_v35  ;;  %v6821_v17 = vld [vmem:[#allocation2 + $0xd0] sm:$0xff]  ;;  %v844_v35 = vsel %vm367_vm1, %v812_v41, %v796_v38  ;;  %v6889_v38 = vld [vmem:[#allocation2 + $0x118] sm:$0xff] }
 0x176   : > { %1676 = vrot.lane.b32.xlu1 %v824_v44, %s5438_s29  ;;  %1682 = vrot.lane.b32.xlu0 %v866_v39, %s5438_s29  ;;  %v868_v44 = vsel %vm228_vm4, 0.0, %v843_v33  ;;  %v797_v37 = vrot.slane %v6821_v17, 7  ;;  %v6841_v39 = vld [vmem:[#allocation2 + $0xe8] sm:$0xff] }
 0x177   : > { %v814_v18 = vrot.slane %v6841_v39, 7 }
 0x178   : > { %v6825_v12 = vpop.permute.xlu1 %1436  ;;  %v6831_v23 = vpop.permute.xlu0 %1442 }
 0x179   : > { %9978 = vst [vmem:[#allocation173_spill] sm:$0xff] %v6825_v12  ;;  %9979 = vst [vmem:[#allocation174_spill] sm:$0xff] %v6831_v23  ;;  %v6839_v12 = vld [vmem:[#allocation2 + $0xe0] sm:$0xff]  ;;  %v845_v23 = vsel %vm367_vm1, %v813_v34, %v797_v37 }
 0x17a   : > { %1680 = vrot.lane.b32.xlu1 %v825_v47, %s5438_s29  ;;  %1686 = vrot.lane.b32.xlu0 %v868_v44, %s5438_s29  ;;  %v870_v47 = vsel %vm228_vm4, 0.0, %v844_v35  ;;  %v798_v50 = vrot.slane %v6839_v12, 7  ;;  %v6859_v44 = vld [vmem:[#allocation2 + $0xf8] sm:$0xff] }
 0x17b   : > { %v815_v26 = vrot.slane %v6859_v44, 7 }
 0x17c   : > { %v6843_v6 = vpop.permute.xlu1 %1440  ;;  %v6849_v33 = vpop.permute.xlu0 %1446 }
 0x17d   : > { %9980 = vst [vmem:[#allocation175_spill] sm:$0xff] %v6843_v6  ;;  %9981 = vst [vmem:[#allocation176_spill] sm:$0xff] %v6849_v33  ;;  %v6857_v6 = vld [vmem:[#allocation2 + $0xf0] sm:$0xff]  ;;  %v846_v33 = vsel %vm367_vm1, %v814_v18, %v798_v50 }
 0x17e   : > { %1684 = vrot.lane.b32.xlu1 %v826_v10, %s5438_s29  ;;  %1690 = vrot.lane.b32.xlu0 %v870_v47, %s5438_s29  ;;  %v872_v10 = vsel %vm228_vm4, 0.0, %v845_v23  ;;  %v799_v48 = vrot.slane %v6857_v6, 7  ;;  %v874_v23 = vsel %vm228_vm4, 0.0, %v846_v33 }
 0x180   : > { %v6861_v40 = vpop.permute.xlu1 %1444  ;;  %v6867_v35 = vpop.permute.xlu0 %1450  ;;  %v847_v47 = vsel %vm367_vm1, %v815_v26, %v799_v48 }
 0x181   : > { %9982 = vst [vmem:[#allocation177_spill] sm:$0xff] %v6861_v40  ;;  %9983 = vst [vmem:[#allocation178_spill] sm:$0xff] %v6867_v35  ;;  %v829_v35 = vsel %vm367_vm1, %v797_v37, %v813_v34  ;;  %v876_v33 = vsel %vm228_vm4, 0.0, %v847_v47  ;;  %v2265_v37 = vld [vmem:[%s9678_s1] sm:$0xff]  ;;  %v2266_v34 = vld [vmem:[%s9678_s1 + $0x8] sm:$0xff] }
 0x182   : > { %1688 = vrot.lane.b32.xlu1 %v827_v13, %s5438_s29  ;;  %1694 = vrot.lane.b32.xlu0 %v872_v10, %s5438_s29  ;;  %v801_v10 = vrot.slane %v6887_v0, 7  ;;  %v5377_v47 = vpack.c.bf16 %v2266_v34, %v2265_v37 }
 0x184   : > { %v6875_v40 = vpop.permute.xlu1 %1448  ;;  %v6881_v13 = vpop.permute.xlu0 %1454  ;;  %5378 = vmatprep.subr.bf16.mxu0 %v5377_v47 }
 0x185   : > { %9984 = vst [vmem:[#allocation179_spill] sm:$0xff] %v6875_v40  ;;  %9985 = vst [vmem:[#allocation180_spill] sm:$0xff] %v6881_v13  ;;  %v817_v13 = vrot.slane %v6889_v38, 7  ;;  %5380 = vmatpush3.bf16.msra.mxu0 %v5377_v47 }
 0x186   : > { %1692 = vrot.lane.b32.xlu1 %v828_v55, %s5438_s29  ;;  %1698 = vrot.lane.b32.xlu0 %v874_v23, %s5438_s29  ;;  %v830_v23 = vsel %vm367_vm1, %v798_v50, %v814_v18  ;;  %v2268_v50 = vld [vmem:[%s9678_s1 + $0x18] sm:$0xff]  ;;  %v831_v18 = vsel %vm367_vm1, %v799_v48, %v815_v26  ;;  %v898_v48 = vrot.slane %v6618_v52, 1 }
 0x187   : > { %v849_v40 = vsel %vm367_vm1, %v817_v13, %v801_v10  ;;  %v833_v26 = vsel %vm367_vm1, %v801_v10, %v817_v13  ;;  %v883_v10 = vrot.slane %v6632_v19, 1 }
 0x188   : > { %v6891_v41 = vpop.permute.xlu1 %1452  ;;  %v6897_v55 = vpop.permute.xlu0 %1522  ;;  %v880_v34 = vsel %vm228_vm4, 0.0, %v849_v40  ;;  %v882_v40 = vrot.slane %v6616_v62, 1 }
 0x189   : > { %9986 = vst [vmem:[#allocation181_spill] sm:$0xff] %v6891_v41 }
 0x18a   : > { %1696 = vrot.lane.b32.xlu1 %v829_v35, %s5438_s29  ;;  %1702 = vrot.lane.b32.xlu0 %v876_v33, %s5438_s29  ;;  %v5381_v33 = vpack.c.bf16 %v2268_v50, %v2267_v54  ;;  %v2269_v54 = vld [vmem:[%s9678_s1 + $0x20] sm:$0xf] }
 0x18c   : > { %v6909_v41 = vpop.permute.xlu1 %1456  ;;  %v6913_v35 = vpop.permute.xlu0 %1526  ;;  %5382 = vmatprep.subr.bf16.mxu0 %v5381_v33 }
 0x18d   : > { %9987 = vst [vmem:[#allocation182_spill] sm:$0xff] %v6909_v41  ;;  %5384 = vmatpush3.bf16.msra.mxu0 %v5381_v33 }
 0x18e   : > { %1700 = vrot.lane.b32.xlu1 %v830_v23, %s5438_s29  ;;  %1706 = vrot.lane.b32.xlu0 %v6362_v2, %s5438_s29 }
 0x18f   : > { %5269 = vmatprep.subr.msk.mxu0 %vm2374_vm5, %v2269_v54 }
 0x190   : > { %v6925_v37 = vpop.permute.xlu1 %1524  ;;  %v6932_v23 = vpop.permute.xlu0 %1530 }
 0x191   : > { %5270 = vmatpush3.msk.msra.mxu0 %vm2374_vm5, %v2269_v54  ;;  %v914_v54 = vsel %vm464_vm2, %v882_v40, %v898_v48 }
 0x192   : > { %1704 = vrot.lane.b32.xlu1 %v831_v18, %s5438_s29  ;;  %1710 = vrot.lane.b32.xlu0 %v880_v34, %s5438_s29  ;;  %v930_v18 = vsel %vm464_vm2, %v898_v48, %v882_v40  ;;  %v899_v34 = vrot.slane %v6634_v51, 1  ;;  %v884_v40 = vrot.slane %v6652_v49, 1  ;;  %v900_v48 = vrot.slane %v6654_v9, 1 }
 0x193   : > { %v947_v13 = vsel %vm231_vm3, 0.0, %v930_v18 }
 0x194   : > { %v6934_v47 = vpop.permute.xlu1 %1528  ;;  %v6943_v2 = vpop.permute.xlu0 %1534  ;;  %v915_v18 = vsel %vm464_vm2, %v883_v10, %v899_v34 }
 0x196   : > { %1708 = vrot.lane.b32.xlu1 %v6382_v4, %s5438_s29  ;;  %1778 = vrot.lane.b32.xlu0 %v6616_v62, %s5439_s15 }
 0x198   : > { %v6950_v50 = vpop.permute.xlu1 %1532  ;;  %v6955_v4 = vpop.permute.xlu0 %1538 }
 0x19a   : > { %1712 = vrot.lane.b32.xlu1 %v833_v26, %s5438_s29  ;;  %1782 = vrot.lane.b32.xlu0 %v6632_v19, %s5439_s15 }
 0x19c   : > { %v6959_v33 = vpop.permute.xlu1 %1536  ;;  %v6969_v62 = vpop.permute.xlu0 %1542 }
 0x19e   : > { %1780 = vrot.lane.b32.xlu1 %v6618_v52, %s5439_s15  ;;  %1908 = vrot.lane.b32.xlu0 %v947_v13, %s5440_s16  ;;  %v931_v52 = vsel %vm464_vm2, %v899_v34, %v883_v10  ;;  %v916_v10 = vsel %vm464_vm2, %v884_v40, %v900_v48 }
 0x1a0   : > { %v6973_v26 = vpop.permute.xlu1 %1540  ;;  %v6979_v19 = vpop.permute.xlu0 %1546 }
 0x1a1   : > { %9988 = vst [vmem:[#allocation183_spill] sm:$0xff] %v6979_v19 }
 0x1a2   : > { %1906 = vrot.lane.b32.xlu1 %v914_v54, %s5440_s16  ;;  %1910 = vrot.lane.b32.xlu0 %v915_v18, %s5440_s16  ;;  %v949_v54 = vsel %vm231_vm3, 0.0, %v931_v52  ;;  %v885_v52 = vrot.slane %v6676_v27, 1 }
 0x1a4   : > { %v6981_v41 = vpop.permute.xlu1 %1544  ;;  %v6990_v13 = vpop.permute.xlu0 %1550 }
 0x1a5   : > { %9989 = vst [vmem:[#allocation184_spill] sm:$0xff] %v6990_v13  ;;  %v901_v13 = vrot.slane %v6678_v25, 1 }
 0x1a6   : > { %1784 = vrot.lane.b32.xlu1 %v6634_v51, %s5439_s15  ;;  %1786 = vrot.lane.b32.xlu0 %v6652_v49, %s5439_s15  ;;  %v932_v51 = vsel %vm464_vm2, %v900_v48, %v884_v40 }
 0x1a7   : > { %v917_v40 = vsel %vm464_vm2, %v885_v52, %v901_v13 }
 0x1a8   : > { %v6994_v19 = vpop.permute.xlu1 %1548  ;;  %v7001_v34 = vpop.permute.xlu0 %1554 }
 0x1a9   : > { %9990 = vst [vmem:[#allocation185_spill] sm:$0xff] %v7001_v34 }
 0x1aa   : > { %1912 = vrot.lane.b32.xlu1 %v949_v54, %s5440_s16  ;;  %1914 = vrot.lane.b32.xlu0 %v916_v10, %s5440_s16  ;;  %v951_v54 = vsel %vm231_vm3, 0.0, %v932_v51  ;;  %v886_v51 = vrot.slane %v6695_v31, 1 }
 0x1ac   : > { %v7003_v18 = vpop.permute.xlu1 %1552  ;;  %v7012_v49 = vpop.permute.xlu0 %1558 }
 0x1ad   : > { %9991 = vst [vmem:[#allocation186_spill] sm:$0xff] %v7012_v49  ;;  %v902_v49 = vrot.slane %v6697_v46, 1 }
 0x1ae   : > { %1788 = vrot.lane.b32.xlu1 %v6654_v9, %s5439_s15  ;;  %1790 = vrot.lane.b32.xlu0 %v6676_v27, %s5439_s15  ;;  %v933_v9 = vsel %vm464_vm2, %v901_v13, %v885_v52 }
 0x1af   : > { %v918_v13 = vsel %vm464_vm2, %v886_v51, %v902_v49 }
 0x1b0   : > { %v7016_v34 = vpop.permute.xlu1 %1556  ;;  %v7023_v48 = vpop.permute.xlu0 %1562 }
 0x1b1   : > { %9992 = vst [vmem:[#allocation187_spill] sm:$0xff] %v7016_v34  ;;  %9993 = vst [vmem:[#allocation188_spill] sm:$0xff] %v7023_v48  ;;  %v909_v34 = vrot.slane %v6823_v36, 1 }
 0x1b2   : > { %1916 = vrot.lane.b32.xlu1 %v951_v54, %s5440_s16  ;;  %1918 = vrot.lane.b32.xlu0 %v917_v40, %s5440_s16  ;;  %v953_v54 = vsel %vm231_vm3, 0.0, %v933_v9  ;;  %v887_v9 = vrot.slane %v6713_v56, 1 }
 0x1b4   : > { %v7025_v10 = vpop.permute.xlu1 %1560  ;;  %v7034_v27 = vpop.permute.xlu0 %1566 }
 0x1b5   : > { %9994 = vst [vmem:[#allocation189_spill] sm:$0xff] %v7025_v10  ;;  %9995 = vst [vmem:[#allocation190_spill] sm:$0xff] %v7034_v27  ;;  %v903_v27 = vrot.slane %v6715_v28, 1 }
 0x1b6   : > { %1792 = vrot.lane.b32.xlu1 %v6678_v25, %s5439_s15  ;;  %1794 = vrot.lane.b32.xlu0 %v6695_v31, %s5439_s15  ;;  %v934_v25 = vsel %vm464_vm2, %v902_v49, %v886_v51 }
 0x1b7   : > { %v919_v49 = vsel %vm464_vm2, %v887_v9, %v903_v27 }
 0x1b8   : > { %v7038_v48 = vpop.permute.xlu1 %1564  ;;  %v7045_v52 = vpop.permute.xlu0 %1570 }
 0x1b9   : > { %9996 = vst [vmem:[#allocation191_spill] sm:$0xff] %v7038_v48  ;;  %9997 = vst [vmem:[#allocation192_spill] sm:$0xff] %v7045_v52  ;;  %v908_v48 = vrot.slane %v6805_v59, 1 }
 0x1ba   : > { %1920 = vrot.lane.b32.xlu1 %v953_v54, %s5440_s16  ;;  %1922 = vrot.lane.b32.xlu0 %v918_v13, %s5440_s16  ;;  %v955_v54 = vsel %vm231_vm3, 0.0, %v934_v25  ;;  %v888_v25 = vrot.slane %v6731_v8, 1 }
 0x1bc   : > { %v7047_v40 = vpop.permute.xlu1 %1568  ;;  %v7056_v31 = vpop.permute.xlu0 %1574 }
 0x1bd   : > { %9998 = vst [vmem:[#allocation193_spill] sm:$0xff] %v7047_v40  ;;  %9999 = vst [vmem:[#allocation194_spill] sm:$0xff] %v7056_v31  ;;  %v904_v31 = vrot.slane %v6733_v63, 1 }
 0x1be   : > { %1796 = vrot.lane.b32.xlu1 %v6697_v46, %s5439_s15  ;;  %1798 = vrot.lane.b32.xlu0 %v6713_v56, %s5439_s15  ;;  %v935_v46 = vsel %vm464_vm2, %v903_v27, %v887_v9 }
 0x1bf   : > { %v920_v27 = vsel %vm464_vm2, %v888_v25, %v904_v31 }
 0x1c0   : > { %v7060_v52 = vpop.permute.xlu1 %1572  ;;  %v7067_v51 = vpop.permute.xlu0 %1578 }
 0x1c1   : > { %10000 = vst [vmem:[#allocation195_spill] sm:$0xff] %v7060_v52  ;;  %10001 = vst [vmem:[#allocation196_spill] sm:$0xff] %v7067_v51  ;;  %v907_v52 = vrot.slane %v6787_v32, 1 }
 0x1c2   : > { %1924 = vrot.lane.b32.xlu1 %v955_v54, %s5440_s16  ;;  %1926 = vrot.lane.b32.xlu0 %v919_v49, %s5440_s16  ;;  %v957_v54 = vsel %vm231_vm3, 0.0, %v935_v46  ;;  %v889_v46 = vrot.slane %v6749_v20, 1 }
 0x1c4   : > { %v7069_v13 = vpop.permute.xlu1 %1576  ;;  %v7078_v56 = vpop.permute.xlu0 %1582 }
 0x1c5   : > { %10002 = vst [vmem:[#allocation197_spill] sm:$0xff] %v7069_v13  ;;  %10003 = vst [vmem:[#allocation198_spill] sm:$0xff] %v7078_v56  ;;  %v905_v56 = vrot.slane %v6751_v29, 1 }
 0x1c6   : > { %1800 = vrot.lane.b32.xlu1 %v6715_v28, %s5439_s15  ;;  %1802 = vrot.lane.b32.xlu0 %v6731_v8, %s5439_s15  ;;  %v936_v28 = vsel %vm464_vm2, %v904_v31, %v888_v25 }
 0x1c7   : > { %v921_v31 = vsel %vm464_vm2, %v889_v46, %v905_v56 }
 0x1c8   : > { %v7082_v51 = vpop.permute.xlu1 %1580  ;;  %v7089_v9 = vpop.permute.xlu0 %1650 }
 0x1c9   : > { %10004 = vst [vmem:[#allocation199_spill] sm:$0xff] %v7082_v51 }
 0x1ca   : > { %1928 = vrot.lane.b32.xlu1 %v957_v54, %s5440_s16  ;;  %1930 = vrot.lane.b32.xlu0 %v920_v27, %s5440_s16  ;;  %v959_v54 = vsel %vm231_vm3, 0.0, %v936_v28  ;;  %v890_v28 = vrot.slane %v6767_v16, 1 }
 0x1cc   : > { %v7091_v49 = vpop.permute.xlu1 %1584  ;;  %v7100_v8 = vpop.permute.xlu0 %1654 }
 0x1cd   : > { %10005 = vst [vmem:[#allocation200_spill] sm:$0xff] %v7091_v49  ;;  %v906_v49 = vrot.slane %v6769_v30, 1 }
 0x1ce   : > { %1804 = vrot.lane.b32.xlu1 %v6733_v63, %s5439_s15  ;;  %1806 = vrot.lane.b32.xlu0 %v6749_v20, %s5439_s15  ;;  %v937_v63 = vsel %vm464_vm2, %v905_v56, %v889_v46 }
 0x1cf   : > { %v922_v56 = vsel %vm464_vm2, %v890_v28, %v906_v49 }
 0x1d0   : > { %v7104_v51 = vpop.permute.xlu1 %1652  ;;  %v7111_v25 = vpop.permute.xlu0 %1658 }
 0x1d2   : > { %1932 = vrot.lane.b32.xlu1 %v959_v54, %s5440_s16  ;;  %1934 = vrot.lane.b32.xlu0 %v921_v31, %s5440_s16  ;;  %v961_v54 = vsel %vm231_vm3, 0.0, %v937_v63  ;;  %v891_v63 = vrot.slane %v6785_v42, 1 }
 0x1d4   : > { %v7113_v27 = vpop.permute.xlu1 %1656  ;;  %v7122_v20 = vpop.permute.xlu0 %1662 }
 0x1d6   : > { %1808 = vrot.lane.b32.xlu1 %v6751_v29, %s5439_s15  ;;  %1810 = vrot.lane.b32.xlu0 %v6767_v16, %s5439_s15  ;;  %v938_v29 = vsel %vm464_vm2, %v906_v49, %v890_v28  ;;  %v923_v49 = vsel %vm464_vm2, %v891_v63, %v907_v52 }
 0x1d8   : > { %v7126_v13 = vpop.permute.xlu1 %1660  ;;  %v7133_v46 = vpop.permute.xlu0 %1666 }
 0x1da   : > { %1936 = vrot.lane.b32.xlu1 %v961_v54, %s5440_s16  ;;  %1938 = vrot.lane.b32.xlu0 %v922_v56, %s5440_s16  ;;  %v963_v54 = vsel %vm231_vm3, 0.0, %v938_v29  ;;  %v892_v29 = vrot.slane %v6803_v11, 1 }
 0x1dc   : > { %v7135_v31 = vpop.permute.xlu1 %1664  ;;  %v7144_v16 = vpop.permute.xlu0 %1670 }
 0x1de   : > { %1812 = vrot.lane.b32.xlu1 %v6769_v30, %s5439_s15  ;;  %1814 = vrot.lane.b32.xlu0 %v6785_v42, %s5439_s15  ;;  %v939_v30 = vsel %vm464_vm2, %v907_v52, %v891_v63  ;;  %v924_v52 = vsel %vm464_vm2, %v892_v29, %v908_v48 }
 0x1e0   : > { %v7148_v40 = vpop.permute.xlu1 %1668  ;;  %v7155_v28 = vpop.permute.xlu0 %1674 }
 0x1e2   : > { %1940 = vrot.lane.b32.xlu1 %v963_v54, %s5440_s16  ;;  %1942 = vrot.lane.b32.xlu0 %v923_v49, %s5440_s16  ;;  %v965_v54 = vsel %vm231_vm3, 0.0, %v939_v30  ;;  %v893_v30 = vrot.slane %v6821_v17, 1 }
 0x1e4   : > { %v7157_v56 = vpop.permute.xlu1 %1672  ;;  %v7166_v42 = vpop.permute.xlu0 %1678 }
 0x1e6   : > { %1816 = vrot.lane.b32.xlu1 %v6787_v32, %s5439_s15  ;;  %1818 = vrot.lane.b32.xlu0 %v6803_v11, %s5439_s15  ;;  %v940_v32 = vsel %vm464_vm2, %v908_v48, %v892_v29  ;;  %v925_v48 = vsel %vm464_vm2, %v893_v30, %v909_v34 }
 0x1e8   : > { %v7170_v10 = vpop.permute.xlu1 %1676  ;;  %v7177_v63 = vpop.permute.xlu0 %1682 }
 0x1e9   : > { %10006 = vst [vmem:[#allocation201_spill] sm:$0xff] %v7177_v63 }
 0x1ea   : > { %1944 = vrot.lane.b32.xlu1 %v965_v54, %s5440_s16  ;;  %1946 = vrot.lane.b32.xlu0 %v924_v52, %s5440_s16  ;;  %v967_v54 = vsel %vm231_vm3, 0.0, %v940_v32  ;;  %v894_v32 = vrot.slane %v6839_v12, 1 }
 0x1ec   : > { %v7179_v49 = vpop.permute.xlu1 %1680  ;;  %v7188_v11 = vpop.permute.xlu0 %1686 }
 0x1ed   : > { %10007 = vst [vmem:[#allocation202_spill] sm:$0xff] %v7188_v11  ;;  %v910_v11 = vrot.slane %v6841_v39, 1 }
 0x1ee   : > { %1820 = vrot.lane.b32.xlu1 %v6805_v59, %s5439_s15  ;;  %1822 = vrot.lane.b32.xlu0 %v6821_v17, %s5439_s15  ;;  %v941_v59 = vsel %vm464_vm2, %v909_v34, %v893_v30 }
 0x1ef   : > { %v926_v34 = vsel %vm464_vm2, %v894_v32, %v910_v11 }
 0x1f0   : > { %v7192_v63 = vpop.permute.xlu1 %1684  ;;  %v7199_v29 = vpop.permute.xlu0 %1690 }
 0x1f1   : > { %10008 = vst [vmem:[#allocation203_spill] sm:$0xff] %v7199_v29 }
 0x1f2   : > { %1948 = vrot.lane.b32.xlu1 %v967_v54, %s5440_s16  ;;  %1950 = vrot.lane.b32.xlu0 %v925_v48, %s5440_s16  ;;  %v969_v54 = vsel %vm231_vm3, 0.0, %v941_v59  ;;  %v895_v59 = vrot.slane %v6857_v6, 1 }
 0x1f4   : > { %v7201_v52 = vpop.permute.xlu1 %1688  ;;  %v7210_v17 = vpop.permute.xlu0 %1694 }
 0x1f5   : > { %10009 = vst [vmem:[#allocation204_spill] sm:$0xff] %v7210_v17  ;;  %v911_v17 = vrot.slane %v6859_v44, 1 }
 0x1f6   : > { %1824 = vrot.lane.b32.xlu1 %v6823_v36, %s5439_s15  ;;  %1826 = vrot.lane.b32.xlu0 %v6839_v12, %s5439_s15  ;;  %v942_v36 = vsel %vm464_vm2, %v910_v11, %v894_v32 }
 0x1f7   : > { %v927_v11 = vsel %vm464_vm2, %v895_v59, %v911_v17 }
 0x1f8   : > { %v7214_v29 = vpop.permute.xlu1 %1692  ;;  %v7221_v30 = vpop.permute.xlu0 %1698 }
 0x1f9   : > { %10010 = vst [vmem:[#allocation205_spill] sm:$0xff] %v7214_v29  ;;  %10011 = vst [vmem:[#allocation206_spill] sm:$0xff] %v7221_v30 }
 0x1fa   : > { %1952 = vrot.lane.b32.xlu1 %v969_v54, %s5440_s16  ;;  %1954 = vrot.lane.b32.xlu0 %v926_v34, %s5440_s16  ;;  %v971_v54 = vsel %vm231_vm3, 0.0, %v942_v36 }
 0x1fc   : > { %v7223_v48 = vpop.permute.xlu1 %1696  ;;  %v7232_v12 = vpop.permute.xlu0 %1702 }
 0x1fd   : > { %10012 = vst [vmem:[#allocation207_spill] sm:$0xff] %v7223_v48  ;;  %10013 = vst [vmem:[#allocation208_spill] sm:$0xff] %v7232_v12 }
 0x1fe   : > { %1828 = vrot.lane.b32.xlu1 %v6841_v39, %s5439_s15  ;;  %1830 = vrot.lane.b32.xlu0 %v6857_v6, %s5439_s15  ;;  %v943_v39 = vsel %vm464_vm2, %v911_v17, %v895_v59 }
 0x1ff   : > { %v973_v6 = vsel %vm231_vm3, 0.0, %v943_v39  ;;  %v10022_v39 = vld [vmem:[#allocation19_spill] sm:$0xff] }
 0x200   : > { %v7236_v30 = vpop.permute.xlu1 %1700  ;;  %v7243_v32 = vpop.permute.xlu0 %1706 }
 0x201   : > { %10014 = vst [vmem:[#allocation209_spill] sm:$0xff] %v7236_v30  ;;  %10015 = vst [vmem:[#allocation210_spill] sm:$0xff] %v7243_v32  ;;  %v10024_v30 = vld [vmem:[#allocation52_spill] sm:$0xff] }
 0x202   : > { %1956 = vrot.lane.b32.xlu1 %v971_v54, %s5440_s16  ;;  %1958 = vrot.lane.b32.xlu0 %v927_v11, %s5440_s16  ;;  %v5410_v54 = vld [vmem:[#allocation2 + $0x100] sm:$0xff]  ;;  %v10019_v11 = vld [vmem:[#allocation18_spill] sm:$0xff] }
 0x203   : > { %v400_v17 = vsel %vm228_vm4, 0.0, %v10019_v11  ;;  %v10025_v11 = vld [vmem:[#allocation58_spill] sm:$0xff] }
 0x204   : > { %v7245_v34 = vpop.permute.xlu1 %1704  ;;  %v7252_v36 = vpop.permute.xlu0 %1710  ;;  %v2004_v48 = vsel %vm232_vm0, %v10025_v11, %v10024_v30 }
 0x205   : > { %10016 = vst [vmem:[#allocation211_spill] sm:$0xff] %v7245_v34  ;;  %10017 = vst [vmem:[#allocation212_spill] sm:$0xff] %v7252_v36  ;;  %v2037_v29 = vsel %vm2034_vm6, %v2004_v48, %v6344_v14  ;;  %v10026_v48 = vld [vmem:[#allocation56_spill] sm:$0xff] }
 0x206   : > { %1832 = vrot.lane.b32.xlu1 %v6859_v44, %s5439_s15  ;;  %1834 = vrot.lane.b32.xlu0 %v5410_v54, %s5439_s15  ;;  %v10021_v44 = vld [vmem:[#allocation50_spill] sm:$0xff]  ;;  %v897_v54 = vrot.slane %v6887_v0, 1 }
 0x207   : > { %v2003_v36 = vsel %vm232_vm0, %v10022_v39, %v10021_v44 }
 0x208   : > { %v7256_v12 = vpop.permute.xlu1 %1708  ;;  %v1779_v32 = vpop.permute.xlu0 %1778 }
 0x209   : > { %10018 = vst [vmem:[#allocation213_spill] sm:$0xff] %v7256_v12  ;;  %v10023_v12 = vld [vmem:[#allocation47_spill] sm:$0xff] }
 0x20a   : > { %1960 = vrot.lane.b32.xlu1 %v973_v6, %s5440_s16  ;;  %1962 = vrot.lane.b32.xlu0 %v6642_v7, %s5440_s16  ;;  %v913_v6 = vrot.slane %v6889_v38, 1  ;;  %v2002_v34 = vsel %vm232_vm0, %v400_v17, %v10023_v12  ;;  %v5411_v7 = vld [vmem:[#allocation2 + $0x108] sm:$0xff] }
 0x20b   : > { %v2035_v39 = vsel %vm2034_vm6, %v2002_v34, %v6322_v22  ;;  %v10027_v34 = vld [vmem:[#allocation64_spill] sm:$0xff] }
 0x20c   : > { %v7263_v59 = vpop.permute.xlu1 %1712  ;;  %v1783_v44 = vpop.permute.xlu0 %1782  ;;  %v2068_v30 = vsel %vm2067_vm7, %v2035_v39, %v6486_v58  ;;  %v929_v58 = vsel %vm464_vm2, %v897_v54, %v913_v6 }
 0x20d   : > { %10020 = vst [vmem:[#allocation18_spill] sm:$0xff] %v7263_v59  ;;  %v2036_v59 = vsel %vm2034_vm6, %v2003_v36, %v6352_v15  ;;  %v2070_v15 = vsel %vm2067_vm7, %v2037_v29, %v6494_v60  ;;  %v2101_v22 = vsel %vm2100_vm8, %v2068_v30, %v6614_v57  ;;  %v10030_v30 = vld [vmem:[#allocation49_spill] sm:$0xff] }
 0x20e   : > { %1836 = vrot.lane.b32.xlu1 %v5411_v7, %s5439_s15  ;;  %v2069_v12 = vsel %vm2067_vm7, %v2036_v59, %v6496_v61  ;;  %1838 = vrot.lane.b32.xlu0 %v6887_v0, %s5439_s15  ;;  %v2103_v60 = vsel %vm2100_vm8, %v2070_v15, %v6628_v24  ;;  %v2134_v61 = vsel %vm2133_vm9, %v2101_v22, %v6897_v55  ;;  %v10028_v7 = vld [vmem:[#allocation54_spill] sm:$0xff] }
 0x20f   : > { %v2102_v36 = vsel %vm2100_vm8, %v2069_v12, %v6636_v53  ;;  %v2167_v57 = vsel %vm2166_vm10, %v2134_v61, %v7089_v9  ;;  %v2136_v24 = vsel %vm2133_vm9, %v2103_v60, %v6913_v35  ;;  %v2005_v59 = vsel %vm232_vm0, %v10027_v34, %v10026_v48  ;;  %v10038_v48 = vld [vmem:[#allocation144_spill] sm:$0xff] }
 0x210   : > { %v1781_v17 = vpop.permute.xlu1 %1780  ;;  %v2135_v14 = vsel %vm2133_vm9, %v2102_v36, %v6925_v37  ;;  %v1909_v0 = vpop.permute.xlu0 %1908  ;;  %v2200_v29 = vsel %vm2199_vm11, %v2167_v57, %v1779_v32  ;;  %v10031_v36 = vld [vmem:[#allocation142_spill] sm:$0xff]  ;;  %v10033_v57 = vld [vmem:[#allocation60_spill] sm:$0xff] }
 0x211   : > { %v2168_v53 = vsel %vm2166_vm10, %v2135_v14, %v7104_v51  ;;  %v945_v51 = vsel %vm464_vm2, %v913_v6, %v897_v54  ;;  %v2038_v54 = vsel %vm2034_vm6, %v2005_v59, %v6368_v3 }
 0x212   : > { %1964 = vrot.lane.b32.xlu1 %v6674_v43, %s5440_s16  ;;  %v2201_v37 = vsel %vm2199_vm11, %v2168_v53, %v1781_v17  ;;  %1966 = vrot.lane.b32.xlu0 %v929_v58, %s5440_s16  ;;  %v2169_v43 = vsel %vm2166_vm10, %v2136_v24, %v7100_v8  ;;  %v977_v6 = vsel %vm231_vm3, 0.0, %v945_v51  ;;  %v10032_v58 = vld [vmem:[#allocation48_spill] sm:$0xff] }
 0x213   : > { %v2202_v11 = vsel %vm2199_vm11, %v2169_v43, %v1783_v44  ;;  %v2234_v35 = vsel %vm2232_vm12, %v2201_v37, %v1909_v0  ;;  %v10029_v44 = vld [vmem:[#allocation62_spill] sm:$0xff]  ;;  %v10034_v37 = vld [vmem:[#allocation68_spill] sm:$0xff]  ;;  %v10036_v43 = vld [vmem:[#allocation57_spill] sm:$0xff] }
 0x214   : > { %v1907_v55 = vpop.permute.xlu1 %1906  ;;  %v1911_v32 = vpop.permute.xlu0 %1910  ;;  %v2006_v39 = vsel %vm232_vm0, %v10029_v44, %v10028_v7  ;;  %v2007_v24 = vsel %vm232_vm0, %v10034_v37, %v10033_v57  ;;  %v10049_v57 = vld [vmem:[#allocation117_spill] sm:$0xff] }
 0x215   : > { %v2233_v9 = vsel %vm2232_vm12, %v2200_v29, %v1907_v55  ;;  %v2235_v8 = vsel %vm2232_vm12, %v2202_v11, %v1911_v32  ;;  %v2039_v3 = vsel %vm2034_vm6, %v2006_v39, %v6366_v21  ;;  %v10039_v11 = vld [vmem:[#allocation115_spill] sm:$0xff]  ;;  %v10040_v32 = vld [vmem:[#allocation53_spill] sm:$0xff] }
 0x216   : > { %1840 = vrot.lane.b32.xlu1 %v6889_v38, %s5439_s15  ;;  %5271 = vmatprep.mubr.msk.f32.mxu0 %vm2277_vm13, %v2233_v9  ;;  %v2071_v38 = vsel %vm2067_vm7, %v2038_v54, %v6504_v1  ;;  %v2072_v17 = vsel %vm2067_vm7, %v2039_v3, %v10031_v36  ;;  %v10037_v9 = vld [vmem:[#allocation66_spill] sm:$0xff]  ;;  %v10042_v39 = vld [vmem:[#allocation51_spill] sm:$0xff] }
 0x217   : > { %5272 = vmatmul.mubr.msk.f32.vlgmr.msra.gmra.mrb[0].mxu0 %vm2277_vm13, %v2234_v35  ;;  %v2104_v15 = vsel %vm2100_vm8, %v2071_v38, %v10030_v30  ;;  %v2105_v1 = vsel %vm2100_vm8, %v2072_v17, %v10032_v58 }
 0x218   : > { %v1785_v12 = vpop.permute.xlu1 %1784  ;;  %5274 = vmatprep.mubr.msk.f32.mxu0 %vm2277_vm13, %v2235_v8  ;;  %v2137_v22 = vsel %vm2133_vm9, %v2104_v15, %v6934_v47  ;;  %v1787_v14 = vpop.permute.xlu0 %1786  ;;  %v2138_v21 = vsel %vm2133_vm9, %v2105_v1, %v6932_v23  ;;  %v10041_v8 = vld [vmem:[#allocation143_spill] sm:$0xff] }
 0x219   : > { %v2170_v60 = vsel %vm2166_vm10, %v2137_v22, %v7113_v27  ;;  %v2171_v0 = vsel %vm2166_vm10, %v2138_v21, %v7111_v25  ;;  %v10035_v27 = vld [vmem:[#allocation116_spill] sm:$0xff]  ;;  %v2008_v25 = vsel %vm232_vm0, %v10037_v9, %v10036_v43  ;;  %v10043_v22 = vld [vmem:[#allocation63_spill] sm:$0xff]  ;;  %v10046_v21 = vld [vmem:[#allocation61_spill] sm:$0xff] }
 0x21a   : > { %1968 = vrot.lane.b32.xlu1 %v977_v6, %s5440_s16  ;;  %v2203_v61 = vsel %vm2199_vm11, %v2170_v60, %v1785_v12  ;;  %v2204_v29 = vsel %vm2199_vm11, %v2171_v0, %v1787_v14  ;;  %v2040_v23 = vsel %vm2034_vm6, %v2007_v24, %v10035_v27  ;;  %v2041_v35 = vsel %vm2034_vm6, %v2008_v25, %v10039_v11  ;;  %v10050_v24 = vld [vmem:[#allocation59_spill] sm:$0xff] }
 0x21b   : > { %v2073_v34 = vsel %vm2067_vm7, %v2040_v23, %v10038_v48  ;;  %v2074_v6 = vsel %vm2067_vm7, %v2041_v35, %v10041_v8  ;;  %v10052_v43 = vld [vmem:[#allocation55_spill] sm:$0xff] }
 0x21c   : > { %v1913_v53 = vpop.permute.xlu1 %1912  ;;  %v1915_v55 = vpop.permute.xlu0 %1914  ;;  %v2106_v54 = vsel %vm2100_vm8, %v2073_v34, %v10040_v32  ;;  %v2107_v38 = vsel %vm2100_vm8, %v2074_v6, %v10042_v39  ;;  %v10053_v32 = vld [vmem:[#allocation67_spill] sm:$0xff]  ;;  %v10057_v39 = vld [vmem:[#allocation74_spill] sm:$0xff] }
 0x21d   : > { %v2236_v47 = vsel %vm2232_vm12, %v2203_v61, %v1913_v53  ;;  %v2237_v51 = vsel %vm2232_vm12, %v2204_v29, %v1915_v55  ;;  %v2139_v7 = vsel %vm2133_vm9, %v2106_v54, %v6950_v50  ;;  %v2140_v3 = vsel %vm2133_vm9, %v2107_v38, %v6943_v2  ;;  %v10044_v50 = vld [vmem:[#allocation72_spill] sm:$0xff]  ;;  %v10047_v61 = vld [vmem:[#allocation70_spill] sm:$0xff]  ;;  %v10051_v55 = vld [vmem:[#allocation145_spill] sm:$0xff] }
 0x21e   : > { %5275 = vmatmul.mubr.msk.f32.gmra.mrb[2].mxu0 %vm2277_vm13, %v2236_v47  ;;  %v2172_v12 = vsel %vm2166_vm10, %v2139_v7, %v7126_v13  ;;  %v2173_v36 = vsel %vm2166_vm10, %v2140_v3, %v7122_v20  ;;  %v2009_v14 = vsel %vm232_vm0, %v10044_v50, %v10043_v22  ;;  %v10045_v13 = vld [vmem:[#allocation118_spill] sm:$0xff]  ;;  %v2010_v20 = vsel %vm232_vm0, %v10047_v61, %v10046_v21  ;;  %v10058_v38 = vld [vmem:[#allocation148_spill] sm:$0xff]  ;;  %v10061_v22 = vld [vmem:[#allocation147_spill] sm:$0xff] }
 0x21f   : > { %5277 = vmatprep.mubr.msk.f32.mxu0 %vm2277_vm13, %v2237_v51  ;;  %v2042_v2 = vsel %vm2034_vm6, %v2009_v14, %v10045_v13  ;;  %v10048_v53 = vld [vmem:[#allocation146_spill] sm:$0xff]  ;;  %v2043_v37 = vsel %vm2034_vm6, %v2010_v20, %v10049_v57 }
 0x220   : > { %v1789_v59 = vpop.permute.xlu1 %1788  ;;  %v1791_v44 = vpop.permute.xlu0 %1790  ;;  %v2075_v0 = vsel %vm2067_vm7, %v2042_v2, %v10048_v53  ;;  %v2076_v27 = vsel %vm2067_vm7, %v2043_v37, %v10051_v55  ;;  %v10067_v55 = vld [vmem:[#allocation78_spill] sm:$0xff] }
 0x221   : > { %v2205_v30 = vsel %vm2199_vm11, %v2172_v12, %v1789_v59  ;;  %v2206_v58 = vsel %vm2199_vm11, %v2173_v36, %v1791_v44  ;;  %v2108_v29 = vsel %vm2100_vm8, %v2075_v0, %v10050_v24  ;;  %v2109_v9 = vsel %vm2100_vm8, %v2076_v27, %v10052_v43  ;;  %v10056_v44 = vld [vmem:[#allocation65_spill] sm:$0xff]  ;;  %v10063_v0 = vld [vmem:[#allocation71_spill] sm:$0xff]  ;;  %v10068_v27 = vld [vmem:[#allocation150_spill] sm:$0xff] }
 0x222   : > { %v2141_v23 = vsel %vm2133_vm9, %v2108_v29, %v6959_v33  ;;  %v2142_v48 = vsel %vm2133_vm9, %v2109_v9, %v6955_v4  ;;  %v10054_v33 = vld [vmem:[#allocation76_spill] sm:$0xff]  ;;  %v10060_v36 = vld [vmem:[#allocation161_spill] sm:$0xff] }
 0x223   : > { %v2174_v25 = vsel %vm2166_vm10, %v2141_v23, %v7135_v31  ;;  %v2175_v11 = vsel %vm2166_vm10, %v2142_v48, %v7133_v46  ;;  %v2011_v54 = vsel %vm232_vm0, %v10054_v33, %v10053_v32  ;;  %v10055_v31 = vld [vmem:[#allocation120_spill] sm:$0xff]  ;;  %v2012_v46 = vsel %vm232_vm0, %v10057_v39, %v10056_v44  ;;  %v10066_v29 = vld [vmem:[#allocation69_spill] sm:$0xff]  ;;  %v10072_v32 = vld [vmem:[#allocation162_spill] sm:$0xff] }
 0x224   : > { %v1917_v15 = vpop.permute.xlu1 %1916  ;;  %v1919_v1 = vpop.permute.xlu0 %1918  ;;  %v2044_v4 = vsel %vm2034_vm6, %v2011_v54, %v10055_v31  ;;  %v10069_v43 = vld [vmem:[#allocation121_spill] sm:$0xff]  ;;  %v10074_v39 = vld [vmem:[#allocation75_spill] sm:$0xff] }
 0x225   : > { %v2238_v17 = vsel %vm2232_vm12, %v2205_v30, %v1917_v15  ;;  %v2239_v60 = vsel %vm2232_vm12, %v2206_v58, %v1919_v1  ;;  %v2077_v12 = vsel %vm2067_vm7, %v2044_v4, %v10058_v38  ;;  %v10059_v30 = vld [vmem:[#allocation119_spill] sm:$0xff]  ;;  %v10062_v1 = vld [vmem:[#allocation37_spill] sm:$0xff] }
 0x226   : > { %5278 = vmatmul.mubr.msk.f32.gmra.mrb[4].mxu0 %vm2277_vm13, %v2238_v17  ;;  %v2045_v15 = vsel %vm2034_vm6, %v2012_v46, %v10059_v30  ;;  %v2110_v17 = vsel %vm2100_vm8, %v2077_v12, %v10060_v36  ;;  %v10078_v36 = vld [vmem:[#allocation82_spill] sm:$0xff] }
 0x227   : > { %5280 = vmatprep.mubr.msk.f32.mxu0 %vm2277_vm13, %v2239_v60  ;;  %v2078_v50 = vsel %vm2067_vm7, %v2045_v15, %v10061_v22  ;;  %v2143_v14 = vsel %vm2133_vm9, %v2110_v17, %v6973_v26  ;;  %v10064_v26 = vld [vmem:[#allocation80_spill] sm:$0xff]  ;;  %v10077_v15 = vld [vmem:[#allocation73_spill] sm:$0xff] }
 0x228   : > { %v1793_v47 = vpop.permute.xlu1 %1792  ;;  %v1795_v51 = vpop.permute.xlu0 %1794  ;;  %v2111_v13 = vsel %vm2100_vm8, %v2078_v50, %v10062_v1  ;;  %v2176_v2 = vsel %vm2166_vm10, %v2143_v14, %v7148_v40  ;;  %v10065_v40 = vld [vmem:[#allocation122_spill] sm:$0xff]  ;;  %v10079_v17 = vld [vmem:[#allocation152_spill] sm:$0xff]  ;;  %v10080_v14 = vld [vmem:[#allocation123_spill] sm:$0xff] }
 0x229   : > { %v2207_v34 = vsel %vm2199_vm11, %v2174_v25, %v1793_v47  ;;  %v2208_v8 = vsel %vm2199_vm11, %v2175_v11, %v1795_v51  ;;  %v2144_v60 = vsel %vm2133_vm9, %v2111_v13, %v6969_v62  ;;  %v2013_v47 = vsel %vm232_vm0, %v10064_v26, %v10063_v0  ;;  %v10070_v25 = vld [vmem:[#allocation163_spill] sm:$0xff]  ;;  %v10081_v1 = vld [vmem:[#allocation165_spill] sm:$0xff]  ;;  %v10084_v26 = vld [vmem:[#allocation184_spill] sm:$0xff] }
 0x22a   : > { %v2177_v20 = vsel %vm2166_vm10, %v2144_v60, %v7144_v16  ;;  %v2046_v62 = vsel %vm2034_vm6, %v2013_v47, %v10065_v40  ;;  %v2014_v16 = vsel %vm232_vm0, %v10067_v55, %v10066_v29 }
 0x22b   : > { %v2079_v23 = vsel %vm2067_vm7, %v2046_v62, %v10068_v27  ;;  %v2047_v9 = vsel %vm2034_vm6, %v2014_v16, %v10069_v43  ;;  %v10089_v43 = vld [vmem:[#allocation86_spill] sm:$0xff] }
 0x22c   : > { %v1921_v59 = vpop.permute.xlu1 %1920  ;;  %v1923_v6 = vpop.permute.xlu0 %1922  ;;  %v2112_v48 = vsel %vm2100_vm8, %v2079_v23, %v10070_v25 }
 0x22d   : > { %v2240_v35 = vsel %vm2232_vm12, %v2207_v34, %v1921_v59  ;;  %v2241_v7 = vsel %vm2232_vm12, %v2208_v8, %v1923_v6  ;;  %v10071_v34 = vld [vmem:[#allocation149_spill] sm:$0xff]  ;;  %v2145_v11 = vsel %vm2133_vm9, %v2112_v48, %v6981_v41  ;;  %v10073_v8 = vld [vmem:[#allocation183_spill] sm:$0xff]  ;;  %v10075_v41 = vld [vmem:[#allocation84_spill] sm:$0xff] }
 0x22e   : > { %5281 = vmatmul.mubr.msk.f32.gmra.mrb[6].mxu0 %vm2277_vm13, %v2240_v35  ;;  %v2080_v59 = vsel %vm2067_vm7, %v2047_v9, %v10071_v34  ;;  %v2178_v54 = vsel %vm2166_vm10, %v2145_v11, %v7157_v56  ;;  %v2015_v46 = vsel %vm232_vm0, %v10075_v41, %v10074_v39  ;;  %v10076_v56 = vld [vmem:[#allocation124_spill] sm:$0xff]  ;;  %v10090_v9 = vld [vmem:[#allocation154_spill] sm:$0xff]  ;;  %v10091_v34 = vld [vmem:[#allocation125_spill] sm:$0xff] }
 0x22f   : > { %5283 = vmatprep.mubr.msk.f32.mxu0 %vm2277_vm13, %v2241_v7  ;;  %v2113_v33 = vsel %vm2100_vm8, %v2080_v59, %v10072_v32  ;;  %v10092_v11 = vld [vmem:[#allocation167_spill] sm:$0xff]  ;;  %v10093_v32 = vld [vmem:[#allocation153_spill] sm:$0xff] }
 0x230   : > { %v1797_v3 = vpop.permute.xlu1 %1796  ;;  %v1799_v58 = vpop.permute.xlu0 %1798  ;;  %v2146_v6 = vsel %vm2133_vm9, %v2113_v33, %v10073_v8 }
 0x231   : > { %v2209_v21 = vsel %vm2199_vm11, %v2176_v2, %v1797_v3  ;;  %v2210_v57 = vsel %vm2199_vm11, %v2177_v20, %v1799_v58  ;;  %v2179_v7 = vsel %vm2166_vm10, %v2146_v6, %v7155_v28  ;;  %v2048_v3 = vsel %vm2034_vm6, %v2015_v46, %v10076_v56  ;;  %v10082_v2 = vld [vmem:[#allocation151_spill] sm:$0xff]  ;;  %v10083_v20 = vld [vmem:[#allocation164_spill] sm:$0xff]  ;;  %v10094_v6 = vld [vmem:[#allocation166_spill] sm:$0xff] }
 0x232   : > { %v2016_v28 = vsel %vm232_vm0, %v10078_v36, %v10077_v15  ;;  %v2081_v22 = vsel %vm2067_vm7, %v2048_v3, %v10079_v17  ;;  %v10096_v46 = vld [vmem:[#allocation201_spill] sm:$0xff]  ;;  %v10097_v56 = vld [vmem:[#allocation83_spill] sm:$0xff] }
 0x233   : > { %v2049_v58 = vsel %vm2034_vm6, %v2016_v28, %v10080_v14  ;;  %v2114_v13 = vsel %vm2100_vm8, %v2081_v22, %v10081_v1  ;;  %v10100_v17 = vld [vmem:[#allocation81_spill] sm:$0xff]  ;;  %v10101_v22 = vld [vmem:[#allocation90_spill] sm:$0xff]  ;;  %v10102_v14 = vld [vmem:[#allocation156_spill] sm:$0xff] }
 0x234   : > { %v1925_v61 = vpop.permute.xlu1 %1924  ;;  %v1927_v37 = vpop.permute.xlu0 %1926  ;;  %v2082_v60 = vsel %vm2067_vm7, %v2049_v58, %v10082_v2 }
 0x235   : > { %v2242_v53 = vsel %vm2232_vm12, %v2209_v21, %v1925_v61  ;;  %v2243_v24 = vsel %vm2232_vm12, %v2210_v57, %v1927_v37  ;;  %v2147_v21 = vsel %vm2133_vm9, %v2114_v13, %v6994_v19  ;;  %v10086_v19 = vld [vmem:[#allocation88_spill] sm:$0xff]  ;;  %v10103_v13 = vld [vmem:[#allocation127_spill] sm:$0xff] }
 0x236   : > { %5284 = vmatmul.mubr.msk.f32.gmra.mrb[8].mxu0 %vm2277_vm13, %v2242_v53  ;;  %v2115_v53 = vsel %vm2100_vm8, %v2082_v60, %v10083_v20  ;;  %v2180_v0 = vsel %vm2166_vm10, %v2147_v21, %v7170_v10  ;;  %v10087_v10 = vld [vmem:[#allocation126_spill] sm:$0xff]  ;;  %v10104_v60 = vld [vmem:[#allocation169_spill] sm:$0xff] }
 0x237   : > { %5286 = vmatprep.mubr.msk.f32.mxu0 %vm2277_vm13, %v2243_v24  ;;  %v2148_v47 = vsel %vm2133_vm9, %v2115_v53, %v10084_v26  ;;  %v10085_v24 = vld [vmem:[#allocation79_spill] sm:$0xff] }
 0x238   : > { %v1801_v51 = vpop.permute.xlu1 %1800  ;;  %v1803_v35 = vpop.permute.xlu0 %1802  ;;  %v2181_v40 = vsel %vm2166_vm10, %v2148_v47, %v7166_v42  ;;  %v2017_v29 = vsel %vm232_vm0, %v10086_v19, %v10085_v24  ;;  %v10106_v53 = vld [vmem:[#allocation187_spill] sm:$0xff]  ;;  %v10107_v47 = vld [vmem:[#allocation168_spill] sm:$0xff] }
 0x239   : > { %v2211_v31 = vsel %vm2199_vm11, %v2178_v54, %v1801_v51  ;;  %v2212_v38 = vsel %vm2199_vm11, %v2179_v7, %v1803_v35  ;;  %v2050_v27 = vsel %vm2034_vm6, %v2017_v29, %v10087_v10  ;;  %v10088_v51 = vld [vmem:[#allocation77_spill] sm:$0xff]  ;;  %v10109_v29 = vld [vmem:[#allocation202_spill] sm:$0xff]  ;;  %v10110_v10 = vld [vmem:[#allocation87_spill] sm:$0xff] }
 0x23a   : > { %v2018_v42 = vsel %vm232_vm0, %v10089_v43, %v10088_v51  ;;  %v2083_v25 = vsel %vm2067_vm7, %v2050_v27, %v10090_v9  ;;  %v10095_v7 = vld [vmem:[#allocation185_spill] sm:$0xff]  ;;  %v10111_v27 = vld [vmem:[#allocation96_spill] sm:$0xff] }
 0x23b   : > { %v2051_v59 = vsel %vm2034_vm6, %v2018_v42, %v10091_v34  ;;  %v2116_v35 = vsel %vm2100_vm8, %v2083_v25, %v10092_v11  ;;  %v10113_v25 = vld [vmem:[#allocation85_spill] sm:$0xff] }
 0x23c   : > { %v1929_v4 = vpop.permute.xlu1 %1928  ;;  %v1931_v12 = vpop.permute.xlu0 %1930  ;;  %v2084_v33 = vsel %vm2067_vm7, %v2051_v59, %v10093_v32  ;;  %v2149_v54 = vsel %vm2133_vm9, %v2116_v35, %v7003_v18  ;;  %v10098_v18 = vld [vmem:[#allocation92_spill] sm:$0xff]  ;;  %v10115_v59 = vld [vmem:[#allocation158_spill] sm:$0xff]  ;;  %v10116_v32 = vld [vmem:[#allocation129_spill] sm:$0xff] }
 0x23d   : > { %v2244_v44 = vsel %vm2232_vm12, %v2211_v31, %v1929_v4  ;;  %v2245_v30 = vsel %vm2232_vm12, %v2212_v38, %v1931_v12  ;;  %v2117_v31 = vsel %vm2100_vm8, %v2084_v33, %v10094_v6  ;;  %v2182_v4 = vsel %vm2166_vm10, %v2149_v54, %v7179_v49  ;;  %v10099_v49 = vld [vmem:[#allocation128_spill] sm:$0xff]  ;;  %v10117_v54 = vld [vmem:[#allocation171_spill] sm:$0xff]  ;;  %v10118_v6 = vld [vmem:[#allocation157_spill] sm:$0xff] }
 0x23e   : > { %5287 = vmatmul.mubr.msk.f32.gmra.mrb[10].mxu0 %vm2277_vm13, %v2244_v44  ;;  %v2150_v44 = vsel %vm2133_vm9, %v2117_v31, %v10095_v7  ;;  %v2019_v3 = vsel %vm232_vm0, %v10098_v18, %v10097_v56 }
 0x23f   : > { %5289 = vmatprep.mubr.msk.f32.mxu0 %vm2277_vm13, %v2245_v30  ;;  %v2183_v38 = vsel %vm2166_vm10, %v2150_v44, %v10096_v46  ;;  %v2052_v36 = vsel %vm2034_vm6, %v2019_v3, %v10099_v49  ;;  %v10122_v3 = vld [vmem:[#allocation203_spill] sm:$0xff] }
 0x240   : > { %v1805_v50 = vpop.permute.xlu1 %1804  ;;  %v1807_v61 = vpop.permute.xlu0 %1806  ;;  %v2085_v58 = vsel %vm2067_vm7, %v2052_v36, %v10102_v14  ;;  %v10123_v49 = vld [vmem:[#allocation91_spill] sm:$0xff]  ;;  %v10124_v36 = vld [vmem:[#allocation100_spill] sm:$0xff] }
 0x241   : > { %v2213_v57 = vsel %vm2199_vm11, %v2180_v0, %v1805_v50  ;;  %v2214_v55 = vsel %vm2199_vm11, %v2181_v40, %v1807_v61  ;;  %v2020_v50 = vsel %vm232_vm0, %v10101_v22, %v10100_v17  ;;  %v2118_v21 = vsel %vm2100_vm8, %v2085_v58, %v10104_v60  ;;  %v10105_v61 = vld [vmem:[#allocation155_spill] sm:$0xff]  ;;  %v10108_v40 = vld [vmem:[#allocation186_spill] sm:$0xff]  ;;  %v10126_v58 = vld [vmem:[#allocation89_spill] sm:$0xff] }
 0x242   : > { %v2053_v2 = vsel %vm2034_vm6, %v2020_v50, %v10103_v13  ;;  %v2151_v0 = vsel %vm2133_vm9, %v2118_v21, %v10106_v53  ;;  %v10130_v53 = vld [vmem:[#allocation173_spill] sm:$0xff] }
 0x243   : > { %v2086_v20 = vsel %vm2067_vm7, %v2053_v2, %v10105_v61  ;;  %v10128_v2 = vld [vmem:[#allocation160_spill] sm:$0xff]  ;;  %v10129_v61 = vld [vmem:[#allocation131_spill] sm:$0xff] }
 0x244   : > { %v1933_v37 = vpop.permute.xlu1 %1932  ;;  %v1935_v16 = vpop.permute.xlu0 %1934 }
 0x245   : > { %v2246_v62 = vsel %vm2232_vm12, %v2213_v57, %v1933_v37  ;;  %v2247_v23 = vsel %vm2232_vm12, %v2214_v55, %v1935_v16  ;;  %v2119_v57 = vsel %vm2100_vm8, %v2086_v20, %v10107_v47  ;;  %v2184_v37 = vsel %vm2166_vm10, %v2151_v0, %v7192_v63  ;;  %v10112_v63 = vld [vmem:[#allocation130_spill] sm:$0xff] }
 0x246   : > { %5290 = vmatmul.mubr.msk.f32.gmra.mrb[12].mxu0 %vm2277_vm13, %v2246_v62  ;;  %v2152_v62 = vsel %vm2133_vm9, %v2119_v57, %v10108_v40  ;;  %v10132_v57 = vld [vmem:[#allocation191_spill] sm:$0xff] }
 0x247   : > { %5292 = vmatprep.mubr.msk.f32.mxu0 %vm2277_vm13, %v2247_v23  ;;  %v2185_v55 = vsel %vm2166_vm10, %v2152_v62, %v10109_v29  ;;  %v2021_v23 = vsel %vm232_vm0, %v10111_v27, %v10110_v10  ;;  %v10133_v62 = vld [vmem:[#allocation172_spill] sm:$0xff] }
 0x248   : > { %v1809_v48 = vpop.permute.xlu1 %1808  ;;  %v1811_v8 = vpop.permute.xlu0 %1810  ;;  %v2054_v42 = vsel %vm2034_vm6, %v2021_v23, %v10112_v63  ;;  %v10136_v23 = vld [vmem:[#allocation204_spill] sm:$0xff]  ;;  %v10137_v63 = vld [vmem:[#allocation95_spill] sm:$0xff] }
 0x249   : > { %v2215_v39 = vsel %vm2199_vm11, %v2182_v4, %v1809_v48  ;;  %v2216_v30 = vsel %vm2199_vm11, %v2183_v38, %v1811_v8  ;;  %v10114_v48 = vld [vmem:[#allocation94_spill] sm:$0xff]  ;;  %v2087_v11 = vsel %vm2067_vm7, %v2054_v42, %v10115_v59  ;;  %v10119_v4 = vld [vmem:[#allocation189_spill] sm:$0xff]  ;;  %v10121_v38 = vld [vmem:[#allocation188_spill] sm:$0xff] }
 0x24a   : > { %v2022_v34 = vsel %vm232_vm0, %v10114_v48, %v10113_v25  ;;  %v2120_v8 = vsel %vm2100_vm8, %v2087_v11, %v10117_v54  ;;  %v10138_v42 = vld [vmem:[#allocation104_spill] sm:$0xff]  ;;  %v10142_v54 = vld [vmem:[#allocation39_spill] sm:$0xff] }
 0x24b   : > { %v2055_v33 = vsel %vm2034_vm6, %v2022_v34, %v10116_v32  ;;  %v2153_v7 = vsel %vm2133_vm9, %v2120_v8, %v10119_v4  ;;  %v10139_v34 = vld [vmem:[#allocation134_spill] sm:$0xff] }
 0x24c   : > { %v1937_v41 = vpop.permute.xlu1 %1936  ;;  %v1939_v15 = vpop.permute.xlu0 %1938  ;;  %v2088_v31 = vsel %vm2067_vm7, %v2055_v33, %v10118_v6  ;;  %v2186_v46 = vsel %vm2166_vm10, %v2153_v7, %v7201_v52  ;;  %v10125_v52 = vld [vmem:[#allocation132_spill] sm:$0xff]  ;;  %v10141_v32 = vld [vmem:[#allocation102_spill] sm:$0xff]  ;;  %v10144_v7 = vld [vmem:[#allocation175_spill] sm:$0xff] }
 0x24d   : > { %v2248_v12 = vsel %vm2232_vm12, %v2215_v39, %v1937_v41  ;;  %v2249_v28 = vsel %vm2232_vm12, %v2216_v30, %v1939_v15  ;;  %v10120_v39 = vld [vmem:[#allocation170_spill] sm:$0xff] }
 0x24e   : > { %5293 = vmatmul.mubr.msk.f32.gmra.mrb[14].mxu0 %vm2277_vm13, %v2248_v12  ;;  %v2121_v41 = vsel %vm2100_vm8, %v2088_v31, %v10120_v39  ;;  %v10143_v31 = vld [vmem:[#allocation133_spill] sm:$0xff]  ;;  %v10145_v39 = vld [vmem:[#allocation38_spill] sm:$0xff] }
 0x24f   : > { %5295 = vmatprep.mubr.msk.f32.mxu0 %vm2277_vm13, %v2249_v28  ;;  %v2154_v12 = vsel %vm2133_vm9, %v2121_v41, %v10121_v38  ;;  %v2023_v28 = vsel %vm232_vm0, %v10124_v36, %v10123_v49 }
 0x250   : > { %v1813_v1 = vpop.permute.xlu1 %1812  ;;  %v1815_v26 = vpop.permute.xlu0 %1814  ;;  %v2187_v30 = vsel %vm2166_vm10, %v2154_v12, %v10122_v3  ;;  %v2056_v50 = vsel %vm2034_vm6, %v2023_v28, %v10125_v52  ;;  %v10148_v3 = vld [vmem:[#allocation207_spill] sm:$0xff] }
 0x251   : > { %v2217_v24 = vsel %vm2199_vm11, %v2184_v37, %v1813_v1  ;;  %v2218_v51 = vsel %vm2199_vm11, %v2185_v55, %v1815_v26  ;;  %v10127_v1 = vld [vmem:[#allocation98_spill] sm:$0xff]  ;;  %v2089_v60 = vsel %vm2067_vm7, %v2056_v50, %v10128_v2  ;;  %v10131_v26 = vld [vmem:[#allocation159_spill] sm:$0xff]  ;;  %v10153_v2 = vld [vmem:[#allocation136_spill] sm:$0xff] }
 0x252   : > { %v2024_v13 = vsel %vm232_vm0, %v10127_v1, %v10126_v58  ;;  %v2122_v0 = vsel %vm2100_vm8, %v2089_v60, %v10130_v53  ;;  %v10135_v55 = vld [vmem:[#allocation190_spill] sm:$0xff]  ;;  %v10151_v50 = vld [vmem:[#allocation99_spill] sm:$0xff] }
 0x253   : > { %v2057_v20 = vsel %vm2034_vm6, %v2024_v13, %v10129_v61  ;;  %v2155_v37 = vsel %vm2133_vm9, %v2122_v0, %v10132_v57  ;;  %v10154_v61 = vld [vmem:[#allocation97_spill] sm:$0xff]  ;;  %v10157_v57 = vld [vmem:[#allocation135_spill] sm:$0xff] }
 0x254   : > { %v1941_v19 = vpop.permute.xlu1 %1940  ;;  %v1943_v43 = vpop.permute.xlu0 %1942  ;;  %v2090_v47 = vsel %vm2067_vm7, %v2057_v20, %v10131_v26  ;;  %v10155_v20 = vld [vmem:[#allocation106_spill] sm:$0xff]  ;;  %v10156_v0 = vld [vmem:[#allocation41_spill] sm:$0xff] }
 0x255   : > { %v2250_v16 = vsel %vm2232_vm12, %v2217_v24, %v1941_v19  ;;  %v2251_v9 = vsel %vm2232_vm12, %v2218_v51, %v1943_v43  ;;  %v2123_v24 = vsel %vm2100_vm8, %v2090_v47, %v10133_v62  ;;  %v10134_v19 = vld [vmem:[#allocation205_spill] sm:$0xff]  ;;  %v2028_v53 = vsel %vm232_vm0, %v10155_v20, %v10154_v61  ;;  %v10179_v61 = vld [vmem:[#allocation107_spill] sm:$0xff] }
 0x256   : > { %5296 = vmatmul.mubr.msk.f32.gmra.mrb[16].mxu0 %vm2277_vm13, %v2250_v16  ;;  %v2188_v29 = vsel %vm2166_vm10, %v2155_v37, %v10134_v19  ;;  %v2156_v16 = vsel %vm2133_vm9, %v2123_v24, %v10135_v55  ;;  %v2061_v37 = vsel %vm2034_vm6, %v2028_v53, %v10157_v57  ;;  %v10159_v24 = vld [vmem:[#allocation40_spill] sm:$0xff]  ;;  %v10180_v20 = vld [vmem:[#allocation113_spill] sm:$0xff] }
 0x257   : > { %5298 = vmatprep.mubr.msk.f32.mxu0 %vm2277_vm13, %v2251_v9  ;;  %v2189_v51 = vsel %vm2166_vm10, %v2156_v16, %v10136_v23  ;;  %v2025_v9 = vsel %vm232_vm0, %v10138_v42, %v10137_v63  ;;  %v2094_v19 = vsel %vm2067_vm7, %v2061_v37, %v10159_v24  ;;  %v7709_v63 = vld [vmem:[#allocation2] sm:$0xff]  ;;  %v10163_v42 = vld [vmem:[#allocation194_spill] sm:$0xff]  ;;  %v2031_v53 = vsel %vm232_vm0, %v10180_v20, %v10179_v61 }
 0x258   : > { %v1817_v35 = vpop.permute.xlu1 %1816  ;;  %v1819_v44 = vpop.permute.xlu0 %1818  ;;  %v2058_v59 = vsel %vm2034_vm6, %v2025_v9, %v10139_v34  ;;  %3371 = vrot.lane.b32.xlu0 %v7709_v63, %s5433_s24  ;;  %v10164_v34 = vld [vmem:[#allocation208_spill] sm:$0xff]  ;;  %v7818_v61 = vld [vmem:[%s9679_s2] ss:$0 sm:$0xff] }
 0x259   : > { %v2219_v56 = vsel %vm2199_vm11, %v2186_v46, %v1817_v35  ;;  %v2220_v17 = vsel %vm2199_vm11, %v2187_v30, %v1819_v44  ;;  %v10140_v35 = vld [vmem:[#allocation93_spill] sm:$0xff]  ;;  %v2091_v8 = vsel %vm2067_vm7, %v2058_v59, %v10142_v54 }
 0x25a   : > { %v2026_v33 = vsel %vm232_vm0, %v10141_v32, %v10140_v35  ;;  %v2124_v44 = vsel %vm2100_vm8, %v2091_v8, %v10144_v7  ;;  %v10146_v46 = vld [vmem:[#allocation193_spill] sm:$0xff]  ;;  %v10165_v35 = vld [vmem:[#allocation103_spill] sm:$0xff] }
 0x25b   : > { %v2059_v4 = vsel %vm2034_vm6, %v2026_v33, %v10143_v31  ;;  %v2157_v38 = vsel %vm2133_vm9, %v2124_v44, %v10146_v46  ;;  %v10166_v32 = vld [vmem:[#allocation111_spill] sm:$0xff]  ;;  %v10168_v7 = vld [vmem:[#allocation101_spill] sm:$0xff] }
 0x25c   : > { %v1945_v18 = vpop.permute.xlu1 %1944  ;;  %v1947_v22 = vpop.permute.xlu0 %1946  ;;  %v2092_v41 = vsel %vm2067_vm7, %v2059_v4, %v10145_v39  ;;  %v2190_v30 = vsel %vm2166_vm10, %v2157_v38, %v10148_v3  ;;  %v2029_v33 = vsel %vm232_vm0, %v10166_v32, %v10165_v35  ;;  %v10169_v44 = vld [vmem:[#allocation109_spill] sm:$0xff]  ;;  %v10191_v32 = vld [vmem:[#allocation198_spill] sm:$0xff] }
 0x25d   : > { %v2252_v15 = vsel %vm2232_vm12, %v2219_v56, %v1945_v18  ;;  %v2253_v14 = vsel %vm2232_vm12, %v2220_v17, %v1947_v22  ;;  %v10147_v56 = vld [vmem:[#allocation174_spill] sm:$0xff]  ;;  %v2030_v39 = vsel %vm232_vm0, %v10169_v44, %v10168_v7 }
 0x25e   : > { %5299 = vmatmul.mubr.msk.f32.gmra.mrb[18].mxu0 %vm2277_vm13, %v2252_v15  ;;  %v2125_v18 = vsel %vm2100_vm8, %v2092_v41, %v10147_v56  ;;  %v10149_v15 = vld [vmem:[#allocation192_spill] sm:$0xff]  ;;  %v10150_v17 = vld [vmem:[#allocation206_spill] sm:$0xff]  ;;  %v10170_v41 = vld [vmem:[#allocation43_spill] sm:$0xff] }
 0x25f   : > { %5301 = vmatprep.mubr.msk.f32.mxu0 %vm2277_vm13, %v2253_v14  ;;  %v2158_v49 = vsel %vm2133_vm9, %v2125_v18, %v10149_v15  ;;  %v10152_v14 = vld [vmem:[#allocation108_spill] sm:$0xff]  ;;  %v10172_v18 = vld [vmem:[#allocation179_spill] sm:$0xff]  ;;  %v10193_v7 = vld [vmem:[#allocation110_spill] sm:$0xff] }
 0x260   : > { %v1821_v21 = vpop.permute.xlu1 %1820  ;;  %v1823_v40 = vpop.permute.xlu0 %1822  ;;  %v2191_v22 = vsel %vm2166_vm10, %v2158_v49, %v10150_v17  ;;  %v2027_v58 = vsel %vm232_vm0, %v10152_v14, %v10151_v50  ;;  %v10174_v49 = vld [vmem:[#allocation197_spill] sm:$0xff]  ;;  %v10175_v17 = vld [vmem:[#allocation178_spill] sm:$0xff]  ;;  %v10177_v14 = vld [vmem:[#allocation196_spill] sm:$0xff] }
 0x261   : > { %v2221_v10 = vsel %vm2199_vm11, %v2188_v29, %v1821_v21  ;;  %v2222_v25 = vsel %vm2199_vm11, %v2189_v51, %v1823_v40  ;;  %v2060_v60 = vsel %vm2034_vm6, %v2027_v58, %v10153_v2  ;;  %v10158_v40 = vld [vmem:[#allocation177_spill] sm:$0xff]  ;;  %v10160_v29 = vld [vmem:[#allocation195_spill] sm:$0xff]  ;;  %v10178_v2 = vld [vmem:[#allocation210_spill] sm:$0xff] }
 0x262   : > { %v2093_v26 = vsel %vm2067_vm7, %v2060_v60, %v10156_v0  ;;  %v10162_v51 = vld [vmem:[#allocation209_spill] sm:$0xff]  ;;  %v10194_v44 = vld [vmem:[#allocation114_spill] sm:$0xff] }
 0x263   : > { %v2126_v62 = vsel %vm2100_vm8, %v2093_v26, %v10158_v40  ;;  %v10182_v40 = vld [vmem:[#allocation105_spill] sm:$0xff] }
 0x264   : > { %v1949_v27 = vpop.permute.xlu1 %1948  ;;  %v1951_v48 = vpop.permute.xlu0 %1950  ;;  %v2159_v55 = vsel %vm2133_vm9, %v2126_v62, %v10160_v29  ;;  %v10183_v62 = vld [vmem:[#allocation112_spill] sm:$0xff] }
 0x265   : > { %v2254_v43 = vsel %vm2232_vm12, %v2221_v10, %v1949_v27  ;;  %v2255_v11 = vsel %vm2232_vm12, %v2222_v25, %v1951_v48  ;;  %v7701_v10 = vld [vmem:[#allocation2 + $0x8] sm:$0xff]  ;;  %v2032_v24 = vsel %vm232_vm0, %v10183_v62, %v10182_v40 }
 0x266   : > { %5302 = vmatmul.mubr.msk.f32.gmra.mrb[20].mxu0 %vm2277_vm13, %v2254_v43  ;;  %v10161_v27 = vld [vmem:[#allocation176_spill] sm:$0xff]  ;;  %v2192_v43 = vsel %vm2166_vm10, %v2159_v55, %v10162_v51  ;;  %3373 = vrot.lane.b32.xlu1 %v7701_v10, %s5433_s24 }
 0x267   : > { %5304 = vmatprep.mubr.msk.f32.mxu0 %vm2277_vm13, %v2255_v11  ;;  %v2127_v23 = vsel %vm2100_vm8, %v2094_v19, %v10161_v27  ;;  %v10184_v19 = vld [vmem:[#allocation45_spill] sm:$0xff] }
 0x268   : > { %v1825_v6 = vpop.permute.xlu1 %1824  ;;  %v1827_v12 = vpop.permute.xlu0 %1826  ;;  %v2160_v9 = vsel %vm2133_vm9, %v2127_v23, %v10163_v42  ;;  %v10186_v23 = vld [vmem:[#allocation181_spill] sm:$0xff] }
 0x269   : > { %v2223_v36 = vsel %vm2199_vm11, %v2190_v30, %v1825_v6  ;;  %v2224_v1 = vsel %vm2199_vm11, %v2191_v22, %v1827_v12  ;;  %v2193_v59 = vsel %vm2166_vm10, %v2160_v9, %v10164_v34  ;;  %v10167_v6 = vld [vmem:[#allocation138_spill] sm:$0xff]  ;;  %v10171_v12 = vld [vmem:[#allocation137_spill] sm:$0xff]  ;;  %v10188_v9 = vld [vmem:[#allocation199_spill] sm:$0xff] }
 0x26a   : > { %v2062_v31 = vsel %vm2034_vm6, %v2029_v33, %v10167_v6  ;;  %v2063_v56 = vsel %vm2034_vm6, %v2030_v39, %v10171_v12  ;;  %v10173_v30 = vld [vmem:[#allocation42_spill] sm:$0xff]  ;;  %v10189_v34 = vld [vmem:[#allocation180_spill] sm:$0xff]  ;;  %v2033_v39 = vsel %vm232_vm0, %v10194_v44, %v10193_v7 }
 0x26b   : > { %v2095_v46 = vsel %vm2067_vm7, %v2062_v31, %v10170_v41  ;;  %v2096_v15 = vsel %vm2067_vm7, %v2063_v56, %v10173_v30  ;;  %v10192_v6 = vld [vmem:[#allocation212_spill] sm:$0xff] }
 0x26c   : > { %v1953_v28 = vpop.permute.xlu1 %1952  ;;  %v1955_v13 = vpop.permute.xlu0 %1954  ;;  %v2128_v3 = vsel %vm2100_vm8, %v2095_v46, %v10172_v18  ;;  %v2129_v22 = vsel %vm2100_vm8, %v2096_v15, %v10175_v17  ;;  %v10196_v18 = vld [vmem:[#allocation46_spill] sm:$0xff] }
 0x26d   : > { %v2256_v52 = vsel %vm2232_vm12, %v2223_v36, %v1953_v28  ;;  %v2257_v21 = vsel %vm2232_vm12, %v2224_v1, %v1955_v13  ;;  %v2161_v36 = vsel %vm2133_vm9, %v2128_v3, %v10174_v49  ;;  %v2162_v58 = vsel %vm2133_vm9, %v2129_v22, %v10177_v14  ;;  %v10197_v15 = vld [vmem:[#allocation182_spill] sm:$0xff] }
 0x26e   : > { %5305 = vmatmul.mubr.msk.f32.gmra.mrb[22].mxu0 %vm2277_vm13, %v2256_v52  ;;  %v10176_v52 = vld [vmem:[#allocation211_spill] sm:$0xff]  ;;  %v2195_v60 = vsel %vm2166_vm10, %v2162_v58, %v10178_v2  ;;  %v10199_v17 = vld [vmem:[#allocation18_spill] sm:$0xff]  ;;  %v2715_v58 = vrot.slane %v7701_v10, 7  ;;  %v2795_v2 = vrot.slane %v7709_v63, 1 }
 0x26f   : > { %5307 = vmatprep.mubr.msk.f32.mxu0 %vm2277_vm13, %v2257_v21  ;;  %v2194_v50 = vsel %vm2166_vm10, %v2161_v36, %v10176_v52  ;;  %v10198_v36 = vld [vmem:[#allocation200_spill] sm:$0xff] }
 0x270   : > { %v1829_v47 = vpop.permute.xlu1 %1828  ;;  %v1831_v16 = vpop.permute.xlu0 %1830 }
 0x271   : > { %v2225_v25 = vsel %vm2199_vm11, %v2192_v43, %v1829_v47  ;;  %v2226_v54 = vsel %vm2199_vm11, %v2193_v59, %v1831_v16  ;;  %v10181_v47 = vld [vmem:[#allocation140_spill] sm:$0xff]  ;;  %v10185_v16 = vld [vmem:[#allocation139_spill] sm:$0xff] }
 0x272   : > { %v2064_v57 = vsel %vm2034_vm6, %v2031_v53, %v10181_v47  ;;  %v2065_v27 = vsel %vm2034_vm6, %v2032_v24, %v10185_v16  ;;  %v10187_v43 = vld [vmem:[#allocation44_spill] sm:$0xff] }
 0x273   : > { %v2097_v29 = vsel %vm2067_vm7, %v2064_v57, %v10184_v19  ;;  %v2098_v42 = vsel %vm2067_vm7, %v2065_v27, %v10187_v43 }
 0x274   : > { %v1957_v48 = vpop.permute.xlu1 %1956  ;;  %v1959_v8 = vpop.permute.xlu0 %1958  ;;  %v2130_v51 = vsel %vm2100_vm8, %v2097_v29, %v10186_v23  ;;  %v2131_v59 = vsel %vm2100_vm8, %v2098_v42, %v10189_v34 }
 0x275   : > { %v2258_v11 = vsel %vm2232_vm12, %v2225_v25, %v1957_v48  ;;  %v2259_v4 = vsel %vm2232_vm12, %v2226_v54, %v1959_v8  ;;  %v2163_v25 = vsel %vm2133_vm9, %v2130_v51, %v10188_v9  ;;  %v2164_v33 = vsel %vm2133_vm9, %v2131_v59, %v10191_v32 }
 0x276   : > { %5308 = vmatmul.mubr.msk.f32.gmra.mrb[24].mxu0 %vm2277_vm13, %v2258_v11  ;;  %v10190_v11 = vld [vmem:[#allocation213_spill] sm:$0xff]  ;;  %v2197_v31 = vsel %vm2166_vm10, %v2164_v33, %v10192_v6 }
 0x277   : > { %5310 = vmatprep.mubr.msk.f32.mxu0 %vm2277_vm13, %v2259_v4  ;;  %v2196_v35 = vsel %vm2166_vm10, %v2163_v25, %v10190_v11 }
 0x278   : > { %v1833_v38 = vpop.permute.xlu1 %1832  ;;  %v1835_v28 = vpop.permute.xlu0 %1834 }
 0x279   : > { %v2227_v1 = vsel %vm2199_vm11, %v2194_v50, %v1833_v38  ;;  %v2228_v0 = vsel %vm2199_vm11, %v2195_v60, %v1835_v28  ;;  %v10195_v38 = vld [vmem:[#allocation141_spill] sm:$0xff] }
 0x27a   : > { %v2066_v12 = vsel %vm2034_vm6, %v2033_v39, %v10195_v38 }
 0x27b   : > { %v2099_v3 = vsel %vm2067_vm7, %v2066_v12, %v10196_v18 }
 0x27c   : > { %v1961_v13 = vpop.permute.xlu1 %1960  ;;  %v1963_v26 = vpop.permute.xlu0 %1962  ;;  %v2132_v49 = vsel %vm2100_vm8, %v2099_v3, %v10197_v15 }
 0x27d   : > { %v2260_v21 = vsel %vm2232_vm12, %v2227_v1, %v1961_v13  ;;  %v2261_v37 = vsel %vm2232_vm12, %v2228_v0, %v1963_v26  ;;  %v2165_v28 = vsel %vm2133_vm9, %v2132_v49, %v10198_v36  ;;  %v2699_v1 = vrot.slane %v7709_v63, 7 }
 0x27e   : > { %5311 = vmatmul.mubr.msk.f32.gmra.mrb[26].mxu0 %vm2277_vm13, %v2260_v21  ;;  %v2198_v22 = vsel %vm2166_vm10, %v2165_v28, %v10199_v17  ;;  %v2811_v13 = vrot.slane %v7701_v10, 1 }
 0x27f   : > { %5313 = vmatprep.mubr.msk.f32.mxu0 %vm2277_vm13, %v2261_v37  ;;  %v7809_v60 = vsel %vm367_vm1, %v2699_v1, %v2715_v58  ;;  %v7813_v21 = vsel %vm367_vm1, %v2715_v58, %v2699_v1 }
 0x280   : > { %v1837_v55 = vpop.permute.xlu1 %1836  ;;  %v1839_v48 = vpop.permute.xlu0 %1838  ;;  %v7822_v20 = vsel %vm464_vm2, %v2811_v13, %v2795_v2  ;;  %v7826_v63 = vsel %vm464_vm2, %v2795_v2, %v2811_v13 }
 0x281   : > { %v2229_v54 = vsel %vm2199_vm11, %v2196_v35, %v1837_v55  ;;  %v2230_v41 = vsel %vm2199_vm11, %v2197_v31, %v1839_v48 }
 0x284   : > { %v1965_v8 = vpop.permute.xlu1 %1964  ;;  %v1967_v46 = vpop.permute.xlu0 %1966 }
 0x285   : > { %v2262_v4 = vsel %vm2232_vm12, %v2229_v54, %v1965_v8  ;;  %v2263_v56 = vsel %vm2232_vm12, %v2230_v41, %v1967_v46 }
 0x286   : > { %5314 = vmatmul.mubr.msk.f32.gmra.mrb[28].mxu0 %vm2277_vm13, %v2262_v4 }
 0x287   : > { %5316 = vmatprep.mubr.msk.f32.mxu0 %vm2277_vm13, %v2263_v56 }
 0x288   : > { %v1841_v30 = vpop.permute.xlu1 %1840 }
 0x289   : > { %v2231_v52 = vsel %vm2199_vm11, %v2198_v22, %v1841_v30 }
 0x28c   : > { %v1969_v50 = vpop.permute.xlu1 %1968 }
 0x28d   : > { %v2264_v14 = vsel %vm2232_vm12, %v2231_v52, %v1969_v50 }
 0x28e   : > { %5317 = vmatmul.mubr.msk.f32.gmra.mrb[30].mxu0 %vm2277_vm13, %v2264_v14 }
 0x2ea   : > { %v5273_v10 = vpop.f32.mrb[0].mxu0 }
 0x2eb   : > { %v2450_v53 = vadd.f32 %v5273_v10, %v7818_v61  ;;  %v2444_v0 = vpop.f32.mrb[1].mxu0 }
 0x2ec   : > { %v2445_v26 = vadd.f32 %v7818_v61, %v2444_v0 }
 0x2ed   : > { %v2604_v47 = vmax.f32 %v2450_v53, 0.0 }
 0x2ee   : > { %v2603_v57 = vmax.f32 %v2445_v26, 0.0 }
 0x2ef   : > { %2636 = vst.msk [vmem:[#allocation2 + $0x18] sm:$0xff] %vm232_vm0, %v2604_v47 }
 0x2f0   : > { %2635 = vst.msk [vmem:[#allocation2 + $0x10] sm:$0xff] %vm232_vm0, %v2603_v57 }
 0x2f1   : > { %v5276_v37 = vpop.f32.mrb[2].mxu0 }
 0x2f2   : > { %v2460_v40 = vadd.f32 %v5276_v37, %v7818_v61  ;;  %v2454_v62 = vpop.f32.mrb[3].mxu0 }
 0x2f3   : > { %v2455_v24 = vadd.f32 %v7818_v61, %v2454_v62 }
 0x2f4   : > { %v2606_v19 = vmax.f32 %v2460_v40, 0.0 }
 0x2f5   : > { %v2605_v29 = vmax.f32 %v2455_v24, 0.0 }
 0x2f6   : > { %2638 = vst.msk [vmem:[#allocation2 + $0x28] sm:$0xff] %vm232_vm0, %v2606_v19  ;;  %v7835_v55 = vld [vmem:[#allocation2 + $0x18] sm:$0xff] }
 0x2f7   : > { %2637 = vst.msk [vmem:[#allocation2 + $0x20] sm:$0xff] %vm232_vm0, %v2605_v29  ;;  %3377 = vrot.lane.b32.xlu1 %v7835_v55, %s5433_s24  ;;  %v7840_v16 = vld [vmem:[#allocation2 + $0x10] sm:$0xff] }
 0x2f8   : > { %3375 = vrot.lane.b32.xlu0 %v7840_v16, %s5433_s24 }
 0x2f9   : > { %v5279_v27 = vpop.f32.mrb[4].mxu0 }
 0x2fa   : > { %v2470_v23 = vadd.f32 %v5279_v27, %v7818_v61  ;;  %v2464_v51 = vpop.f32.mrb[5].mxu0 }
 0x2fb   : > { %v2465_v43 = vadd.f32 %v7818_v61, %v2464_v51 }
 0x2fc   : > { %v2608_v42 = vmax.f32 %v2470_v23, 0.0 }
 0x2fd   : > { %v2607_v9 = vmax.f32 %v2465_v43, 0.0  ;;  %v7846_v25 = vld [vmem:[#allocation2 + $0x28] sm:$0xff] }
 0x2fe   : > { %2640 = vst.msk [vmem:[#allocation2 + $0x38] sm:$0xff] %vm232_vm0, %v2608_v42  ;;  %3381 = vrot.lane.b32.xlu1 %v7846_v25, %s5433_s24  ;;  %v7851_v48 = vld [vmem:[#allocation2 + $0x20] sm:$0xff] }
 0x2ff   : > { %2639 = vst.msk [vmem:[#allocation2 + $0x30] sm:$0xff] %vm232_vm0, %v2607_v9  ;;  %3379 = vrot.lane.b32.xlu0 %v7851_v48, %s5433_s24 }
 0x301   : > { %v5282_v34 = vpop.f32.mrb[6].mxu0 }
 0x302   : > { %v2480_v59 = vadd.f32 %v5282_v34, %v7818_v61  ;;  %v2474_v11 = vpop.f32.mrb[7].mxu0 }
 0x303   : > { %v2475_v35 = vadd.f32 %v7818_v61, %v2474_v11 }
 0x304   : > { %v2610_v32 = vmax.f32 %v2480_v59, 0.0 }
 0x305   : > { %v2609_v33 = vmax.f32 %v2475_v35, 0.0  ;;  %v7858_v54 = vld [vmem:[#allocation2 + $0x38] sm:$0xff] }
 0x306   : > { %2642 = vst.msk [vmem:[#allocation2 + $0x48] sm:$0xff] %vm232_vm0, %v2610_v32  ;;  %3385 = vrot.lane.b32.xlu1 %v7858_v54, %s5433_s24  ;;  %v7863_v8 = vld [vmem:[#allocation2 + $0x30] sm:$0xff] }
 0x307   : > { %2641 = vst.msk [vmem:[#allocation2 + $0x40] sm:$0xff] %vm232_vm0, %v2609_v33  ;;  %3383 = vrot.lane.b32.xlu0 %v7863_v8, %s5433_s24 }
 0x309   : > { %v5285_v6 = vpop.f32.mrb[8].mxu0 }
 0x30a   : > { %v2490_v31 = vadd.f32 %v5285_v6, %v7818_v61  ;;  %v2484_v4 = vpop.f32.mrb[9].mxu0 }
 0x30b   : > { %v2485_v7 = vadd.f32 %v7818_v61, %v2484_v4 }
 0x30c   : > { %v2612_v44 = vmax.f32 %v2490_v31, 0.0 }
 0x30d   : > { %v2611_v39 = vmax.f32 %v2485_v7, 0.0  ;;  %v7870_v41 = vld [vmem:[#allocation2 + $0x48] sm:$0xff] }
 0x30e   : > { %2644 = vst.msk [vmem:[#allocation2 + $0x58] sm:$0xff] %vm232_vm0, %v2612_v44  ;;  %3389 = vrot.lane.b32.xlu1 %v7870_v41, %s5433_s24  ;;  %v7875_v46 = vld [vmem:[#allocation2 + $0x40] sm:$0xff] }
 0x30f   : > { %2643 = vst.msk [vmem:[#allocation2 + $0x50] sm:$0xff] %vm232_vm0, %v2611_v39  ;;  %3387 = vrot.lane.b32.xlu0 %v7875_v46, %s5433_s24 }
 0x311   : > { %v5288_v38 = vpop.f32.mrb[10].mxu0 }
 0x312   : > { %v2500_v12 = vadd.f32 %v5288_v38, %v7818_v61  ;;  %v2494_v56 = vpop.f32.mrb[11].mxu0 }
 0x313   : > { %v2495_v18 = vadd.f32 %v7818_v61, %v2494_v56 }
 0x314   : > { %v2614_v3 = vmax.f32 %v2500_v12, 0.0 }
 0x315   : > { %v2613_v30 = vmax.f32 %v2495_v18, 0.0  ;;  %v7882_v15 = vld [vmem:[#allocation2 + $0x58] sm:$0xff] }
 0x316   : > { %2646 = vst.msk [vmem:[#allocation2 + $0x68] sm:$0xff] %vm232_vm0, %v2614_v3  ;;  %3393 = vrot.lane.b32.xlu1 %v7882_v15, %s5433_s24  ;;  %v7887_v49 = vld [vmem:[#allocation2 + $0x50] sm:$0xff] }
 0x317   : > { %2645 = vst.msk [vmem:[#allocation2 + $0x60] sm:$0xff] %vm232_vm0, %v2613_v30  ;;  %3391 = vrot.lane.b32.xlu0 %v7887_v49, %s5433_s24 }
 0x319   : > { %v5291_v36 = vpop.f32.mrb[12].mxu0 }
 0x31a   : > { %v2510_v28 = vadd.f32 %v5291_v36, %v7818_v61  ;;  %v2504_v17 = vpop.f32.mrb[13].mxu0 }
 0x31b   : > { %v2505_v22 = vadd.f32 %v7818_v61, %v2504_v17 }
 0x31c   : > { %v2616_v52 = vmax.f32 %v2510_v28, 0.0 }
 0x31d   : > { %v2615_v50 = vmax.f32 %v2505_v22, 0.0  ;;  %v7894_v14 = vld [vmem:[#allocation2 + $0x68] sm:$0xff] }
 0x31e   : > { %2648 = vst.msk [vmem:[#allocation2 + $0x78] sm:$0xff] %vm232_vm0, %v2616_v52  ;;  %3397 = vrot.lane.b32.xlu1 %v7894_v14, %s5433_s24  ;;  %v7899_v58 = vld [vmem:[#allocation2 + $0x60] sm:$0xff] }
 0x31f   : > { %2647 = vst.msk [vmem:[#allocation2 + $0x70] sm:$0xff] %vm232_vm0, %v2615_v50  ;;  %3395 = vrot.lane.b32.xlu0 %v7899_v58, %s5433_s24 }
 0x321   : > { %v5294_v1 = vpop.f32.mrb[14].mxu0 }
 0x322   : > { %v2520_v13 = vadd.f32 %v5294_v1, %v7818_v61  ;;  %v2514_v2 = vpop.f32.mrb[15].mxu0 }
 0x323   : > { %v2515_v10 = vadd.f32 %v7818_v61, %v2514_v2 }
 0x324   : > { %v2618_v53 = vmax.f32 %v2520_v13, 0.0 }
 0x325   : > { %v2617_v0 = vmax.f32 %v2515_v10, 0.0  ;;  %v7906_v26 = vld [vmem:[#allocation2 + $0x78] sm:$0xff] }
 0x326   : > { %2650 = vst.msk [vmem:[#allocation2 + $0x88] sm:$0xff] %vm232_vm0, %v2618_v53  ;;  %3401 = vrot.lane.b32.xlu1 %v7906_v26, %s5433_s24  ;;  %v7911_v47 = vld [vmem:[#allocation2 + $0x70] sm:$0xff] }
 0x327   : > { %2649 = vst.msk [vmem:[#allocation2 + $0x80] sm:$0xff] %vm232_vm0, %v2617_v0  ;;  %3399 = vrot.lane.b32.xlu0 %v7911_v47, %s5433_s24 }
 0x329   : > { %v5297_v57 = vpop.f32.mrb[16].mxu0 }
 0x32a   : > { %v2530_v37 = vadd.f32 %v5297_v57, %v7818_v61  ;;  %v2524_v40 = vpop.f32.mrb[17].mxu0 }
 0x32b   : > { %v2525_v62 = vadd.f32 %v7818_v61, %v2524_v40 }
 0x32c   : > { %v2620_v24 = vmax.f32 %v2530_v37, 0.0 }
 0x32d   : > { %v2619_v19 = vmax.f32 %v2525_v62, 0.0  ;;  %v7918_v29 = vld [vmem:[#allocation2 + $0x88] sm:$0xff] }
 0x32e   : > { %2652 = vst.msk [vmem:[#allocation2 + $0x98] sm:$0xff] %vm232_vm0, %v2620_v24  ;;  %3405 = vrot.lane.b32.xlu1 %v7918_v29, %s5433_s24  ;;  %v7923_v27 = vld [vmem:[#allocation2 + $0x80] sm:$0xff] }
 0x32f   : > { %2651 = vst.msk [vmem:[#allocation2 + $0x90] sm:$0xff] %vm232_vm0, %v2619_v19  ;;  %3403 = vrot.lane.b32.xlu0 %v7923_v27, %s5433_s24 }
 0x331   : > { %v5300_v23 = vpop.f32.mrb[18].mxu0 }
 0x332   : > { %v2540_v51 = vadd.f32 %v5300_v23, %v7818_v61  ;;  %v2534_v43 = vpop.f32.mrb[19].mxu0 }
 0x333   : > { %v2535_v42 = vadd.f32 %v7818_v61, %v2534_v43 }
 0x334   : > { %v2622_v9 = vmax.f32 %v2540_v51, 0.0 }
 0x335   : > { %v2621_v34 = vmax.f32 %v2535_v42, 0.0  ;;  %v7930_v59 = vld [vmem:[#allocation2 + $0x98] sm:$0xff] }
 0x336   : > { %2654 = vst.msk [vmem:[#allocation2 + $0xa8] sm:$0xff] %vm232_vm0, %v2622_v9  ;;  %3409 = vrot.lane.b32.xlu1 %v7930_v59, %s5433_s24  ;;  %v7935_v11 = vld [vmem:[#allocation2 + $0x90] sm:$0xff] }
 0x337   : > { %2653 = vst.msk [vmem:[#allocation2 + $0xa0] sm:$0xff] %vm232_vm0, %v2621_v34  ;;  %3407 = vrot.lane.b32.xlu0 %v7935_v11, %s5433_s24 }
 0x339   : > { %v5303_v35 = vpop.f32.mrb[20].mxu0 }
 0x33a   : > { %v2550_v32 = vadd.f32 %v5303_v35, %v7818_v61  ;;  %v2544_v33 = vpop.f32.mrb[21].mxu0 }
 0x33b   : > { %v2545_v6 = vadd.f32 %v7818_v61, %v2544_v33 }
 0x33c   : > { %v2624_v31 = vmax.f32 %v2550_v32, 0.0 }
 0x33d   : > { %v2623_v4 = vmax.f32 %v2545_v6, 0.0  ;;  %v7942_v7 = vld [vmem:[#allocation2 + $0xa8] sm:$0xff] }
 0x33e   : > { %2656 = vst.msk [vmem:[#allocation2 + $0xb8] sm:$0xff] %vm232_vm0, %v2624_v31  ;;  %3413 = vrot.lane.b32.xlu1 %v7942_v7, %s5433_s24  ;;  %v7947_v44 = vld [vmem:[#allocation2 + $0xa0] sm:$0xff] }
 0x33f   : > { %2655 = vst.msk [vmem:[#allocation2 + $0xb0] sm:$0xff] %vm232_vm0, %v2623_v4  ;;  %3411 = vrot.lane.b32.xlu0 %v7947_v44, %s5433_s24 }
 0x341   : > { %v5306_v39 = vpop.f32.mrb[22].mxu0 }
 0x342   : > { %v2560_v38 = vadd.f32 %v5306_v39, %v7818_v61  ;;  %v2554_v12 = vpop.f32.mrb[23].mxu0 }
 0x343   : > { %v2555_v56 = vadd.f32 %v7818_v61, %v2554_v12 }
 0x344   : > { %v2626_v18 = vmax.f32 %v2560_v38, 0.0 }
 0x345   : > { %v2625_v3 = vmax.f32 %v2555_v56, 0.0  ;;  %v7954_v30 = vld [vmem:[#allocation2 + $0xb8] sm:$0xff] }
 0x346   : > { %2658 = vst.msk [vmem:[#allocation2 + $0xc8] sm:$0xff] %vm232_vm0, %v2626_v18  ;;  %3417 = vrot.lane.b32.xlu1 %v7954_v30, %s5433_s24  ;;  %v9762_v36 = vrot.slane %v7954_v30, 7  ;;  %v7960_v28 = vld [vmem:[#allocation2 + $0xb0] sm:$0xff] }
 0x347   : > { %2657 = vst.msk [vmem:[#allocation2 + $0xc0] sm:$0xff] %vm232_vm0, %v2625_v3  ;;  %v9763_v17 = vrot.slane %v7960_v28, 7  ;;  %3415 = vrot.lane.b32.xlu0 %v7960_v28, %s5433_s24 }
 0x349   : > { %v5309_v22 = vpop.f32.mrb[24].mxu0  ;;  %v7972_v52 = vsel %vm367_vm1, %v9763_v17, %v9762_v36  ;;  %v2803_v36 = vrot.slane %v7923_v27, 1 }
 0x34a   : > { %v2570_v50 = vadd.f32 %v5309_v22, %v7818_v61  ;;  %v2564_v1 = vpop.f32.mrb[25].mxu0 }
 0x34b   : > { %v2565_v13 = vadd.f32 %v7818_v61, %v2564_v1 }
 0x34c   : > { %v2628_v2 = vmax.f32 %v2570_v50, 0.0 }
 0x34d   : > { %v2627_v10 = vmax.f32 %v2565_v13, 0.0  ;;  %v2692_v53 = vld [vmem:[#allocation2 + $0xc8] sm:$0xff] }
 0x34e   : > { %2660 = vst.msk [vmem:[#allocation2 + $0xd8] sm:$0xff] %vm232_vm0, %v2628_v2  ;;  %3421 = vrot.lane.b32.xlu1 %v2692_v53, %s5433_s24  ;;  %v2727_v0 = vrot.slane %v2692_v53, 7  ;;  %v2823_v57 = vrot.slane %v2692_v53, 1  ;;  %v2691_v37 = vld [vmem:[#allocation2 + $0xc0] sm:$0xff] }
 0x34f   : > { %2659 = vst.msk [vmem:[#allocation2 + $0xd0] sm:$0xff] %vm232_vm0, %v2627_v10  ;;  %v2711_v40 = vrot.slane %v2691_v37, 7  ;;  %v2807_v62 = vrot.slane %v2691_v37, 1  ;;  %3419 = vrot.lane.b32.xlu0 %v2691_v37, %s5433_s24 }
 0x351   : > { %v5312_v24 = vpop.f32.mrb[26].mxu0  ;;  %v7982_v19 = vsel %vm464_vm2, %v2823_v57, %v2807_v62  ;;  %v7986_v23 = vsel %vm464_vm2, %v2807_v62, %v2823_v57  ;;  %v7990_v51 = vsel %vm367_vm1, %v2711_v40, %v2727_v0  ;;  %v7994_v43 = vsel %vm367_vm1, %v2727_v0, %v2711_v40 }
 0x352   : > { %10200 = vst [vmem:[#allocation50_spill] sm:$0xff] %v7990_v51  ;;  %10201 = vst [vmem:[#allocation19_spill] sm:$0xff] %v7994_v43  ;;  %v2580_v42 = vadd.f32 %v5312_v24, %v7818_v61  ;;  %v2574_v9 = vpop.f32.mrb[27].mxu0 }
 0x353   : > { %v2575_v34 = vadd.f32 %v7818_v61, %v2574_v9 }
 0x354   : > { %v2630_v35 = vmax.f32 %v2580_v42, 0.0 }
 0x355   : > { %v2629_v32 = vmax.f32 %v2575_v34, 0.0  ;;  %v2694_v33 = vld [vmem:[#allocation2 + $0xd8] sm:$0xff] }
 0x356   : > { %2662 = vst.msk [vmem:[#allocation2 + $0xe8] sm:$0xff] %vm232_vm0, %v2630_v35  ;;  %3425 = vrot.lane.b32.xlu1 %v2694_v33, %s5433_s24  ;;  %v2728_v6 = vrot.slane %v2694_v33, 7  ;;  %v2824_v31 = vrot.slane %v2694_v33, 1  ;;  %v2693_v4 = vld [vmem:[#allocation2 + $0xd0] sm:$0xff] }
 0x357   : > { %2661 = vst.msk [vmem:[#allocation2 + $0xe0] sm:$0xff] %vm232_vm0, %v2629_v32  ;;  %v2712_v39 = vrot.slane %v2693_v4, 7  ;;  %v2808_v38 = vrot.slane %v2693_v4, 1  ;;  %3423 = vrot.lane.b32.xlu0 %v2693_v4, %s5433_s24 }
 0x359   : > { %v5315_v12 = vpop.f32.mrb[28].mxu0  ;;  %v8004_v56 = vsel %vm464_vm2, %v2824_v31, %v2808_v38  ;;  %v8008_v18 = vsel %vm464_vm2, %v2808_v38, %v2824_v31  ;;  %v8012_v3 = vsel %vm367_vm1, %v2712_v39, %v2728_v6  ;;  %v8016_v22 = vsel %vm367_vm1, %v2728_v6, %v2712_v39 }
 0x35a   : > { %10202 = vst [vmem:[#allocation47_spill] sm:$0xff] %v8012_v3  ;;  %10203 = vst [vmem:[#allocation52_spill] sm:$0xff] %v8016_v22  ;;  %v2590_v50 = vadd.f32 %v5315_v12, %v7818_v61  ;;  %v2584_v1 = vpop.f32.mrb[29].mxu0  ;;  %v2812_v6 = vrot.slane %v7835_v55, 1  ;;  %v2796_v31 = vrot.slane %v7840_v16, 1  ;;  %v2860_v38 = vsel %vm231_vm3, 0.0, %v7822_v20 }
 0x35b   : > { %v2585_v13 = vadd.f32 %v7818_v61, %v2584_v1  ;;  %v2813_v1 = vrot.slane %v7846_v25, 1  ;;  %v2720_v3 = vrot.slane %v7882_v15, 7  ;;  %v2704_v22 = vrot.slane %v7887_v49, 7 }
 0x35c   : > { %v2632_v2 = vmax.f32 %v2590_v50, 0.0 }
 0x35d   : > { %v2631_v10 = vmax.f32 %v2585_v13, 0.0  ;;  %v8020_v53 = vld [vmem:[#allocation2 + $0xe8] sm:$0xff]  ;;  %v2797_v13 = vrot.slane %v7851_v48, 1 }
 0x35e   : > { %2664 = vst.msk [vmem:[#allocation2 + $0xf8] sm:$0xff] %vm232_vm0, %v2632_v2  ;;  %3429 = vrot.lane.b32.xlu1 %v8020_v53, %s5433_s24  ;;  %v2729_v0 = vrot.slane %v8020_v53, 7  ;;  %v8026_v57 = vld [vmem:[#allocation2 + $0xe0] sm:$0xff]  ;;  %v2844_v2 = vsel %vm464_vm2, %v2812_v6, %v2796_v31 }
 0x35f   : > { %2663 = vst.msk [vmem:[#allocation2 + $0xf0] sm:$0xff] %vm232_vm0, %v2631_v10  ;;  %v2713_v37 = vrot.slane %v8026_v57, 7  ;;  %3427 = vrot.lane.b32.xlu0 %v8026_v57, %s5433_s24  ;;  %v8076_v20 = vsel %vm231_vm3, 0.0, %v2844_v2  ;;  %v2814_v10 = vrot.slane %v7858_v54, 1 }
 0x361   : > { %v5318_v40 = vpop.f32.mrb[30].mxu0  ;;  %v8034_v62 = vsel %vm367_vm1, %v2713_v37, %v2729_v0  ;;  %v8038_v24 = vsel %vm367_vm1, %v2729_v0, %v2713_v37  ;;  %v2798_v0 = vrot.slane %v7863_v8, 1  ;;  %v8084_v37 = vsel %vm464_vm2, %v2796_v31, %v2812_v6 }
 0x362   : > { %10204 = vst [vmem:[#allocation58_spill] sm:$0xff] %v8034_v62  ;;  %10205 = vst [vmem:[#allocation56_spill] sm:$0xff] %v8038_v24  ;;  %v2600_v42 = vadd.f32 %v5318_v40, %v7818_v61  ;;  %v2594_v9 = vpop.f32.mrb[31].mxu0  ;;  %v2845_v40 = vsel %vm464_vm2, %v2813_v1, %v2797_v13  ;;  %v2816_v6 = vrot.slane %v7882_v15, 1  ;;  %v2800_v31 = vrot.slane %v7887_v49, 1 }
 0x363   : > { %v2595_v34 = vadd.f32 %v7818_v61, %v2594_v9  ;;  %v2799_v9 = vrot.slane %v7875_v46, 1 }
 0x364   : > { %v2634_v35 = vmax.f32 %v2600_v42, 0.0  ;;  %v2815_v42 = vrot.slane %v7870_v41, 1 }
 0x365   : > { %v2633_v32 = vmax.f32 %v2595_v34, 0.0  ;;  %v8042_v33 = vld [vmem:[#allocation2 + $0xf8] sm:$0xff]  ;;  %v8100_v34 = vsel %vm464_vm2, %v2797_v13, %v2813_v1  ;;  %v2817_v1 = vrot.slane %v7894_v14, 1  ;;  %v2801_v13 = vrot.slane %v7899_v58, 1 }
 0x366   : > { %2666 = vst.msk [vmem:[#allocation2 + $0x108] sm:$0xff] %vm232_vm0, %v2634_v35  ;;  %3433 = vrot.lane.b32.xlu1 %v8042_v33, %s5433_s24  ;;  %v2730_v4 = vrot.slane %v8042_v33, 7  ;;  %v8050_v39 = vld [vmem:[#allocation2 + $0xf0] sm:$0xff]  ;;  %v2846_v35 = vsel %vm464_vm2, %v2814_v10, %v2798_v0  ;;  %v8132_v2 = vsel %vm464_vm2, %v2799_v9, %v2815_v42 }
 0x367   : > { %2665 = vst.msk [vmem:[#allocation2 + $0x100] sm:$0xff] %vm232_vm0, %v2633_v32  ;;  %v2714_v61 = vrot.slane %v8050_v39, 7  ;;  %3431 = vrot.lane.b32.xlu0 %v8050_v39, %s5433_s24  ;;  %v8108_v32 = vsel %vm231_vm3, 0.0, %v2846_v35  ;;  %v2802_v35 = vrot.slane %v7911_v47, 1  ;;  %v2833_v17 = vsel %vm464_vm2, %v2801_v13, %v2817_v1 }
 0x369   : > { %v8061_v12 = vsel %vm367_vm1, %v2714_v61, %v2730_v4  ;;  %v8065_v50 = vsel %vm367_vm1, %v2730_v4, %v2714_v61  ;;  %v8116_v4 = vsel %vm464_vm2, %v2798_v0, %v2814_v10  ;;  %v2847_v61 = vsel %vm464_vm2, %v2815_v42, %v2799_v9 }
 0x36a   : > { %10206 = vst [vmem:[#allocation64_spill] sm:$0xff] %v8061_v12  ;;  %10207 = vst [vmem:[#allocation54_spill] sm:$0xff] %v8065_v50  ;;  %3501 = vrot.lane.b32.xlu1 %v2860_v38, %s5434_s25  ;;  %v8124_v38 = vsel %vm231_vm3, 0.0, %v2847_v61  ;;  %v2848_v10 = vsel %vm464_vm2, %v2816_v6, %v2800_v31  ;;  %v8148_v42 = vsel %vm464_vm2, %v2800_v31, %v2816_v6  ;;  %v2820_v12 = vrot.slane %v7930_v59, 1 }
 0x36b   : > { %3499 = vrot.lane.b32.xlu0 %v7826_v63, %s5434_s25  ;;  %v8092_v63 = vsel %vm231_vm3, 0.0, %v2845_v40  ;;  %v8140_v0 = vsel %vm231_vm3, 0.0, %v2848_v10  ;;  %v2818_v40 = vrot.slane %v7906_v26, 1  ;;  %v2849_v9 = vsel %vm464_vm2, %v2817_v1, %v2801_v13 }
 0x36c   : > { %v2872_v61 = vsel %vm231_vm3, 0.0, %v2849_v9  ;;  %v2819_v10 = vrot.slane %v7918_v29, 1  ;;  %v2804_v9 = vrot.slane %v7935_v11, 1  ;;  %v2821_v13 = vrot.slane %v7942_v7, 1 }
 0x36d   : > { %v2850_v6 = vsel %vm464_vm2, %v2818_v40, %v2802_v35  ;;  %v2703_v50 = vrot.slane %v7875_v46, 7 }
 0x36e   : > { %3505 = vrot.lane.b32.xlu1 %v8076_v20, %s5434_s25  ;;  %v2874_v31 = vsel %vm231_vm3, 0.0, %v2850_v6  ;;  %v2851_v1 = vsel %vm464_vm2, %v2819_v10, %v2803_v36  ;;  %v2805_v6 = vrot.slane %v7947_v44, 1 }
 0x36f   : > { %3503 = vrot.lane.b32.xlu0 %v8084_v37, %s5434_s25 }
 0x372   : > { %3509 = vrot.lane.b32.xlu1 %v8092_v63, %s5434_s25 }
 0x373   : > { %3507 = vrot.lane.b32.xlu0 %v8100_v34, %s5434_s25 }
 0x376   : > { %3513 = vrot.lane.b32.xlu1 %v8108_v32, %s5434_s25 }
 0x377   : > { %3511 = vrot.lane.b32.xlu0 %v8116_v4, %s5434_s25 }
 0x37a   : > { %3517 = vrot.lane.b32.xlu1 %v8124_v38, %s5434_s25 }
 0x37b   : > { %3515 = vrot.lane.b32.xlu0 %v8132_v2, %s5434_s25 }
 0x37e   : > { %3521 = vrot.lane.b32.xlu1 %v8140_v0, %s5434_s25 }
 0x37f   : > { %3519 = vrot.lane.b32.xlu0 %v8148_v42, %s5434_s25 }
 0x382   : > { %3525 = vrot.lane.b32.xlu1 %v2872_v61, %s5434_s25  ;;  %v2834_v61 = vsel %vm464_vm2, %v2802_v35, %v2818_v40  ;;  %v2852_v40 = vsel %vm464_vm2, %v2820_v12, %v2804_v9 }
 0x383   : > { %3523 = vrot.lane.b32.xlu0 %v2833_v17, %s5434_s25  ;;  %v2876_v17 = vsel %vm231_vm3, 0.0, %v2851_v1  ;;  %v2878_v35 = vsel %vm231_vm3, 0.0, %v2852_v40  ;;  %v2806_v1 = vrot.slane %v7960_v28, 1 }
 0x386   : > { %3529 = vrot.lane.b32.xlu1 %v2874_v31, %s5434_s25  ;;  %v2835_v31 = vsel %vm464_vm2, %v2803_v36, %v2819_v10  ;;  %v2853_v36 = vsel %vm464_vm2, %v2821_v13, %v2805_v6 }
 0x387   : > { %3527 = vrot.lane.b32.xlu0 %v2834_v61, %s5434_s25  ;;  %v2822_v61 = vrot.slane %v7954_v30, 1  ;;  %v2880_v10 = vsel %vm231_vm3, 0.0, %v2853_v36  ;;  %v8216_v36 = vpop.permute.xlu0 %3371 }
 0x389   : > { %v2854_v40 = vsel %vm464_vm2, %v2822_v61, %v2806_v1 }
 0x38a   : > { %3533 = vrot.lane.b32.xlu1 %v2876_v17, %s5434_s25  ;;  %v2836_v17 = vsel %vm464_vm2, %v2804_v9, %v2820_v12  ;;  %v2882_v12 = vsel %vm231_vm3, 0.0, %v2854_v40  ;;  %v2838_v9 = vsel %vm464_vm2, %v2806_v1, %v2822_v61  ;;  %v2886_v61 = vsel %vm231_vm3, 0.0, %v8004_v56 }
 0x38b   : > { %3531 = vrot.lane.b32.xlu0 %v2835_v31, %s5434_s25  ;;  %v2837_v31 = vsel %vm464_vm2, %v2805_v6, %v2821_v13  ;;  %v2825_v13 = vrot.slane %v8020_v53, 1  ;;  %v2809_v6 = vrot.slane %v8026_v57, 1  ;;  %v2826_v1 = vrot.slane %v8042_v33, 1 }
 0x38d   : > { %v2857_v53 = vsel %vm464_vm2, %v2825_v13, %v2809_v6  ;;  %v2841_v56 = vsel %vm464_vm2, %v2809_v6, %v2825_v13  ;;  %v2701_v13 = vrot.slane %v7851_v48, 7 }
 0x38e   : > { %3537 = vrot.lane.b32.xlu1 %v2878_v35, %s5434_s25  ;;  %v2884_v35 = vsel %vm231_vm3, 0.0, %v7982_v19  ;;  %v2810_v19 = vrot.slane %v8050_v39, 1  ;;  %v2716_v39 = vrot.slane %v7835_v55, 7 }
 0x38f   : > { %3535 = vrot.lane.b32.xlu0 %v2836_v17, %s5434_s25  ;;  %v8213_v17 = vpop.permute.xlu1 %3373 }
 0x390   : > { %v2858_v33 = vsel %vm464_vm2, %v2826_v1, %v2810_v19 }
 0x392   : > { %3541 = vrot.lane.b32.xlu1 %v2880_v10, %s5434_s25  ;;  %v8232_v10 = vpop.permute.xlu0 %3375 }
 0x393   : > { %3539 = vrot.lane.b32.xlu0 %v2837_v31, %s5434_s25  ;;  %v8230_v57 = vpop.permute.xlu1 %3377  ;;  %v2700_v31 = vrot.slane %v7840_v16, 7 }
 0x395   : > { %v2748_v6 = vsel %vm367_vm1, %v2716_v39, %v2700_v31 }
 0x396   : > { %3545 = vrot.lane.b32.xlu1 %v2882_v12, %s5434_s25  ;;  %v8246_v40 = vpop.permute.xlu0 %3379  ;;  %v2890_v12 = vsel %vm231_vm3, 0.0, %v2858_v33 }
 0x397   : > { %3543 = vrot.lane.b32.xlu0 %v2838_v9, %s5434_s25  ;;  %v2842_v9 = vsel %vm464_vm2, %v2810_v19, %v2826_v1  ;;  %v8268_v1 = vsel %vm228_vm4, 0.0, %v2748_v6  ;;  %v2718_v19 = vrot.slane %v7858_v54, 7  ;;  %v2719_v6 = vrot.slane %v7870_v41, 7 }
 0x399   : > { %v2751_v51 = vsel %vm367_vm1, %v2719_v6, %v2703_v50 }
 0x39a   : > { %3549 = vrot.lane.b32.xlu1 %v2884_v35, %s5434_s25  ;;  %v2717_v35 = vrot.slane %v7846_v25, 7  ;;  %v8328_v43 = vsel %vm228_vm4, 0.0, %v2751_v51 }
 0x39b   : > { %3547 = vrot.lane.b32.xlu0 %v7986_v23, %s5434_s25  ;;  %v2888_v23 = vsel %vm231_vm3, 0.0, %v2857_v53  ;;  %v8262_v53 = vsel %vm367_vm1, %v2700_v31, %v2716_v39 }
 0x39c   : > { %v2749_v33 = vsel %vm367_vm1, %v2717_v35, %v2701_v13  ;;  %v8282_v31 = vsel %vm367_vm1, %v2701_v13, %v2717_v35 }
 0x39e   : > { %3553 = vrot.lane.b32.xlu1 %v2886_v61, %s5434_s25 }
 0x39f   : > { %3551 = vrot.lane.b32.xlu0 %v8008_v18, %s5434_s25  ;;  %v8244_v18 = vpop.permute.xlu1 %3381 }
 0x3a2   : > { %3557 = vrot.lane.b32.xlu1 %v2888_v23, %s5434_s25  ;;  %v8264_v23 = vpop.permute.xlu0 %3383 }
 0x3a3   : > { %3555 = vrot.lane.b32.xlu0 %v2841_v56, %s5434_s25  ;;  %v8258_v61 = vpop.permute.xlu1 %3385  ;;  %v2702_v56 = vrot.slane %v7863_v8, 7 }
 0x3a5   : > { %v2750_v62 = vsel %vm367_vm1, %v2718_v19, %v2702_v56  ;;  %v8302_v13 = vsel %vm367_vm1, %v2702_v56, %v2718_v19  ;;  %v8322_v56 = vsel %vm367_vm1, %v2703_v50, %v2719_v6  ;;  %v8342_v6 = vsel %vm367_vm1, %v2704_v22, %v2720_v3 }
 0x3a6   : > { %3561 = vrot.lane.b32.xlu1 %v2890_v12, %s5434_s25  ;;  %v8284_v12 = vpop.permute.xlu0 %3387  ;;  %v8308_v24 = vsel %vm228_vm4, 0.0, %v2750_v62  ;;  %10213 = vst [vmem:[#allocation68_spill] sm:$0xff] %v8342_v6 }
 0x3a7   : > { %3559 = vrot.lane.b32.xlu0 %v2842_v9, %s5434_s25  ;;  %v8278_v39 = vpop.permute.xlu1 %3389  ;;  %v8288_v9 = vsel %vm228_vm4, 0.0, %v2749_v33 }
 0x3aa   : > { %3629 = vrot.lane.b32.xlu1 %v8262_v53, %s5435_s26  ;;  %v8304_v33 = vpop.permute.xlu0 %3391 }
 0x3ab   : > { %3627 = vrot.lane.b32.xlu0 %v8268_v1, %s5435_s26  ;;  %v8298_v35 = vpop.permute.xlu1 %3393  ;;  %10209 = vst [vmem:[#allocation49_spill] sm:$0xff] %v8304_v33  ;;  %v2705_v33 = vrot.slane %v7899_v58, 7  ;;  %v2706_v58 = vrot.slane %v7911_v47, 7  ;;  %v2707_v47 = vrot.slane %v7923_v27, 7  ;;  %v2708_v27 = vrot.slane %v7935_v11, 7 }
 0x3ac   : > { %10208 = vst [vmem:[#allocation62_spill] sm:$0xff] %v8298_v35  ;;  %v2721_v35 = vrot.slane %v7894_v14, 7  ;;  %v2722_v14 = vrot.slane %v7906_v26, 7  ;;  %v2723_v26 = vrot.slane %v7918_v29, 7  ;;  %v2724_v29 = vrot.slane %v7930_v59, 7 }
 0x3ad   : > { %v2725_v59 = vrot.slane %v7942_v7, 7  ;;  %v2709_v11 = vrot.slane %v7947_v44, 7 }
 0x3ae   : > { %3633 = vrot.lane.b32.xlu1 %v8282_v31, %s5435_s26  ;;  %v8324_v62 = vpop.permute.xlu0 %3395 }
 0x3af   : > { %3631 = vrot.lane.b32.xlu0 %v8288_v9, %s5435_s26  ;;  %v8318_v19 = vpop.permute.xlu1 %3397  ;;  %10211 = vst [vmem:[#allocation48_spill] sm:$0xff] %v8324_v62  ;;  %v2757_v7 = vsel %vm367_vm1, %v2725_v59, %v2709_v11 }
 0x3b0   : > { %10210 = vst [vmem:[#allocation142_spill] sm:$0xff] %v8318_v19  ;;  %v2752_v19 = vsel %vm367_vm1, %v2720_v3, %v2704_v22  ;;  %v8362_v22 = vsel %vm367_vm1, %v2705_v33, %v2721_v35 }
 0x3b1   : > { %v8348_v62 = vsel %vm228_vm4, 0.0, %v2752_v19  ;;  %10216 = vst [vmem:[#allocation66_spill] sm:$0xff] %v8362_v22 }
 0x3b2   : > { %3637 = vrot.lane.b32.xlu1 %v8302_v13, %s5435_s26  ;;  %v8344_v51 = vpop.permute.xlu0 %3399 }
 0x3b3   : > { %3635 = vrot.lane.b32.xlu0 %v8308_v24, %s5435_s26  ;;  %v8338_v50 = vpop.permute.xlu1 %3401  ;;  %10214 = vst [vmem:[#allocation116_spill] sm:$0xff] %v8344_v51 }
 0x3b4   : > { %10212 = vst [vmem:[#allocation60_spill] sm:$0xff] %v8338_v50  ;;  %v2753_v50 = vsel %vm367_vm1, %v2721_v35, %v2705_v33  ;;  %v8382_v33 = vsel %vm367_vm1, %v2706_v58, %v2722_v14 }
 0x3b5   : > { %v8368_v51 = vsel %vm228_vm4, 0.0, %v2753_v50  ;;  %10220 = vst [vmem:[#allocation143_spill] sm:$0xff] %v8382_v33 }
 0x3b6   : > { %3641 = vrot.lane.b32.xlu1 %v8322_v56, %s5435_s26  ;;  %v8364_v19 = vpop.permute.xlu0 %3403  ;;  %10218 = vst [vmem:[#allocation115_spill] sm:$0xff] %v8368_v51 }
 0x3b7   : > { %3639 = vrot.lane.b32.xlu0 %v8328_v43, %s5435_s26  ;;  %v8358_v3 = vpop.permute.xlu1 %3405  ;;  %10217 = vst [vmem:[#allocation144_spill] sm:$0xff] %v8364_v19 }
 0x3b8   : > { %10215 = vst [vmem:[#allocation57_spill] sm:$0xff] %v8358_v3  ;;  %v2754_v3 = vsel %vm367_vm1, %v2722_v14, %v2706_v58  ;;  %v8402_v58 = vsel %vm367_vm1, %v2707_v47, %v2723_v26 }
 0x3b9   : > { %v8388_v19 = vsel %vm228_vm4, 0.0, %v2754_v3  ;;  %10224 = vst [vmem:[#allocation118_spill] sm:$0xff] %v8402_v58 }
 0x3ba   : > { %3645 = vrot.lane.b32.xlu1 %v8342_v6, %s5435_s26  ;;  %v8384_v50 = vpop.permute.xlu0 %3407  ;;  %10222 = vst [vmem:[#allocation63_spill] sm:$0xff] %v8388_v19 }
 0x3bb   : > { %3643 = vrot.lane.b32.xlu0 %v8348_v62, %s5435_s26  ;;  %v8378_v35 = vpop.permute.xlu1 %3409  ;;  %10221 = vst [vmem:[#allocation51_spill] sm:$0xff] %v8384_v50 }
 0x3bc   : > { %10219 = vst [vmem:[#allocation53_spill] sm:$0xff] %v8378_v35  ;;  %v2755_v35 = vsel %vm367_vm1, %v2723_v26, %v2707_v47  ;;  %v8422_v47 = vsel %vm367_vm1, %v2708_v27, %v2724_v29 }
 0x3bd   : > { %v8408_v50 = vsel %vm228_vm4, 0.0, %v2755_v35  ;;  %10228 = vst [vmem:[#allocation117_spill] sm:$0xff] %v8422_v47 }
 0x3be   : > { %3649 = vrot.lane.b32.xlu1 %v8362_v22, %s5435_s26  ;;  %v8404_v3 = vpop.permute.xlu0 %3411  ;;  %10226 = vst [vmem:[#allocation70_spill] sm:$0xff] %v8408_v50 }
 0x3bf   : > { %3647 = vrot.lane.b32.xlu0 %v8368_v51, %s5435_s26  ;;  %v8398_v14 = vpop.permute.xlu1 %3413  ;;  %10225 = vst [vmem:[#allocation61_spill] sm:$0xff] %v8404_v3 }
 0x3c0   : > { %10223 = vst [vmem:[#allocation72_spill] sm:$0xff] %v8398_v14  ;;  %v2756_v14 = vsel %vm367_vm1, %v2724_v29, %v2708_v27  ;;  %v8440_v29 = vsel %vm367_vm1, %v2709_v11, %v2725_v59 }
 0x3c1   : > { %v8428_v3 = vsel %vm228_vm4, 0.0, %v2756_v14  ;;  %10232 = vst [vmem:[#allocation67_spill] sm:$0xff] %v8440_v29  ;;  %v8446_v14 = vsel %vm228_vm4, 0.0, %v2757_v7 }
 0x3c2   : > { %3653 = vrot.lane.b32.xlu1 %v8382_v33, %s5435_s26  ;;  %v8424_v35 = vpop.permute.xlu0 %3415  ;;  %10230 = vst [vmem:[#allocation145_spill] sm:$0xff] %v8428_v3  ;;  %10234 = vst [vmem:[#allocation120_spill] sm:$0xff] %v8446_v14 }
 0x3c3   : > { %3651 = vrot.lane.b32.xlu0 %v8388_v19, %s5435_s26  ;;  %v8418_v26 = vpop.permute.xlu1 %3417  ;;  %10229 = vst [vmem:[#allocation59_spill] sm:$0xff] %v8424_v35  ;;  %v10236_v35 = vrot.slane %v7954_v30, 7  ;;  %v4619_v30 = vld [vmem:[%s9680_s3] sm:$0xff] }
 0x3c4   : > { %10227 = vst [vmem:[#allocation146_spill] sm:$0xff] %v8418_v26  ;;  %v10235_v26 = vrot.slane %v7960_v28, 7  ;;  %v4620_v28 = vld [vmem:[%s9680_s3 + $0x8] sm:$0xff] }
 0x3c6   : > { %3657 = vrot.lane.b32.xlu1 %v8402_v58, %s5435_s26  ;;  %v8442_v27 = vpop.permute.xlu0 %3419 }
 0x3c7   : > { %3655 = vrot.lane.b32.xlu0 %v8408_v50, %s5435_s26  ;;  %v8436_v44 = vpop.permute.xlu1 %3421  ;;  %10233 = vst [vmem:[#allocation76_spill] sm:$0xff] %v8442_v27  ;;  %v3120_v50 = vld [vmem:[#allocation2 + $0x48] sm:$0xff] }
 0x3c8   : > { %10231 = vst [vmem:[#allocation55_spill] sm:$0xff] %v8436_v44  ;;  %v2758_v44 = vsel %vm367_vm1, %v10236_v35, %v10235_v26  ;;  %v5385_v35 = vpack.c.bf16 %v4620_v28, %v4619_v30 }
 0x3c9   : > { %v8464_v7 = vsel %vm228_vm4, 0.0, %v2758_v44  ;;  %v4622_v44 = vld [vmem:[%s9680_s3 + $0x18] sm:$0xff] }
 0x3ca   : > { %3661 = vrot.lane.b32.xlu1 %v8422_v47, %s5435_s26  ;;  %v8460_v11 = vpop.permute.xlu0 %3423  ;;  %10239 = vst [vmem:[#allocation148_spill] sm:$0xff] %v8464_v7  ;;  %5386 = vmatprep.subr.bf16.mxu1 %v5385_v35 }
 0x3cb   : > { %3659 = vrot.lane.b32.xlu0 %v8428_v3, %s5435_s26  ;;  %v8458_v59 = vpop.permute.xlu1 %3425  ;;  %10238 = vst [vmem:[#allocation74_spill] sm:$0xff] %v8460_v11  ;;  %5388 = vmatpush3.bf16.msra.mxu1 %v5385_v35 }
 0x3cc   : > { %10237 = vst [vmem:[#allocation65_spill] sm:$0xff] %v8458_v59 }
 0x3ce   : > { %3665 = vrot.lane.b32.xlu1 %v8440_v29, %s5435_s26 }
 0x3cf   : > { %3663 = vrot.lane.b32.xlu0 %v8446_v14, %s5435_s26 }
 0x3d0   : > { %v8476_v26 = vpop.permute.xlu1 %3429 }
 0x3d1   : > { %10240 = vst [vmem:[#allocation119_spill] sm:$0xff] %v8476_v26  ;;  %v8478_v59 = vpop.permute.xlu0 %3427 }
 0x3d2   : > { %3755 = vrot.lane.b32.xlu1 %v7840_v16, %s5436_s27  ;;  %10241 = vst [vmem:[#allocation161_spill] sm:$0xff] %v8478_v59  ;;  %v4621_v16 = vld [vmem:[%s9680_s3 + $0x10] sm:$0xff] }
 0x3d3   : > { %3667 = vrot.lane.b32.xlu0 %v8464_v7, %s5435_s26  ;;  %v5389_v30 = vpack.c.bf16 %v4622_v44, %v4621_v16  ;;  %v3117_v44 = vld [vmem:[#allocation2 + $0x30] sm:$0xff] }
 0x3d5   : > { %5390 = vmatprep.subr.bf16.mxu1 %v5389_v30 }
 0x3d6   : > { %3883 = vrot.lane.b32.xlu1 %v8084_v37, %s5437_s28  ;;  %5392 = vmatpush3.bf16.msra.mxu1 %v5389_v30  ;;  %v3118_v30 = vld [vmem:[#allocation2 + $0x38] sm:$0xff] }
 0x3d7   : > { %3757 = vrot.lane.b32.xlu0 %v7835_v55, %s5436_s27  ;;  %v4623_v55 = vld [vmem:[%s9680_s3 + $0x20] sm:$0xf]  ;;  %v3164_v59 = vrot.slane %v3118_v30, 7 }
 0x3d8   : > { %v8490_v26 = vpop.permute.xlu1 %3433  ;;  %5327 = vmatprep.subr.msk.mxu1 %vm2374_vm5, %v4623_v55 }
 0x3d9   : > { %10242 = vst [vmem:[#allocation147_spill] sm:$0xff] %v8490_v26  ;;  %v8492_v28 = vpop.permute.xlu0 %3431 }
 0x3da   : > { %10243 = vst [vmem:[#allocation37_spill] sm:$0xff] %v8492_v28  ;;  %4011 = vrot.lane.b32.xlu1 %v8288_v9, %s5438_s29  ;;  %5328 = vmatpush3.msk.msra.mxu1 %vm2374_vm5, %v4623_v55  ;;  %v3148_v55 = vrot.slane %v3117_v44, 7 }
 0x3db   : > { %3885 = vrot.lane.b32.xlu0 %v8076_v20, %s5437_s28 }
 0x3dc   : > { %v8501_v37 = vpop.permute.xlu1 %3501 }
 0x3dd   : > { %v8504_v35 = vpop.permute.xlu0 %3499 }
 0x3de   : > { %4139 = vrot.lane.b32.xlu1 %v7851_v48, %s5439_s15 }
 0x3df   : > { %4013 = vrot.lane.b32.xlu0 %v8282_v31, %s5438_s29 }
 0x3e0   : > { %v8511_v20 = vpop.permute.xlu1 %3505 }
 0x3e1   : > { %v8513_v16 = vpop.permute.xlu0 %3503 }
 0x3e2   : > { %4141 = vrot.lane.b32.xlu1 %v7846_v25, %s5439_s15 }
 0x3e3   : > { %3759 = vrot.lane.b32.xlu0 %v7851_v48, %s5436_s27  ;;  %v3196_v48 = vsel %vm367_vm1, %v3164_v59, %v3148_v55 }
 0x3e4   : > { %v8519_v26 = vpop.permute.xlu1 %3509  ;;  %v3213_v29 = vsel %vm228_vm4, 0.0, %v3196_v48  ;;  %v3260_v48 = vrot.slane %v3118_v30, 1 }
 0x3e5   : > { %v8521_v28 = vpop.permute.xlu0 %3507 }
 0x3e6   : > { %3761 = vrot.lane.b32.xlu1 %v7846_v25, %s5436_s27 }
 0x3e7   : > { %4267 = vrot.lane.b32.xlu0 %v8100_v34, %s5440_s16 }
 0x3e8   : > { %v8527_v11 = vpop.permute.xlu1 %3513 }
 0x3e9   : > { %v8529_v27 = vpop.permute.xlu0 %3511 }
 0x3ea   : > { %4269 = vrot.lane.b32.xlu1 %v8092_v63, %s5440_s16 }
 0x3eb   : > { %3887 = vrot.lane.b32.xlu0 %v8100_v34, %s5437_s28  ;;  %v3180_v34 = vsel %vm367_vm1, %v3148_v55, %v3164_v59 }
 0x3ec   : > { %v8537_v7 = vpop.permute.xlu1 %3517 }
 0x3ed   : > { %v8539_v25 = vpop.permute.xlu0 %3515 }
 0x3ee   : > { %4015 = vrot.lane.b32.xlu1 %v3213_v29, %s5438_s29  ;;  %v3244_v29 = vrot.slane %v3117_v44, 1 }
 0x3ef   : > { %3889 = vrot.lane.b32.xlu0 %v8092_v63, %s5437_s28  ;;  %v3119_v63 = vld [vmem:[#allocation2 + $0x40] sm:$0xff] }
 0x3f0   : > { %v8546_v14 = vpop.permute.xlu1 %3521  ;;  %v3276_v59 = vsel %vm464_vm2, %v3244_v29, %v3260_v48  ;;  %v3292_v55 = vsel %vm464_vm2, %v3260_v48, %v3244_v29 }
 0x3f1   : > { %10244 = vst [vmem:[#allocation71_spill] sm:$0xff] %v8546_v14  ;;  %v8548_v47 = vpop.permute.xlu0 %3519 }
 0x3f2   : > { %10245 = vst [vmem:[#allocation80_spill] sm:$0xff] %v8548_v47  ;;  %4143 = vrot.lane.b32.xlu1 %v3117_v44, %s5439_s15  ;;  %v3149_v44 = vrot.slane %v3119_v63, 7 }
 0x3f3   : > { %4017 = vrot.lane.b32.xlu0 %v3180_v34, %s5438_s29 }
 0x3f4   : > { %v8554_v3 = vpop.permute.xlu1 %3525 }
 0x3f5   : > { %10246 = vst [vmem:[#allocation122_spill] sm:$0xff] %v8554_v3  ;;  %v8556_v58 = vpop.permute.xlu0 %3523 }
 0x3f6   : > { %10247 = vst [vmem:[#allocation69_spill] sm:$0xff] %v8556_v58  ;;  %4145 = vrot.lane.b32.xlu1 %v3118_v30, %s5439_s15  ;;  %v3165_v30 = vrot.slane %v3120_v50, 7 }
 0x3f7   : > { %3763 = vrot.lane.b32.xlu0 %v7863_v8, %s5436_s27 }
 0x3f8   : > { %v8561_v33 = vpop.permute.xlu1 %3529 }
 0x3f9   : > { %10248 = vst [vmem:[#allocation78_spill] sm:$0xff] %v8561_v33  ;;  %v8563_v19 = vpop.permute.xlu0 %3527  ;;  %v3310_v33 = vsel %vm231_vm3, 0.0, %v3292_v55 }
 0x3fa   : > { %10249 = vst [vmem:[#allocation150_spill] sm:$0xff] %v8563_v19  ;;  %3765 = vrot.lane.b32.xlu1 %v7858_v54, %s5436_s27  ;;  %v3197_v54 = vsel %vm367_vm1, %v3165_v30, %v3149_v44 }
 0x3fb   : > { %4271 = vrot.lane.b32.xlu0 %v3276_v59, %s5440_s16  ;;  %v3215_v59 = vsel %vm228_vm4, 0.0, %v3197_v54  ;;  %v3245_v54 = vrot.slane %v3119_v63, 1 }
 0x3fc   : > { %v8572_v8 = vpop.permute.xlu1 %3533 }
 0x3fd   : > { %10250 = vst [vmem:[#allocation121_spill] sm:$0xff] %v8572_v8  ;;  %v8574_v34 = vpop.permute.xlu0 %3531 }
 0x3fe   : > { %10251 = vst [vmem:[#allocation163_spill] sm:$0xff] %v8574_v34  ;;  %4273 = vrot.lane.b32.xlu1 %v3310_v33, %s5440_s16  ;;  %v3126_v34 = vld [vmem:[#allocation2 + $0x78] sm:$0xff] }
 0x3ff   : > { %3891 = vrot.lane.b32.xlu0 %v8116_v4, %s5437_s28  ;;  %v3181_v4 = vsel %vm367_vm1, %v3149_v44, %v3165_v30  ;;  %v3168_v58 = vrot.slane %v3126_v34, 7 }
 0x400   : > { %v8583_v29 = vpop.permute.xlu1 %3537 }
 0x401   : > { %10252 = vst [vmem:[#allocation149_spill] sm:$0xff] %v8583_v29  ;;  %v8585_v48 = vpop.permute.xlu0 %3535 }
 0x402   : > { %10253 = vst [vmem:[#allocation162_spill] sm:$0xff] %v8585_v48  ;;  %4019 = vrot.lane.b32.xlu1 %v3215_v59, %s5438_s29  ;;  %v3261_v59 = vrot.slane %v3120_v50, 1 }
 0x403   : > { %3893 = vrot.lane.b32.xlu0 %v8108_v32, %s5437_s28  ;;  %v3121_v32 = vld [vmem:[#allocation2 + $0x50] sm:$0xff] }
 0x404   : > { %v8592_v55 = vpop.permute.xlu1 %3541  ;;  %v3277_v44 = vsel %vm464_vm2, %v3245_v54, %v3261_v59  ;;  %v3293_v30 = vsel %vm464_vm2, %v3261_v59, %v3245_v54 }
 0x405   : > { %10254 = vst [vmem:[#allocation183_spill] sm:$0xff] %v8592_v55  ;;  %v8594_v33 = vpop.permute.xlu0 %3539  ;;  %v3122_v55 = vld [vmem:[#allocation2 + $0x58] sm:$0xff] }
 0x406   : > { %10255 = vst [vmem:[#allocation75_spill] sm:$0xff] %v8594_v33  ;;  %4147 = vrot.lane.b32.xlu1 %v3119_v63, %s5439_s15  ;;  %v3150_v63 = vrot.slane %v3121_v32, 7 }
 0x407   : > { %4021 = vrot.lane.b32.xlu0 %v3181_v4, %s5438_s29 }
 0x408   : > { %v8600_v29 = vpop.permute.xlu1 %3545 }
 0x409   : > { %10256 = vst [vmem:[#allocation84_spill] sm:$0xff] %v8600_v29  ;;  %v8602_v48 = vpop.permute.xlu0 %3543 }
 0x40a   : > { %10257 = vst [vmem:[#allocation124_spill] sm:$0xff] %v8602_v48  ;;  %4149 = vrot.lane.b32.xlu1 %v3120_v50, %s5439_s15  ;;  %v3166_v50 = vrot.slane %v3122_v55, 7  ;;  %v3125_v48 = vld [vmem:[#allocation2 + $0x70] sm:$0xff] }
 0x40b   : > { %3767 = vrot.lane.b32.xlu0 %v7875_v46, %s5436_s27 }
 0x40c   : > { %v8607_v33 = vpop.permute.xlu1 %3549  ;;  %v10322_v45 = vld [vmem:[#allocation183_spill] sm:$0xff] }
 0x40d   : > { %10258 = vst [vmem:[#allocation73_spill] sm:$0xff] %v8607_v33  ;;  %v8609_v8 = vpop.permute.xlu0 %3547  ;;  %v3312_v33 = vsel %vm231_vm3, 0.0, %v3293_v30 }
 0x40e   : > { %10259 = vst [vmem:[#allocation82_spill] sm:$0xff] %v8609_v8  ;;  %3769 = vrot.lane.b32.xlu1 %v7870_v41, %s5436_s27  ;;  %v3198_v41 = vsel %vm367_vm1, %v3166_v50, %v3150_v63 }
 0x40f   : > { %4275 = vrot.lane.b32.xlu0 %v3277_v44, %s5440_s16  ;;  %v3217_v44 = vsel %vm228_vm4, 0.0, %v3198_v41  ;;  %v3246_v41 = vrot.slane %v3121_v32, 1 }
 0x410   : > { %v8618_v46 = vpop.permute.xlu1 %3553 }
 0x411   : > { %10260 = vst [vmem:[#allocation152_spill] sm:$0xff] %v8618_v46  ;;  %v8620_v4 = vpop.permute.xlu0 %3551 }
 0x412   : > { %10261 = vst [vmem:[#allocation123_spill] sm:$0xff] %v8620_v4  ;;  %4277 = vrot.lane.b32.xlu1 %v3312_v33, %s5440_s16 }
 0x413   : > { %3895 = vrot.lane.b32.xlu0 %v8132_v2, %s5437_s28  ;;  %v3182_v2 = vsel %vm367_vm1, %v3150_v63, %v3166_v50 }
 0x414   : > { %v8629_v54 = vpop.permute.xlu1 %3557 }
 0x415   : > { %10262 = vst [vmem:[#allocation165_spill] sm:$0xff] %v8629_v54  ;;  %v8631_v59 = vpop.permute.xlu0 %3555 }
 0x416   : > { %10263 = vst [vmem:[#allocation151_spill] sm:$0xff] %v8631_v59  ;;  %4023 = vrot.lane.b32.xlu1 %v3217_v44, %s5438_s29  ;;  %v3262_v44 = vrot.slane %v3122_v55, 1 }
 0x417   : > { %3897 = vrot.lane.b32.xlu0 %v8124_v38, %s5437_s28  ;;  %v3123_v38 = vld [vmem:[#allocation2 + $0x60] sm:$0xff] }
 0x418   : > { %v8638_v30 = vpop.permute.xlu1 %3561  ;;  %v3278_v63 = vsel %vm464_vm2, %v3246_v41, %v3262_v44  ;;  %v3294_v50 = vsel %vm464_vm2, %v3262_v44, %v3246_v41 }
 0x419   : > { %10264 = vst [vmem:[#allocation164_spill] sm:$0xff] %v8638_v30  ;;  %v8640_v33 = vpop.permute.xlu0 %3559  ;;  %v3124_v30 = vld [vmem:[#allocation2 + $0x68] sm:$0xff]  ;;  %v3314_v4 = vsel %vm231_vm3, 0.0, %v3294_v50 }
 0x41a   : > { %10265 = vst [vmem:[#allocation184_spill] sm:$0xff] %v8640_v33  ;;  %4151 = vrot.lane.b32.xlu1 %v3121_v32, %s5439_s15  ;;  %v3151_v32 = vrot.slane %v3123_v38, 7 }
 0x41b   : > { %4025 = vrot.lane.b32.xlu0 %v3182_v2, %s5438_s29 }
 0x41c   : > { %v8646_v54 = vpop.permute.xlu1 %3629 }
 0x41d   : > { %v8648_v59 = vpop.permute.xlu0 %3627 }
 0x41e   : > { %4153 = vrot.lane.b32.xlu1 %v3122_v55, %s5439_s15  ;;  %v3167_v55 = vrot.slane %v3124_v30, 7 }
 0x41f   : > { %3771 = vrot.lane.b32.xlu0 %v7887_v49, %s5436_s27 }
 0x420   : > { %v8653_v33 = vpop.permute.xlu1 %3633 }
 0x421   : > { %v8655_v46 = vpop.permute.xlu0 %3631 }
 0x422   : > { %3773 = vrot.lane.b32.xlu1 %v7882_v15, %s5436_s27  ;;  %v3199_v15 = vsel %vm367_vm1, %v3167_v55, %v3151_v32 }
 0x423   : > { %4279 = vrot.lane.b32.xlu0 %v3278_v63, %s5440_s16  ;;  %v3219_v63 = vsel %vm228_vm4, 0.0, %v3199_v15  ;;  %v3247_v15 = vrot.slane %v3123_v38, 1 }
 0x424   : > { %v8664_v49 = vpop.permute.xlu1 %3637 }
 0x425   : > { %v8666_v2 = vpop.permute.xlu0 %3635 }
 0x426   : > { %4281 = vrot.lane.b32.xlu1 %v3314_v4, %s5440_s16 }
 0x427   : > { %3899 = vrot.lane.b32.xlu0 %v8148_v42, %s5437_s28  ;;  %v3183_v42 = vsel %vm367_vm1, %v3151_v32, %v3167_v55  ;;  %v5413_v55 = vld [vmem:[#allocation2 + $0x68] sm:$0xff] }
 0x428   : > { %v8675_v41 = vpop.permute.xlu1 %3641 }
 0x429   : > { %v8677_v44 = vpop.permute.xlu0 %3639 }
 0x42a   : > { %4027 = vrot.lane.b32.xlu1 %v3219_v63, %s5438_s29  ;;  %v3263_v63 = vrot.slane %v3124_v30, 1 }
 0x42b   : > { %3901 = vrot.lane.b32.xlu0 %v8140_v0, %s5437_s28  ;;  %v5412_v0 = vld [vmem:[#allocation2 + $0x60] sm:$0xff] }
 0x42c   : > { %v8684_v50 = vpop.permute.xlu1 %3645  ;;  %v3024_v32 = vrot.slane %v5412_v0, 1  ;;  %v3279_v22 = vsel %vm464_vm2, %v3247_v15, %v3263_v63 }
 0x42d   : > { %v8686_v4 = vpop.permute.xlu0 %3643 }
 0x42e   : > { %4155 = vrot.lane.b32.xlu1 %v3123_v38, %s5439_s15  ;;  %v3152_v38 = vrot.slane %v3125_v48, 7 }
 0x42f   : > { %4029 = vrot.lane.b32.xlu0 %v3183_v42, %s5438_s29  ;;  %v3040_v42 = vrot.slane %v5413_v55, 1 }
 0x430   : > { %v8692_v8 = vpop.permute.xlu1 %3649 }
 0x431   : > { %10266 = vst [vmem:[#allocation79_spill] sm:$0xff] %v8692_v8  ;;  %v8694_v29 = vpop.permute.xlu0 %3647 }
 0x432   : > { %10267 = vst [vmem:[#allocation88_spill] sm:$0xff] %v8694_v29  ;;  %4157 = vrot.lane.b32.xlu1 %v3124_v30, %s5439_s15  ;;  %v3295_v30 = vsel %vm464_vm2, %v3263_v63, %v3247_v15 }
 0x433   : > { %3775 = vrot.lane.b32.xlu0 %v5412_v0, %s5436_s27  ;;  %v3316_v0 = vsel %vm231_vm3, 0.0, %v3295_v30 }
 0x434   : > { %v8698_v19 = vpop.permute.xlu1 %3653 }
 0x435   : > { %10268 = vst [vmem:[#allocation126_spill] sm:$0xff] %v8698_v19  ;;  %v8700_v3 = vpop.permute.xlu0 %3651 }
 0x436   : > { %10269 = vst [vmem:[#allocation77_spill] sm:$0xff] %v8700_v3  ;;  %3777 = vrot.lane.b32.xlu1 %v5413_v55, %s5436_s27  ;;  %v3056_v55 = vsel %vm464_vm2, %v3024_v32, %v3040_v42  ;;  %v3200_v3 = vsel %vm367_vm1, %v3168_v58, %v3152_v38 }
 0x437   : > { %4283 = vrot.lane.b32.xlu0 %v3279_v22, %s5440_s16  ;;  %v3072_v22 = vsel %vm464_vm2, %v3040_v42, %v3024_v32  ;;  %v3221_v30 = vsel %vm228_vm4, 0.0, %v3200_v3  ;;  %v3184_v32 = vsel %vm367_vm1, %v3152_v38, %v3168_v58  ;;  %v5415_v58 = vld [vmem:[#allocation2 + $0x78] sm:$0xff] }
 0x438   : > { %v8708_v51 = vpop.permute.xlu1 %3657  ;;  %v3041_v38 = vrot.slane %v5415_v58, 1 }
 0x439   : > { %10270 = vst [vmem:[#allocation86_spill] sm:$0xff] %v8708_v51  ;;  %v8710_v19 = vpop.permute.xlu0 %3655 }
 0x43a   : > { %10271 = vst [vmem:[#allocation154_spill] sm:$0xff] %v8710_v19  ;;  %4285 = vrot.lane.b32.xlu1 %v3316_v0, %s5440_s16  ;;  %v3094_v0 = vsel %vm231_vm3, 0.0, %v3072_v22  ;;  %v3264_v22 = vrot.slane %v3126_v34, 1 }
 0x43b   : > { %3903 = vrot.lane.b32.xlu0 %v3056_v55, %s5437_s28 }
 0x43c   : > { %v8722_v15 = vpop.permute.xlu1 %3661 }
 0x43d   : > { %10272 = vst [vmem:[#allocation125_spill] sm:$0xff] %v8722_v15  ;;  %v8724_v63 = vpop.permute.xlu0 %3659  ;;  %v5414_v15 = vld [vmem:[#allocation2 + $0x70] sm:$0xff] }
 0x43e   : > { %10273 = vst [vmem:[#allocation167_spill] sm:$0xff] %v8724_v63  ;;  %4031 = vrot.lane.b32.xlu1 %v3221_v30, %s5438_s29  ;;  %v3248_v30 = vrot.slane %v3125_v48, 1  ;;  %v3025_v19 = vrot.slane %v5414_v15, 1 }
 0x43f   : > { %3905 = vrot.lane.b32.xlu0 %v3094_v0, %s5437_s28  ;;  %v8744_v0 = vld [vmem:[#allocation2 + $0x80] sm:$0xff] }
 0x440   : > { %v8732_v51 = vpop.permute.xlu1 %3665 }
 0x441   : > { %10274 = vst [vmem:[#allocation153_spill] sm:$0xff] %v8732_v51  ;;  %v8734_v55 = vpop.permute.xlu0 %3663  ;;  %v8746_v51 = vld [vmem:[#allocation2 + $0x88] sm:$0xff] }
 0x442   : > { %10275 = vst [vmem:[#allocation166_spill] sm:$0xff] %v8734_v55  ;;  %4159 = vrot.lane.b32.xlu1 %v3125_v48, %s5439_s15  ;;  %v3153_v48 = vrot.slane %v8744_v0, 7 }
 0x443   : > { %4033 = vrot.lane.b32.xlu0 %v3184_v32, %s5438_s29  ;;  %v3280_v32 = vsel %vm464_vm2, %v3248_v30, %v3264_v22 }
 0x444   : > { %v3756_v42 = vpop.permute.xlu1 %3755 }
 0x445   : > { %v8740_v3 = vpop.permute.xlu0 %3667 }
 0x446   : > { %10276 = vst [vmem:[#allocation185_spill] sm:$0xff] %v8740_v3  ;;  %4161 = vrot.lane.b32.xlu1 %v3126_v34, %s5439_s15  ;;  %v3296_v34 = vsel %vm464_vm2, %v3264_v22, %v3248_v30  ;;  %v3169_v3 = vrot.slane %v8746_v51, 7  ;;  %v3073_v30 = vsel %vm464_vm2, %v3041_v38, %v3025_v19  ;;  %v2763_v22 = vsel %vm228_vm4, 0.0, %v7813_v21 }
 0x447   : > { %3779 = vrot.lane.b32.xlu0 %v5414_v15, %s5436_s27  ;;  %v3318_v15 = vsel %vm231_vm3, 0.0, %v3296_v34 }
 0x448   : > { %v3884_v55 = vpop.permute.xlu1 %3883  ;;  %v3201_v6 = vsel %vm367_vm1, %v3169_v3, %v3153_v48 }
 0x449   : > { %v3758_v63 = vpop.permute.xlu0 %3757  ;;  %v3223_v34 = vsel %vm228_vm4, 0.0, %v3201_v6  ;;  %v4364_v6 = vsel %vm232_vm0, %v7809_v60, %v8213_v17 }
 0x44a   : > { %3781 = vrot.lane.b32.xlu1 %v5415_v58, %s5436_s27  ;;  %v3057_v58 = vsel %vm464_vm2, %v3025_v19, %v3041_v38 }
 0x44b   : > { %4287 = vrot.lane.b32.xlu0 %v3280_v32, %s5440_s16 }
 0x44c   : > { %v4012_v8 = vpop.permute.xlu1 %4011 }
 0x44d   : > { %v3886_v14 = vpop.permute.xlu0 %3885 }
 0x44e   : > { %4289 = vrot.lane.b32.xlu1 %v3318_v15, %s5440_s16  ;;  %v3096_v15 = vsel %vm231_vm3, 0.0, %v3073_v30 }
 0x44f   : > { %3907 = vrot.lane.b32.xlu0 %v3057_v58, %s5437_s28  ;;  %v4363_v58 = vsel %vm232_vm0, %v2763_v22, %v8216_v36  ;;  %v3185_v36 = vsel %vm367_vm1, %v3153_v48, %v3169_v3  ;;  %v3265_v48 = vrot.slane %v8746_v51, 1 }
 0x450   : > { %v4140_v32 = vpop.permute.xlu1 %4139  ;;  %v4395_v19 = vsel %vm2034_vm6, %v4363_v58, %v8504_v35  ;;  %v4396_v35 = vsel %vm2034_vm6, %v4364_v6, %v8501_v37  ;;  %v5417_v6 = vld [vmem:[#allocation2 + $0x88] sm:$0xff] }
 0x451   : > { %v4014_v29 = vpop.permute.xlu0 %4013  ;;  %v4427_v21 = vsel %vm2067_vm7, %v4395_v19, %v8648_v59  ;;  %v4428_v59 = vsel %vm2067_vm7, %v4396_v35, %v8646_v54 }
 0x452   : > { %4035 = vrot.lane.b32.xlu1 %v3223_v34, %s5438_s29  ;;  %v4459_v34 = vsel %vm2100_vm8, %v4427_v21, %v3756_v42  ;;  %v4460_v42 = vsel %vm2100_vm8, %v4428_v59, %v3758_v63  ;;  %v8807_v63 = vld [vmem:[#allocation2 + $0x90] sm:$0xff] }
 0x453   : > { %3909 = vrot.lane.b32.xlu0 %v3096_v15, %s5437_s28  ;;  %v4491_v30 = vsel %vm2133_vm9, %v4459_v34, %v3884_v55  ;;  %v4492_v3 = vsel %vm2133_vm9, %v4460_v42, %v3886_v14  ;;  %v3249_v55 = vrot.slane %v8744_v0, 1 }
 0x454   : > { %v4142_v38 = vpop.permute.xlu1 %4141  ;;  %v4523_v60 = vsel %vm2166_vm10, %v4491_v30, %v4012_v8  ;;  %v4524_v54 = vsel %vm2166_vm10, %v4492_v3, %v4014_v29  ;;  %v5416_v8 = vld [vmem:[#allocation2 + $0x80] sm:$0xff] }
 0x455   : > { %v3760_v47 = vpop.permute.xlu0 %3759  ;;  %v4555_v22 = vsel %vm2199_vm11, %v4523_v60, %v4140_v32  ;;  %v8809_v32 = vld [vmem:[#allocation2 + $0x98] sm:$0xff]  ;;  %v4556_v14 = vsel %vm2199_vm11, %v4524_v54, %v4142_v38  ;;  %v3281_v29 = vsel %vm464_vm2, %v3249_v55, %v3265_v48  ;;  %v3297_v34 = vsel %vm464_vm2, %v3265_v48, %v3249_v55 }
 0x456   : > { %4163 = vrot.lane.b32.xlu1 %v8744_v0, %s5439_s15  ;;  %v3026_v0 = vrot.slane %v5416_v8, 1  ;;  %v3170_v38 = vrot.slane %v8809_v32, 7  ;;  %v3320_v59 = vsel %vm231_vm3, 0.0, %v3297_v34  ;;  %v4365_v48 = vsel %vm232_vm0, %v8268_v1, %v8232_v10 }
 0x457   : > { %4037 = vrot.lane.b32.xlu0 %v3185_v36, %s5438_s29  ;;  %v3154_v36 = vrot.slane %v8807_v63, 7  ;;  %v4397_v54 = vsel %vm2034_vm6, %v4365_v48, %v8513_v16 }
 0x458   : > { %v3762_v17 = vpop.permute.xlu1 %3761 }
 0x459   : > { %v4268_v15 = vpop.permute.xlu0 %4267  ;;  %v3202_v42 = vsel %vm367_vm1, %v3170_v38, %v3154_v36  ;;  %v3186_v10 = vsel %vm367_vm1, %v3154_v36, %v3170_v38  ;;  %v5418_v36 = vld [vmem:[#allocation2 + $0x90] sm:$0xff]  ;;  %v8873_v38 = vld [vmem:[#allocation2 + $0xa8] sm:$0xff] }
 0x45a   : > { %4165 = vrot.lane.b32.xlu1 %v8746_v51, %s5439_s15  ;;  %v4587_v37 = vsel %vm2232_vm12, %v4555_v22, %v4268_v15  ;;  %v3042_v51 = vrot.slane %v5417_v6, 1 }
 0x45b   : > { %3783 = vrot.lane.b32.xlu0 %v5416_v8, %s5436_s27  ;;  %5329 = vmatprep.mubr.msk.f32.mxu1 %vm2277_vm13, %v4587_v37  ;;  %v3225_v37 = vsel %vm228_vm4, 0.0, %v3202_v42  ;;  %v5419_v42 = vld [vmem:[#allocation2 + $0x98] sm:$0xff] }
 0x45c   : > { %v4270_v58 = vpop.permute.xlu1 %4269  ;;  %v3058_v60 = vsel %vm464_vm2, %v3026_v0, %v3042_v51  ;;  %v3074_v22 = vsel %vm464_vm2, %v3042_v51, %v3026_v0 }
 0x45d   : > { %v4588_v19 = vsel %vm2232_vm12, %v4556_v14, %v4270_v58  ;;  %v3888_v21 = vpop.permute.xlu0 %3887  ;;  %v3098_v55 = vsel %vm231_vm3, 0.0, %v3074_v22  ;;  %v4429_v14 = vsel %vm2067_vm7, %v4397_v54, %v8655_v46 }
 0x45e   : > { %3785 = vrot.lane.b32.xlu1 %v5417_v6, %s5436_s27  ;;  %5330 = vmatmul.mubr.msk.f32.vlgmr.msra.gmra.mrb[0].mxu1 %vm2277_vm13, %v4588_v19  ;;  %v4366_v19 = vsel %vm232_vm0, %v8262_v53, %v8230_v57  ;;  %v4461_v0 = vsel %vm2100_vm8, %v4429_v14, %v3760_v47 }
 0x45f   : > { %4291 = vrot.lane.b32.xlu0 %v3281_v29, %s5440_s16  ;;  %v4398_v1 = vsel %vm2034_vm6, %v4366_v19, %v8511_v20  ;;  %v4493_v16 = vsel %vm2133_vm9, %v4461_v0, %v3888_v21  ;;  %v3250_v20 = vrot.slane %v8807_v63, 1  ;;  %v3266_v21 = vrot.slane %v8809_v32, 1 }
 0x460   : > { %v4016_v35 = vpop.permute.xlu1 %4015  ;;  %v4430_v46 = vsel %vm2067_vm7, %v4398_v1, %v8653_v33 }
 0x461   : > { %v3890_v30 = vpop.permute.xlu0 %3889  ;;  %v4525_v57 = vsel %vm2166_vm10, %v4493_v16, %v4016_v35  ;;  %v4462_v47 = vsel %vm2100_vm8, %v4430_v46, %v3762_v17  ;;  %v8871_v17 = vld [vmem:[#allocation2 + $0xa0] sm:$0xff]  ;;  %v3282_v22 = vsel %vm464_vm2, %v3250_v20, %v3266_v21  ;;  %v4367_v46 = vsel %vm232_vm0, %v8288_v9, %v8246_v40 }
 0x462   : > { %4293 = vrot.lane.b32.xlu1 %v3320_v59, %s5440_s16  ;;  %v4494_v29 = vsel %vm2133_vm9, %v4462_v47, %v3890_v30 }
 0x463   : > { %3911 = vrot.lane.b32.xlu0 %v3058_v60, %s5437_s28 }
 0x464   : > { %v4144_v15 = vpop.permute.xlu1 %4143 }
 0x465   : > { %v4018_v3 = vpop.permute.xlu0 %4017  ;;  %v4557_v6 = vsel %vm2199_vm11, %v4525_v57, %v4144_v15  ;;  %v3298_v15 = vsel %vm464_vm2, %v3266_v21, %v3250_v20  ;;  %v4399_v57 = vsel %vm2034_vm6, %v4367_v46, %v8521_v28 }
 0x466   : > { %4039 = vrot.lane.b32.xlu1 %v3225_v37, %s5438_s29  ;;  %v4526_v33 = vsel %vm2166_vm10, %v4494_v29, %v4018_v3  ;;  %v3155_v3 = vrot.slane %v8871_v17, 7  ;;  %v3171_v37 = vrot.slane %v8873_v38, 7  ;;  %v3322_v54 = vsel %vm231_vm3, 0.0, %v3298_v15 }
 0x467   : > { %3913 = vrot.lane.b32.xlu0 %v3098_v55, %s5437_s28  ;;  %v4368_v29 = vsel %vm232_vm0, %v8282_v31, %v8244_v18 }
 0x468   : > { %v4146_v8 = vpop.permute.xlu1 %4145  ;;  %v3203_v14 = vsel %vm367_vm1, %v3171_v37, %v3155_v3  ;;  %v3187_v40 = vsel %vm367_vm1, %v3155_v3, %v3171_v37  ;;  %v4400_v9 = vsel %vm2034_vm6, %v4368_v29, %v8519_v26  ;;  %v3251_v26 = vrot.slane %v8871_v17, 1 }
 0x469   : > { %v3764_v58 = vpop.permute.xlu0 %3763  ;;  %v4558_v35 = vsel %vm2199_vm11, %v4526_v33, %v4146_v8  ;;  %v3227_v1 = vsel %vm228_vm4, 0.0, %v3203_v14 }
 0x46a   : > { %4167 = vrot.lane.b32.xlu1 %v8807_v63, %s5439_s15  ;;  %v3027_v63 = vrot.slane %v5418_v36, 1 }
 0x46b   : > { %4041 = vrot.lane.b32.xlu0 %v3186_v10, %s5438_s29 }
 0x46c   : > { %v3766_v53 = vpop.permute.xlu1 %3765 }
 0x46d   : > { %v4272_v51 = vpop.permute.xlu0 %4271 }
 0x46e   : > { %v4589_v34 = vsel %vm2232_vm12, %v4557_v6, %v4272_v51  ;;  %4169 = vrot.lane.b32.xlu1 %v8809_v32, %s5439_s15  ;;  %v3043_v32 = vrot.slane %v5419_v42, 1  ;;  %v4431_v6 = vsel %vm2067_vm7, %v4399_v57, %v8666_v2  ;;  %v4432_v2 = vsel %vm2067_vm7, %v4400_v9, %v8664_v49 }
 0x46f   : > { %3787 = vrot.lane.b32.xlu0 %v5418_v36, %s5436_s27  ;;  %5332 = vmatprep.mubr.msk.f32.mxu1 %vm2277_vm13, %v4589_v34  ;;  %v4463_v34 = vsel %vm2100_vm8, %v4431_v6, %v3764_v58  ;;  %v4464_v58 = vsel %vm2100_vm8, %v4432_v2, %v3766_v53  ;;  %v8935_v53 = vld [vmem:[#allocation2 + $0xb0] sm:$0xff]  ;;  %v4369_v57 = vsel %vm232_vm0, %v8308_v24, %v8264_v23 }
 0x470   : > { %v4274_v30 = vpop.permute.xlu1 %4273  ;;  %v3059_v8 = vsel %vm464_vm2, %v3027_v63, %v3043_v32  ;;  %v3075_v19 = vsel %vm464_vm2, %v3043_v32, %v3027_v63  ;;  %v3156_v37 = vrot.slane %v8935_v53, 7 }
 0x471   : > { %v4590_v59 = vsel %vm2232_vm12, %v4558_v35, %v4274_v30  ;;  %v3892_v60 = vpop.permute.xlu0 %3891  ;;  %v3100_v16 = vsel %vm231_vm3, 0.0, %v3075_v19  ;;  %v3267_v35 = vrot.slane %v8873_v38, 1  ;;  %v5420_v30 = vld [vmem:[#allocation2 + $0xa0] sm:$0xff] }
 0x472   : > { %3789 = vrot.lane.b32.xlu1 %v5419_v42, %s5436_s27  ;;  %5333 = vmatmul.mubr.msk.f32.gmra.mrb[2].mxu1 %vm2277_vm13, %v4590_v59  ;;  %v4495_v28 = vsel %vm2133_vm9, %v4463_v34, %v3892_v60  ;;  %v8937_v59 = vld [vmem:[#allocation2 + $0xb8] sm:$0xff] }
 0x473   : > { %4295 = vrot.lane.b32.xlu0 %v3282_v22, %s5440_s16  ;;  %v5421_v22 = vld [vmem:[#allocation2 + $0xa8] sm:$0xff]  ;;  %v3283_v15 = vsel %vm464_vm2, %v3251_v26, %v3267_v35  ;;  %v3299_v3 = vsel %vm464_vm2, %v3267_v35, %v3251_v26 }
 0x474   : > { %v4020_v55 = vpop.permute.xlu1 %4019 }
 0x475   : > { %v3894_v48 = vpop.permute.xlu0 %3893  ;;  %v4527_v18 = vsel %vm2166_vm10, %v4495_v28, %v4020_v55  ;;  %v3172_v55 = vrot.slane %v8937_v59, 7 }
 0x476   : > { %4297 = vrot.lane.b32.xlu1 %v3322_v54, %s5440_s16  ;;  %v4496_v33 = vsel %vm2133_vm9, %v4464_v58, %v3894_v48  ;;  %v3268_v58 = vrot.slane %v8937_v59, 1 }
 0x477   : > { %3915 = vrot.lane.b32.xlu0 %v3059_v8, %s5437_s28  ;;  %v3324_v8 = vsel %vm231_vm3, 0.0, %v3299_v3  ;;  %v3204_v19 = vsel %vm367_vm1, %v3172_v55, %v3156_v37  ;;  %v3188_v24 = vsel %vm367_vm1, %v3156_v37, %v3172_v55 }
 0x478   : > { %v4148_v0 = vpop.permute.xlu1 %4147 }
 0x479   : > { %v4022_v10 = vpop.permute.xlu0 %4021  ;;  %v4559_v20 = vsel %vm2199_vm11, %v4527_v18, %v4148_v0  ;;  %v3252_v18 = vrot.slane %v8935_v53, 1 }
 0x47a   : > { %4043 = vrot.lane.b32.xlu1 %v3227_v1, %s5438_s29  ;;  %v4528_v49 = vsel %vm2166_vm10, %v4496_v33, %v4022_v10 }
 0x47b   : > { %3917 = vrot.lane.b32.xlu0 %v3100_v16, %s5437_s28  ;;  %v3229_v16 = vsel %vm228_vm4, 0.0, %v3204_v19  ;;  %v3284_v35 = vsel %vm464_vm2, %v3252_v18, %v3268_v58 }
 0x47c   : > { %v4150_v47 = vpop.permute.xlu1 %4149 }
 0x47d   : > { %v3768_v51 = vpop.permute.xlu0 %3767  ;;  %v4560_v60 = vsel %vm2199_vm11, %v4528_v49, %v4150_v47  ;;  %v4401_v47 = vsel %vm2034_vm6, %v4369_v57, %v8529_v27 }
 0x47e   : > { %4171 = vrot.lane.b32.xlu1 %v8871_v17, %s5439_s15  ;;  %v3028_v17 = vrot.slane %v5420_v30, 1  ;;  %v4433_v29 = vsel %vm2067_vm7, %v4401_v47, %v8677_v44 }
 0x47f   : > { %4045 = vrot.lane.b32.xlu0 %v3187_v40, %s5438_s29  ;;  %v4370_v40 = vsel %vm232_vm0, %v8302_v13, %v8258_v61  ;;  %v4465_v9 = vsel %vm2100_vm8, %v4433_v29, %v3768_v51 }
 0x480   : > { %v3770_v31 = vpop.permute.xlu1 %3769  ;;  %v4402_v23 = vsel %vm2034_vm6, %v4370_v40, %v8527_v11 }
 0x481   : > { %v4276_v21 = vpop.permute.xlu0 %4275  ;;  %v4434_v44 = vsel %vm2067_vm7, %v4402_v23, %v8675_v41 }
 0x482   : > { %v4591_v36 = vsel %vm2232_vm12, %v4559_v20, %v4276_v21  ;;  %4173 = vrot.lane.b32.xlu1 %v8873_v38, %s5439_s15  ;;  %v3044_v38 = vrot.slane %v5421_v22, 1  ;;  %v4466_v51 = vsel %vm2100_vm8, %v4434_v44, %v3770_v31  ;;  %v5422_v21 = vld [vmem:[#allocation2 + $0xb0] sm:$0xff] }
 0x483   : > { %3791 = vrot.lane.b32.xlu0 %v5420_v30, %s5436_s27  ;;  %5335 = vmatprep.mubr.msk.f32.mxu1 %vm2277_vm13, %v4591_v36  ;;  %v3029_v49 = vrot.slane %v5422_v21, 1  ;;  %v5423_v30 = vld [vmem:[#allocation2 + $0xb8] sm:$0xff] }
 0x484   : > { %v4278_v63 = vpop.permute.xlu1 %4277  ;;  %v3060_v14 = vsel %vm464_vm2, %v3028_v17, %v3044_v38  ;;  %v3076_v0 = vsel %vm464_vm2, %v3044_v38, %v3028_v17 }
 0x485   : > { %v4592_v42 = vsel %vm2232_vm12, %v4560_v60, %v4278_v63  ;;  %v3896_v32 = vpop.permute.xlu0 %3895  ;;  %v3102_v46 = vsel %vm231_vm3, 0.0, %v3076_v0  ;;  %v9007_v60 = vld [vmem:[#allocation2 + $0xc0] sm:$0xff]  ;;  %v9009_v63 = vld [vmem:[#allocation2 + $0xc8] sm:$0xff] }
 0x486   : > { %3793 = vrot.lane.b32.xlu1 %v5421_v22, %s5436_s27  ;;  %5336 = vmatmul.mubr.msk.f32.gmra.mrb[4].mxu1 %vm2277_vm13, %v4592_v42  ;;  %v4497_v27 = vsel %vm2133_vm9, %v4465_v9, %v3896_v32  ;;  %v2934_v38 = vrot.slane %v9007_v60, 7  ;;  %v3253_v23 = vrot.slane %v9007_v60, 1 }
 0x487   : > { %4299 = vrot.lane.b32.xlu0 %v3283_v15, %s5440_s16  ;;  %v2950_v15 = vrot.slane %v9009_v63, 7 }
 0x488   : > { %v4024_v48 = vpop.permute.xlu1 %4023 }
 0x489   : > { %v3898_v54 = vpop.permute.xlu0 %3897  ;;  %v4529_v61 = vsel %vm2166_vm10, %v4497_v27, %v4024_v48  ;;  %v3269_v27 = vrot.slane %v9009_v63, 1 }
 0x48a   : > { %4301 = vrot.lane.b32.xlu1 %v3324_v8, %s5440_s16  ;;  %v4498_v11 = vsel %vm2133_vm9, %v4466_v51, %v3898_v54  ;;  %v2982_v54 = vsel %vm367_vm1, %v2950_v15, %v2934_v38  ;;  %v4371_v8 = vsel %vm232_vm0, %v8328_v43, %v8284_v12  ;;  %v9074_v51 = vld [vmem:[#allocation2 + $0xd0] sm:$0xff] }
 0x48b   : > { %3919 = vrot.lane.b32.xlu0 %v3060_v14, %s5437_s28  ;;  %v4403_v14 = vsel %vm2034_vm6, %v4371_v8, %v8539_v25 }
 0x48c   : > { %v4152_v10 = vpop.permute.xlu1 %4151  ;;  %v4435_v0 = vsel %vm2067_vm7, %v4403_v14, %v8686_v4 }
 0x48d   : > { %v4026_v1 = vpop.permute.xlu0 %4025  ;;  %v4561_v28 = vsel %vm2199_vm11, %v4529_v61, %v4152_v10 }
 0x48e   : > { %4047 = vrot.lane.b32.xlu1 %v3229_v16, %s5438_s29  ;;  %v4530_v41 = vsel %vm2166_vm10, %v4498_v11, %v4026_v1  ;;  %v3009_v1 = vsel %vm228_vm4, 0.0, %v2982_v54  ;;  %v4372_v16 = vsel %vm232_vm0, %v8322_v56, %v8278_v39  ;;  %v2935_v11 = vrot.slane %v9074_v51, 7 }
 0x48f   : > { %3921 = vrot.lane.b32.xlu0 %v3102_v46, %s5437_s28  ;;  %v4404_v43 = vsel %vm2034_vm6, %v4372_v16, %v8537_v7  ;;  %v3189_v7 = vsel %vm367_vm1, %v2934_v38, %v2950_v15  ;;  %v10283_v38 = vld [vmem:[#allocation79_spill] sm:$0xff] }
 0x490   : > { %v4154_v6 = vpop.permute.xlu1 %4153  ;;  %v4436_v25 = vsel %vm2067_vm7, %v4404_v43, %v8684_v50 }
 0x491   : > { %v3772_v34 = vpop.permute.xlu0 %3771  ;;  %v4562_v31 = vsel %vm2199_vm11, %v4530_v41, %v4154_v6 }
 0x492   : > { %4175 = vrot.lane.b32.xlu1 %v8935_v53, %s5439_s15  ;;  %v3045_v53 = vrot.slane %v5423_v30, 1  ;;  %v4467_v46 = vsel %vm2100_vm8, %v4435_v0, %v3772_v34 }
 0x493   : > { %4049 = vrot.lane.b32.xlu0 %v3188_v24, %s5438_s29 }
 0x494   : > { %v3774_v13 = vpop.permute.xlu1 %3773  ;;  %v3061_v17 = vsel %vm464_vm2, %v3029_v49, %v3045_v53  ;;  %v3077_v22 = vsel %vm464_vm2, %v3045_v53, %v3029_v49  ;;  %v10280_v53 = vld [vmem:[#allocation62_spill] sm:$0xff] }
 0x495   : > { %v4280_v2 = vpop.permute.xlu0 %4279  ;;  %v3104_v55 = vsel %vm231_vm3, 0.0, %v3077_v22  ;;  %v4468_v47 = vsel %vm2100_vm8, %v4436_v25, %v3774_v13  ;;  %v3285_v13 = vsel %vm464_vm2, %v3253_v23, %v3269_v27  ;;  %v3254_v25 = vrot.slane %v9074_v51, 1 }
 0x496   : > { %v4593_v20 = vsel %vm2232_vm12, %v4561_v28, %v4280_v2  ;;  %3795 = vrot.lane.b32.xlu1 %v5422_v21, %s5436_s27  ;;  %v9076_v28 = vld [vmem:[#allocation2 + $0xd8] sm:$0xff]  ;;  %v10277_v21 = vld [vmem:[#allocation49_spill] sm:$0xff] }
 0x497   : > { %3669 = vrot.lane.b32.xlu0 %v7972_v52, %s5435_s26  ;;  %5338 = vmatprep.mubr.msk.f32.mxu1 %vm2277_vm13, %v4593_v20  ;;  %v2951_v20 = vrot.slane %v9076_v28, 7  ;;  %v4373_v41 = vsel %vm232_vm0, %v8348_v62, %v10277_v21 }
 0x498   : > { %v4282_v33 = vpop.permute.xlu1 %4281 }
 0x499   : > { %v4594_v36 = vsel %vm2232_vm12, %v4562_v31, %v4282_v33  ;;  %v3900_v26 = vpop.permute.xlu0 %3899  ;;  %v10278_v31 = vld [vmem:[#allocation80_spill] sm:$0xff] }
 0x49a   : > { %4303 = vrot.lane.b32.xlu1 %v3284_v35, %s5440_s16  ;;  %5339 = vmatmul.mubr.msk.f32.gmra.mrb[6].mxu1 %vm2277_vm13, %v4594_v36  ;;  %v4499_v12 = vsel %vm2133_vm9, %v4467_v46, %v3900_v26  ;;  %v4405_v33 = vsel %vm2034_vm6, %v4373_v41, %v10278_v31  ;;  %v10279_v26 = vld [vmem:[#allocation88_spill] sm:$0xff]  ;;  %v3190_v46 = vsel %vm367_vm1, %v2935_v11, %v2951_v20  ;;  %v10291_v41 = vld [vmem:[#allocation126_spill] sm:$0xff] }
 0x49b   : > { %4177 = vrot.lane.b32.xlu0 %v8937_v59, %s5439_s15  ;;  %v3300_v59 = vsel %vm464_vm2, %v3268_v58, %v3252_v18  ;;  %v3078_v58 = vsel %vm464_vm2, %v3269_v27, %v3253_v23  ;;  %v4437_v35 = vsel %vm2067_vm7, %v4405_v33, %v10279_v26 }
 0x49c   : > { %v4028_v42 = vpop.permute.xlu1 %4027  ;;  %v3326_v48 = vsel %vm231_vm3, 0.0, %v3300_v59 }
 0x49d   : > { %v3902_v32 = vpop.permute.xlu0 %3901  ;;  %v4531_v4 = vsel %vm2166_vm10, %v4499_v12, %v4028_v42 }
 0x49e   : > { %3923 = vrot.lane.b32.xlu1 %v3061_v17, %s5437_s28  ;;  %v4500_v6 = vsel %vm2133_vm9, %v4468_v47, %v3902_v32  ;;  %v10282_v32 = vld [vmem:[#allocation71_spill] sm:$0xff] }
 0x49f   : > { %3797 = vrot.lane.b32.xlu0 %v5423_v30, %s5436_s27  ;;  %v3106_v30 = vsel %vm231_vm3, 0.0, %v3078_v58 }
 0x4a0   : > { %v4156_v3 = vpop.permute.xlu1 %4155 }
 0x4a1   : > { %v4030_v37 = vpop.permute.xlu0 %4029  ;;  %v4563_v39 = vsel %vm2199_vm11, %v4531_v4, %v4156_v3  ;;  %v3270_v4 = vrot.slane %v9076_v28, 1 }
 0x4a2   : > { %3925 = vrot.lane.b32.xlu1 %v3104_v55, %s5437_s28  ;;  %v4532_v50 = vsel %vm2166_vm10, %v4500_v6, %v4030_v37  ;;  %v10285_v6 = vld [vmem:[#allocation115_spill] sm:$0xff] }
 0x4a3   : > { %4305 = vrot.lane.b32.xlu0 %v3326_v48, %s5440_s16 }
 0x4a4   : > { %v4158_v19 = vpop.permute.xlu1 %4157 }
 0x4a5   : > { %v3776_v10 = vpop.permute.xlu0 %3775  ;;  %v4564_v34 = vsel %vm2199_vm11, %v4532_v50, %v4158_v19  ;;  %v9141_v50 = vld [vmem:[#allocation2 + $0xe8] sm:$0xff] }
 0x4a6   : > { %3671 = vrot.lane.b32.xlu1 %v3009_v1, %s5435_s26  ;;  %v4469_v62 = vsel %vm2100_vm8, %v4437_v35, %v3776_v10  ;;  %v2952_v58 = vrot.slane %v9141_v50, 7 }
 0x4a7   : > { %4051 = vrot.lane.b32.xlu0 %v3009_v1, %s5438_s29 }
 0x4a8   : > { %v3778_v57 = vpop.permute.xlu1 %3777 }
 0x4a9   : > { %v4284_v56 = vpop.permute.xlu0 %4283 }
 0x4aa   : > { %v4595_v29 = vsel %vm2232_vm12, %v4563_v39, %v4284_v56  ;;  %4179 = vrot.lane.b32.xlu1 %v9007_v60, %s5439_s15  ;;  %v3286_v39 = vsel %vm464_vm2, %v3254_v25, %v3270_v4  ;;  %v10284_v56 = vld [vmem:[#allocation48_spill] sm:$0xff] }
 0x4ab   : > { %4053 = vrot.lane.b32.xlu0 %v3189_v7, %s5438_s29  ;;  %5341 = vmatprep.mubr.msk.f32.mxu1 %vm2277_vm13, %v4595_v29  ;;  %v4375_v29 = vsel %vm232_vm0, %v10285_v6, %v10284_v56  ;;  %v9212_v6 = vld [vmem:[#allocation2 + $0xf0] sm:$0xff] }
 0x4ac   : > { %v4286_v40 = vpop.permute.xlu1 %4285 }
 0x4ad   : > { %v4596_v9 = vsel %vm2232_vm12, %v4564_v34, %v4286_v40  ;;  %v3904_v24 = vpop.permute.xlu0 %3903  ;;  %v10286_v34 = vld [vmem:[#allocation69_spill] sm:$0xff] }
 0x4ae   : > { %3799 = vrot.lane.b32.xlu1 %v9007_v60, %s5436_s27  ;;  %5342 = vmatmul.mubr.msk.f32.gmra.mrb[8].mxu1 %vm2277_vm13, %v4596_v9  ;;  %v10281_v60 = vld [vmem:[#allocation68_spill] sm:$0xff]  ;;  %v4501_v22 = vsel %vm2133_vm9, %v4469_v62, %v3904_v24  ;;  %v4407_v40 = vsel %vm2034_vm6, %v4375_v29, %v10286_v34  ;;  %v10287_v24 = vld [vmem:[#allocation77_spill] sm:$0xff]  ;;  %v9214_v29 = vld [vmem:[#allocation2 + $0xf8] sm:$0xff] }
 0x4af   : > { %3673 = vrot.lane.b32.xlu0 %v3189_v7, %s5435_s26  ;;  %v4374_v42 = vsel %vm232_vm0, %v10281_v60, %v10280_v53  ;;  %v9139_v7 = vld [vmem:[#allocation2 + $0xe0] sm:$0xff]  ;;  %v4439_v23 = vsel %vm2067_vm7, %v4407_v40, %v10287_v24 }
 0x4b0   : > { %v4032_v44 = vpop.permute.xlu1 %4031  ;;  %v4406_v17 = vsel %vm2034_vm6, %v4374_v42, %v10282_v32 }
 0x4b1   : > { %v3906_v61 = vpop.permute.xlu0 %3905  ;;  %v4438_v15 = vsel %vm2067_vm7, %v4406_v17, %v10283_v38  ;;  %v4533_v59 = vsel %vm2166_vm10, %v4501_v22, %v4032_v44  ;;  %v3079_v44 = vsel %vm464_vm2, %v3270_v4, %v3254_v25  ;;  %v10297_v25 = vld [vmem:[#allocation143_spill] sm:$0xff] }
 0x4b2   : > { %4307 = vrot.lane.b32.xlu1 %v3285_v13, %s5440_s16  ;;  %v4470_v37 = vsel %vm2100_vm8, %v4438_v15, %v3778_v57 }
 0x4b3   : > { %4181 = vrot.lane.b32.xlu0 %v9009_v63, %s5439_s15  ;;  %v4502_v8 = vsel %vm2133_vm9, %v4470_v37, %v3906_v61  ;;  %v10288_v61 = vld [vmem:[#allocation142_spill] sm:$0xff] }
 0x4b4   : > { %v4160_v2 = vpop.permute.xlu1 %4159 }
 0x4b5   : > { %v4034_v18 = vpop.permute.xlu0 %4033  ;;  %v4565_v55 = vsel %vm2199_vm11, %v4533_v59, %v4160_v2 }
 0x4b6   : > { %3927 = vrot.lane.b32.xlu1 %v3285_v13, %s5437_s28  ;;  %v4534_v19 = vsel %vm2166_vm10, %v4502_v8, %v4034_v18  ;;  %v10289_v13 = vld [vmem:[#allocation66_spill] sm:$0xff]  ;;  %v2936_v18 = vrot.slane %v9139_v7, 7  ;;  %v10293_v8 = vld [vmem:[#allocation63_spill] sm:$0xff] }
 0x4b7   : > { %3801 = vrot.lane.b32.xlu0 %v9009_v63, %s5436_s27  ;;  %v2983_v63 = vsel %vm367_vm1, %v2951_v20, %v2935_v11  ;;  %v10290_v11 = vld [vmem:[#allocation122_spill] sm:$0xff] }
 0x4b8   : > { %v4162_v36 = vpop.permute.xlu1 %4161  ;;  %v3011_v54 = vsel %vm228_vm4, 0.0, %v2983_v63  ;;  %v3191_v59 = vsel %vm367_vm1, %v2936_v18, %v2952_v58 }
 0x4b9   : > { %v3780_v49 = vpop.permute.xlu0 %3779  ;;  %v4566_v0 = vsel %vm2199_vm11, %v4534_v19, %v4162_v36  ;;  %v10294_v19 = vld [vmem:[#allocation150_spill] sm:$0xff] }
 0x4ba   : > { %3929 = vrot.lane.b32.xlu1 %v3106_v30, %s5437_s28  ;;  %v4471_v2 = vsel %vm2100_vm8, %v4439_v23, %v3780_v49 }
 0x4bb   : > { %4309 = vrot.lane.b32.xlu0 %v3106_v30, %s5440_s16  ;;  %v3108_v30 = vsel %vm231_vm3, 0.0, %v3079_v44 }
 0x4bc   : > { %v3782_v3 = vpop.permute.xlu1 %3781 }
 0x4bd   : > { %v4288_v48 = vpop.permute.xlu0 %4287 }
 0x4be   : > { %v4597_v14 = vsel %vm2232_vm12, %v4565_v55, %v4288_v48  ;;  %3675 = vrot.lane.b32.xlu1 %v3011_v54, %s5435_s26  ;;  %v3255_v55 = vrot.slane %v9139_v7, 1  ;;  %v3271_v48 = vrot.slane %v9141_v50, 1 }
 0x4bf   : > { %4055 = vrot.lane.b32.xlu0 %v3011_v54, %s5438_s29  ;;  %5344 = vmatprep.mubr.msk.f32.mxu1 %vm2277_vm13, %v4597_v14  ;;  %v10292_v54 = vld [vmem:[#allocation116_spill] sm:$0xff] }
 0x4c0   : > { %v4290_v10 = vpop.permute.xlu1 %4289  ;;  %v4377_v14 = vsel %vm232_vm0, %v10293_v8, %v10292_v54  ;;  %v3080_v44 = vsel %vm464_vm2, %v3271_v48, %v3255_v55  ;;  %v10307_v8 = vld [vmem:[#allocation125_spill] sm:$0xff] }
 0x4c1   : > { %v4598_v1 = vsel %vm2232_vm12, %v4566_v0, %v4290_v10  ;;  %v3908_v16 = vpop.permute.xlu0 %3907  ;;  %v4409_v0 = vsel %vm2034_vm6, %v4377_v14, %v10294_v19 }
 0x4c2   : > { %4183 = vrot.lane.b32.xlu1 %v9074_v51, %s5439_s15  ;;  %5345 = vmatmul.mubr.msk.f32.gmra.mrb[10].mxu1 %vm2277_vm13, %v4598_v1  ;;  %v4503_v21 = vsel %vm2133_vm9, %v4471_v2, %v3908_v16  ;;  %v10295_v1 = vld [vmem:[#allocation154_spill] sm:$0xff]  ;;  %v2953_v2 = vrot.slane %v9214_v29, 7 }
 0x4c3   : > { %4057 = vrot.lane.b32.xlu0 %v3190_v46, %s5438_s29  ;;  %v4441_v16 = vsel %vm2067_vm7, %v4409_v0, %v10295_v1 }
 0x4c4   : > { %v4036_v43 = vpop.permute.xlu1 %4035 }
 0x4c5   : > { %v3910_v12 = vpop.permute.xlu0 %3909  ;;  %v4535_v33 = vsel %vm2166_vm10, %v4503_v21, %v4036_v43  ;;  %v3287_v43 = vsel %vm464_vm2, %v3255_v55, %v3271_v48  ;;  %v10306_v55 = vld [vmem:[#allocation121_spill] sm:$0xff] }
 0x4c6   : > { %3803 = vrot.lane.b32.xlu1 %v9074_v51, %s5436_s27  ;;  %v4376_v51 = vsel %vm232_vm0, %v10289_v13, %v10288_v61 }
 0x4c7   : > { %3677 = vrot.lane.b32.xlu0 %v3190_v46, %s5435_s26  ;;  %v4408_v20 = vsel %vm2034_vm6, %v4376_v51, %v10290_v11  ;;  %v2937_v51 = vrot.slane %v9212_v6, 7 }
 0x4c8   : > { %v4164_v57 = vpop.permute.xlu1 %4163  ;;  %v4440_v31 = vsel %vm2067_vm7, %v4408_v20, %v10291_v41  ;;  %v3110_v41 = vsel %vm231_vm3, 0.0, %v3080_v44 }
 0x4c9   : > { %v4038_v47 = vpop.permute.xlu0 %4037  ;;  %v4472_v26 = vsel %vm2100_vm8, %v4440_v31, %v3782_v3  ;;  %v4567_v35 = vsel %vm2199_vm11, %v4535_v33, %v4164_v57  ;;  %v2985_v31 = vsel %vm367_vm1, %v2953_v2, %v2937_v51 }
 0x4ca   : > { %4311 = vrot.lane.b32.xlu1 %v3286_v39, %s5440_s16  ;;  %v4504_v53 = vsel %vm2133_vm9, %v4472_v26, %v3910_v12  ;;  %v10296_v12 = vld [vmem:[#allocation60_spill] sm:$0xff] }
 0x4cb   : > { %4185 = vrot.lane.b32.xlu0 %v9076_v28, %s5439_s15  ;;  %v4536_v42 = vsel %vm2166_vm10, %v4504_v53, %v4038_v47  ;;  %v4378_v4 = vsel %vm232_vm0, %v10297_v25, %v10296_v12  ;;  %v10298_v47 = vld [vmem:[#allocation78_spill] sm:$0xff] }
 0x4cc   : > { %v4166_v9 = vpop.permute.xlu1 %4165  ;;  %v10301_v53 = vld [vmem:[#allocation70_spill] sm:$0xff] }
 0x4cd   : > { %v3784_v27 = vpop.permute.xlu0 %3783  ;;  %v4568_v62 = vsel %vm2199_vm11, %v4536_v42, %v4166_v9 }
 0x4ce   : > { %3931 = vrot.lane.b32.xlu1 %v3286_v39, %s5437_s28  ;;  %v4473_v57 = vsel %vm2100_vm8, %v4441_v16, %v3784_v27  ;;  %v4410_v39 = vsel %vm2034_vm6, %v4378_v4, %v10298_v47  ;;  %v9283_v4 = vld [vmem:[#allocation2 + $0x100] sm:$0xff] }
 0x4cf   : > { %3805 = vrot.lane.b32.xlu0 %v9076_v28, %s5436_s27  ;;  %v2984_v28 = vsel %vm367_vm1, %v2952_v58, %v2936_v18 }
 0x4d0   : > { %v3786_v36 = vpop.permute.xlu1 %3785  ;;  %v3013_v22 = vsel %vm228_vm4, 0.0, %v2984_v28  ;;  %v10302_v28 = vld [vmem:[#allocation163_spill] sm:$0xff] }
 0x4d1   : > { %v4292_v49 = vpop.permute.xlu0 %4291 }
 0x4d2   : > { %v4599_v60 = vsel %vm2232_vm12, %v4567_v35, %v4292_v49  ;;  %3933 = vrot.lane.b32.xlu1 %v3108_v30, %s5437_s28  ;;  %v3192_v49 = vsel %vm367_vm1, %v2937_v51, %v2953_v2  ;;  %v10308_v51 = vld [vmem:[#allocation51_spill] sm:$0xff]  ;;  %v10309_v2 = vld [vmem:[#allocation145_spill] sm:$0xff] }
 0x4d3   : > { %4313 = vrot.lane.b32.xlu0 %v3108_v30, %s5440_s16  ;;  %5347 = vmatprep.mubr.msk.f32.mxu1 %vm2277_vm13, %v4599_v60  ;;  %v10300_v30 = vld [vmem:[#allocation144_spill] sm:$0xff] }
 0x4d4   : > { %v4294_v63 = vpop.permute.xlu1 %4293  ;;  %v4379_v60 = vsel %vm232_vm0, %v10301_v53, %v10300_v30  ;;  %v3257_v53 = vrot.slane %v9283_v4, 1 }
 0x4d5   : > { %v4600_v32 = vsel %vm2232_vm12, %v4568_v62, %v4294_v63  ;;  %v3912_v17 = vpop.permute.xlu0 %3911  ;;  %v4411_v42 = vsel %vm2034_vm6, %v4379_v60, %v10302_v28  ;;  %v10303_v63 = vld [vmem:[#allocation167_spill] sm:$0xff]  ;;  %v10312_v28 = vld [vmem:[#allocation53_spill] sm:$0xff] }
 0x4d6   : > { %3679 = vrot.lane.b32.xlu1 %v3013_v22, %s5435_s26  ;;  %5348 = vmatmul.mubr.msk.f32.gmra.mrb[12].mxu1 %vm2277_vm13, %v4600_v32  ;;  %v4505_v56 = vsel %vm2133_vm9, %v4473_v57, %v3912_v17  ;;  %v4443_v32 = vsel %vm2067_vm7, %v4411_v42, %v10303_v63  ;;  %v9285_v57 = vld [vmem:[#allocation2 + $0x108] sm:$0xff]  ;;  %v10313_v42 = vld [vmem:[#allocation117_spill] sm:$0xff] }
 0x4d7   : > { %4059 = vrot.lane.b32.xlu0 %v3013_v22, %s5438_s29  ;;  %v3256_v22 = vrot.slane %v9212_v6, 1  ;;  %v3273_v60 = vrot.slane %v9285_v57, 1  ;;  %v10314_v63 = vld [vmem:[#allocation149_spill] sm:$0xff] }
 0x4d8   : > { %v4040_v38 = vpop.permute.xlu1 %4039 }
 0x4d9   : > { %v3914_v15 = vpop.permute.xlu0 %3913  ;;  %v4537_v40 = vsel %vm2166_vm10, %v4505_v56, %v4040_v38  ;;  %v3272_v38 = vrot.slane %v9214_v29, 1 }
 0x4da   : > { %4187 = vrot.lane.b32.xlu1 %v9139_v7, %s5439_s15 }
 0x4db   : > { %4061 = vrot.lane.b32.xlu0 %v3191_v59, %s5438_s29 }
 0x4dc   : > { %v4168_v3 = vpop.permute.xlu1 %4167 }
 0x4dd   : > { %v4042_v37 = vpop.permute.xlu0 %4041  ;;  %v4569_v23 = vsel %vm2199_vm11, %v4537_v40, %v4168_v3  ;;  %v2954_v40 = vrot.slane %v9285_v57, 7 }
 0x4de   : > { %3807 = vrot.lane.b32.xlu1 %v9139_v7, %s5436_s27  ;;  %v10299_v7 = vld [vmem:[#allocation86_spill] sm:$0xff] }
 0x4df   : > { %3681 = vrot.lane.b32.xlu0 %v3191_v59, %s5435_s26  ;;  %v4442_v34 = vsel %vm2067_vm7, %v4410_v39, %v10299_v7  ;;  %v10305_v59 = vld [vmem:[#allocation118_spill] sm:$0xff]  ;;  %v3081_v7 = vsel %vm464_vm2, %v3272_v38, %v3256_v22 }
 0x4e0   : > { %v4170_v10 = vpop.permute.xlu1 %4169  ;;  %v4474_v24 = vsel %vm2100_vm8, %v4442_v34, %v3786_v36  ;;  %v3015_v36 = vsel %vm228_vm4, 0.0, %v2985_v31  ;;  %v2938_v34 = vrot.slane %v9283_v4, 7 }
 0x4e1   : > { %v3788_v46 = vpop.permute.xlu0 %3787  ;;  %v4506_v61 = vsel %vm2133_vm9, %v4474_v24, %v3914_v15  ;;  %v10304_v15 = vld [vmem:[#allocation57_spill] sm:$0xff] }
 0x4e2   : > { %4315 = vrot.lane.b32.xlu1 %v3287_v43, %s5440_s16  ;;  %v4538_v18 = vsel %vm2166_vm10, %v4506_v61, %v4042_v37  ;;  %v4380_v3 = vsel %vm232_vm0, %v10305_v59, %v10304_v15  ;;  %v4475_v37 = vsel %vm2100_vm8, %v4443_v32, %v3788_v46  ;;  %v3288_v46 = vsel %vm464_vm2, %v3256_v22, %v3272_v38  ;;  %v10315_v22 = vld [vmem:[#allocation153_spill] sm:$0xff] }
 0x4e3   : > { %4189 = vrot.lane.b32.xlu0 %v9141_v50, %s5439_s15  ;;  %v4570_v58 = vsel %vm2199_vm11, %v4538_v18, %v4170_v10  ;;  %v4412_v48 = vsel %vm2034_vm6, %v4380_v3, %v10306_v55  ;;  %v10310_v18 = vld [vmem:[#allocation162_spill] sm:$0xff]  ;;  %v3289_v59 = vsel %vm464_vm2, %v3257_v53, %v3273_v60 }
 0x4e4   : > { %v3790_v9 = vpop.permute.xlu1 %3789  ;;  %v4444_v14 = vsel %vm2067_vm7, %v4412_v48, %v10307_v8  ;;  %v3146_v55 = vld [vmem:[#allocation2 + $0x118] sm:$0xff] }
 0x4e5   : > { %v4296_v27 = vpop.permute.xlu0 %4295  ;;  %v4476_v10 = vsel %vm2100_vm8, %v4444_v14, %v3790_v9 }
 0x4e6   : > { %v4601_v13 = vsel %vm2232_vm12, %v4569_v23, %v4296_v27  ;;  %3935 = vrot.lane.b32.xlu1 %v3287_v43, %s5437_s28  ;;  %v3112_v23 = vsel %vm231_vm3, 0.0, %v3081_v7  ;;  %v2986_v27 = vsel %vm367_vm1, %v2954_v40, %v2938_v34  ;;  %v10316_v7 = vld [vmem:[#allocation61_spill] sm:$0xff] }
 0x4e7   : > { %3809 = vrot.lane.b32.xlu0 %v9141_v50, %s5436_s27  ;;  %5350 = vmatprep.mubr.msk.f32.mxu1 %vm2277_vm13, %v4601_v13  ;;  %v3017_v13 = vsel %vm228_vm4, 0.0, %v2986_v27 }
 0x4e8   : > { %v4298_v11 = vpop.permute.xlu1 %4297 }
 0x4e9   : > { %v4602_v20 = vsel %vm2232_vm12, %v4570_v58, %v4298_v11  ;;  %v3916_v21 = vpop.permute.xlu0 %3915  ;;  %v10311_v11 = vld [vmem:[#allocation166_spill] sm:$0xff] }
 0x4ea   : > { %3937 = vrot.lane.b32.xlu1 %v3110_v41, %s5437_s28  ;;  %5351 = vmatmul.mubr.msk.f32.gmra.mrb[14].mxu1 %vm2277_vm13, %v4602_v20  ;;  %v4507_v54 = vsel %vm2133_vm9, %v4475_v37, %v3916_v21  ;;  %v3145_v37 = vld [vmem:[#allocation2 + $0x110] sm:$0xff] }
 0x4eb   : > { %4317 = vrot.lane.b32.xlu0 %v3110_v41, %s5440_s16 }
 0x4ec   : > { %v4044_v50 = vpop.permute.xlu1 %4043 }
 0x4ed   : > { %v3918_v33 = vpop.permute.xlu0 %3917  ;;  %v4539_v19 = vsel %vm2166_vm10, %v4507_v54, %v4044_v50 }
 0x4ee   : > { %3683 = vrot.lane.b32.xlu1 %v3015_v36, %s5435_s26  ;;  %v4508_v43 = vsel %vm2133_vm9, %v4476_v10, %v3918_v33  ;;  %v3193_v33 = vsel %vm367_vm1, %v2938_v34, %v2954_v40  ;;  %v3162_v10 = vrot.slane %v3145_v37, 7  ;;  %v10317_v34 = vld [vmem:[#allocation120_spill] sm:$0xff] }
 0x4ef   : > { %4063 = vrot.lane.b32.xlu0 %v3015_v36, %s5438_s29  ;;  %v4383_v40 = vsel %vm232_vm0, %v10317_v34, %v10316_v7 }
 0x4f0   : > { %v4172_v26 = vpop.permute.xlu1 %4171 }
 0x4f1   : > { %v4046_v35 = vpop.permute.xlu0 %4045  ;;  %v4571_v1 = vsel %vm2199_vm11, %v4539_v19, %v4172_v26 }
 0x4f2   : > { %4191 = vrot.lane.b32.xlu1 %v9212_v6, %s5439_s15  ;;  %v4540_v25 = vsel %vm2166_vm10, %v4508_v43, %v4046_v35 }
 0x4f3   : > { %4065 = vrot.lane.b32.xlu0 %v3192_v49, %s5438_s29 }
 0x4f4   : > { %v4174_v62 = vpop.permute.xlu1 %4173 }
 0x4f5   : > { %v3792_v17 = vpop.permute.xlu0 %3791  ;;  %v4572_v47 = vsel %vm2199_vm11, %v4540_v25, %v4174_v62  ;;  %v4382_v62 = vsel %vm232_vm0, %v10313_v42, %v10312_v28 }
 0x4f6   : > { %3811 = vrot.lane.b32.xlu1 %v9212_v6, %s5436_s27  ;;  %v4414_v32 = vsel %vm2034_vm6, %v4382_v62, %v10314_v63 }
 0x4f7   : > { %3685 = vrot.lane.b32.xlu0 %v3192_v49, %s5435_s26  ;;  %v4446_v38 = vsel %vm2067_vm7, %v4414_v32, %v10315_v22 }
 0x4f8   : > { %v3794_v0 = vpop.permute.xlu1 %3793 }
 0x4f9   : > { %v4300_v16 = vpop.permute.xlu0 %4299  ;;  %v4478_v3 = vsel %vm2100_vm8, %v4446_v38, %v3794_v0  ;;  %v3082_v0 = vsel %vm464_vm2, %v3273_v60, %v3257_v53 }
 0x4fa   : > { %v4603_v12 = vsel %vm2232_vm12, %v4571_v1, %v4300_v16  ;;  %4319 = vrot.lane.b32.xlu1 %v3288_v46, %s5440_s16  ;;  %v3178_v1 = vrot.slane %v3146_v55, 7 }
 0x4fb   : > { %4193 = vrot.lane.b32.xlu0 %v9214_v29, %s5439_s15  ;;  %5353 = vmatprep.mubr.msk.f32.mxu1 %vm2277_vm13, %v4603_v12  ;;  %v3114_v12 = vsel %vm231_vm3, 0.0, %v3082_v0  ;;  %v10327_v0 = vld [vmem:[#allocation124_spill] sm:$0xff] }
 0x4fc   : > { %v4302_v39 = vpop.permute.xlu1 %4301  ;;  %v3210_v25 = vsel %vm367_vm1, %v3178_v1, %v3162_v10 }
 0x4fd   : > { %v4604_v56 = vsel %vm2232_vm12, %v4572_v47, %v4302_v39  ;;  %v3920_v6 = vpop.permute.xlu0 %3919  ;;  %v3258_v39 = vrot.slane %v3145_v37, 1 }
 0x4fe   : > { %3939 = vrot.lane.b32.xlu1 %v3288_v46, %s5437_s28  ;;  %5354 = vmatmul.mubr.msk.f32.gmra.mrb[16].mxu1 %vm2277_vm13, %v4604_v56  ;;  %v3274_v56 = vrot.slane %v3146_v55, 1 }
 0x4ff   : > { %3813 = vrot.lane.b32.xlu0 %v9214_v29, %s5436_s27  ;;  %v4381_v29 = vsel %vm232_vm0, %v10309_v2, %v10308_v51 }
 0x500   : > { %v4048_v9 = vpop.permute.xlu1 %4047  ;;  %v4413_v58 = vsel %vm2034_vm6, %v4381_v29, %v10310_v18 }
 0x501   : > { %v3922_v24 = vpop.permute.xlu0 %3921  ;;  %v4445_v20 = vsel %vm2067_vm7, %v4413_v58, %v10311_v11 }
 0x502   : > { %3941 = vrot.lane.b32.xlu1 %v3112_v23, %s5437_s28  ;;  %v4477_v41 = vsel %vm2100_vm8, %v4445_v20, %v3792_v17  ;;  %v4510_v48 = vsel %vm2133_vm9, %v4478_v3, %v3922_v24  ;;  %v3290_v20 = vsel %vm464_vm2, %v3258_v39, %v3274_v56 }
 0x503   : > { %4321 = vrot.lane.b32.xlu0 %v3112_v23, %s5440_s16  ;;  %v4509_v50 = vsel %vm2133_vm9, %v4477_v41, %v3920_v6  ;;  %v10319_v23 = vld [vmem:[#allocation185_spill] sm:$0xff] }
 0x504   : > { %v4176_v44 = vpop.permute.xlu1 %4175  ;;  %v4541_v36 = vsel %vm2166_vm10, %v4509_v50, %v4048_v9  ;;  %v10318_v9 = vld [vmem:[#allocation75_spill] sm:$0xff]  ;;  %v10320_v50 = vld [vmem:[#allocation72_spill] sm:$0xff] }
 0x505   : > { %v4050_v61 = vpop.permute.xlu0 %4049  ;;  %v4573_v26 = vsel %vm2199_vm11, %v4541_v36, %v4176_v44  ;;  %v4415_v24 = vsel %vm2034_vm6, %v4383_v40, %v10318_v9 }
 0x506   : > { %3687 = vrot.lane.b32.xlu1 %v3017_v13, %s5435_s26  ;;  %v4542_v54 = vsel %vm2166_vm10, %v4510_v48, %v4050_v61  ;;  %v4447_v27 = vsel %vm2067_vm7, %v4415_v24, %v10319_v23  ;;  %v3306_v61 = vsel %vm464_vm2, %v3274_v56, %v3258_v39  ;;  %v10329_v24 = vld [vmem:[#allocation84_spill] sm:$0xff] }
 0x507   : > { %4067 = vrot.lane.b32.xlu0 %v3017_v13, %s5438_s29  ;;  %v3338_v18 = vsel %vm231_vm3, 0.0, %v3306_v61 }
 0x508   : > { %v3796_v21 = vpop.permute.xlu1 %3795 }
 0x509   : > { %v9315_v31 = vpop.permute.xlu0 %3669  ;;  %v4479_v13 = vsel %vm2100_vm8, %v4447_v27, %v3796_v21 }
 0x50a   : > { %4195 = vrot.lane.b32.xlu1 %v9283_v4, %s5439_s15 }
 0x50b   : > { %4069 = vrot.lane.b32.xlu0 %v3193_v33, %s5438_s29 }
 0x50c   : > { %v4304_v35 = vpop.permute.xlu1 %4303 }
 0x50d   : > { %v4605_v49 = vsel %vm2232_vm12, %v4573_v26, %v4304_v35  ;;  %v4178_v30 = vpop.permute.xlu0 %4177 }
 0x50e   : > { %3815 = vrot.lane.b32.xlu1 %v9283_v4, %s5436_s27  ;;  %5356 = vmatprep.mubr.msk.f32.mxu1 %vm2277_vm13, %v4605_v49  ;;  %v4574_v14 = vsel %vm2199_vm11, %v4542_v54, %v4178_v30  ;;  %v3194_v4 = vsel %vm367_vm1, %v3162_v10, %v3178_v1  ;;  %v10324_v54 = vld [vmem:[#allocation3_spill] sm:$0xff]  ;;  %v10326_v10 = vld [vmem:[#allocation148_spill] sm:$0xff] }
 0x50f   : > { %3689 = vrot.lane.b32.xlu0 %v3193_v33, %s5435_s26  ;;  %v10321_v33 = vld [vmem:[#allocation67_spill] sm:$0xff] }
 0x510   : > { %v3924_v17 = vpop.permute.xlu1 %3923  ;;  %v4384_v36 = vsel %vm232_vm0, %v10321_v33, %v10320_v50  ;;  %v10330_v50 = vld [vmem:[#allocation7_spill] sm:$0xff] }
 0x511   : > { %v3798_v15 = vpop.permute.xlu0 %3797  ;;  %v4511_v2 = vsel %vm2133_vm9, %v4479_v13, %v3924_v17  ;;  %v4416_v26 = vsel %vm2034_vm6, %v4384_v36, %v10322_v45  ;;  %v10331_v45 = vld [vmem:[#allocation4_spill] sm:$0xff] }
 0x512   : > { %4323 = vrot.lane.b32.xlu1 %v3289_v59, %s5440_s16  ;;  %v4448_v49 = vsel %vm2067_vm7, %v4416_v26, %v9315_v31  ;;  %v9408_v31 = vld [vmem:[%s9681_s4] ss:$0 sm:$0xff] }
 0x513   : > { %4197 = vrot.lane.b32.xlu0 %v9285_v57, %s5439_s15  ;;  %v4480_v53 = vsel %vm2100_vm8, %v4448_v49, %v3798_v15 }
 0x514   : > { %v3926_v8 = vpop.permute.xlu1 %3925 }
 0x515   : > { %v4306_v19 = vpop.permute.xlu0 %4305  ;;  %v4512_v60 = vsel %vm2133_vm9, %v4480_v53, %v3926_v8 }
 0x516   : > { %v4606_v16 = vsel %vm2232_vm12, %v4574_v14, %v4306_v19  ;;  %3943 = vrot.lane.b32.xlu1 %v3289_v59, %s5437_s28  ;;  %v10325_v19 = vld [vmem:[#allocation59_spill] sm:$0xff] }
 0x517   : > { %3817 = vrot.lane.b32.xlu0 %v9285_v57, %s5436_s27  ;;  %5357 = vmatmul.mubr.msk.f32.gmra.mrb[18].mxu1 %vm2277_vm13, %v4606_v16  ;;  %v3241_v57 = vsel %vm228_vm4, 0.0, %v3210_v25  ;;  %v4385_v1 = vsel %vm232_vm0, %v10326_v10, %v10325_v19  ;;  %v10335_v19 = vld [vmem:[#allocation55_spill] sm:$0xff]  ;;  %v10336_v10 = vld [vmem:[#allocation50_spill] sm:$0xff] }
 0x518   : > { %v9355_v46 = vpop.permute.xlu1 %3671 }
 0x519   : > { %v4052_v43 = vpop.permute.xlu0 %4051 }
 0x51a   : > { %3945 = vrot.lane.b32.xlu1 %v3114_v12, %s5437_s28  ;;  %v4543_v29 = vsel %vm2166_vm10, %v4511_v2, %v4052_v43  ;;  %v4417_v43 = vsel %vm2034_vm6, %v4385_v1, %v10327_v0  ;;  %v10337_v1 = vld [vmem:[#allocation73_spill] sm:$0xff] }
 0x51b   : > { %4325 = vrot.lane.b32.xlu0 %v3114_v12, %s5440_s16  ;;  %v4449_v25 = vsel %vm2067_vm7, %v4417_v43, %v9355_v46  ;;  %v10328_v46 = vld [vmem:[#allocation146_spill] sm:$0xff] }
 0x51c   : > { %v4180_v47 = vpop.permute.xlu1 %4179  ;;  %v4386_v9 = vsel %vm232_vm0, %v7972_v52, %v10328_v46 }
 0x51d   : > { %v4054_v6 = vpop.permute.xlu0 %4053  ;;  %v4575_v58 = vsel %vm2199_vm11, %v4543_v29, %v4180_v47  ;;  %v4418_v23 = vsel %vm2034_vm6, %v4386_v9, %v10329_v24  ;;  %v10339_v9 = vld [vmem:[#allocation6_spill] sm:$0xff] }
 0x51e   : > { %4073 = vrot.lane.b32.xlu1 %v3194_v4, %s5438_s29  ;;  %v4544_v28 = vsel %vm2166_vm10, %v4512_v60, %v4054_v6  ;;  %v10332_v60 = vld [vmem:[#allocation19_spill] sm:$0xff] }
 0x51f   : > { %4071 = vrot.lane.b32.xlu0 %v3241_v57, %s5438_s29 }
 0x520   : > { %v3800_v44 = vpop.permute.xlu1 %3799 }
 0x521   : > { %v3674_v51 = vpop.permute.xlu0 %3673  ;;  %v4481_v47 = vsel %vm2100_vm8, %v4449_v25, %v3800_v44 }
 0x522   : > { %4201 = vrot.lane.b32.xlu1 %v3146_v55, %s5439_s15  ;;  %v4450_v44 = vsel %vm2067_vm7, %v4418_v23, %v3674_v51 }
 0x523   : > { %4199 = vrot.lane.b32.xlu0 %v3145_v37, %s5439_s15  ;;  %v10323_v37 = vld [vmem:[#allocation5_spill] sm:$0xff] }
 0x524   : > { %v4308_v11 = vpop.permute.xlu1 %4307 }
 0x525   : > { %v4607_v21 = vsel %vm2232_vm12, %v4575_v58, %v4308_v11  ;;  %v4182_v41 = vpop.permute.xlu0 %4181 }
 0x526   : > { %4329 = vrot.lane.b32.xlu1 %v3338_v18, %s5440_s16  ;;  %5359 = vmatprep.mubr.msk.f32.mxu1 %vm2277_vm13, %v4607_v21  ;;  %v4576_v62 = vsel %vm2199_vm11, %v4544_v28, %v4182_v41  ;;  %v2787_v28 = vsel %vm228_vm4, 0.0, %v10332_v60 }
 0x527   : > { %4327 = vrot.lane.b32.xlu0 %v3290_v20, %s5440_s16 }
 0x528   : > { %v3928_v35 = vpop.permute.xlu1 %3927 }
 0x529   : > { %v3802_v30 = vpop.permute.xlu0 %3801  ;;  %v4513_v39 = vsel %vm2133_vm9, %v4481_v47, %v3928_v35 }
 0x52a   : > { %v4482_v13 = vsel %vm2100_vm8, %v4450_v44, %v3802_v30 }
 0x52c   : > { %v3930_v42 = vpop.permute.xlu1 %3929 }
 0x52d   : > { %v4310_v63 = vpop.permute.xlu0 %4309  ;;  %v4514_v2 = vsel %vm2133_vm9, %v4482_v13, %v3930_v42 }
 0x52e   : > { %v4608_v32 = vsel %vm2232_vm12, %v4576_v62, %v4310_v63  ;;  %v10333_v62 = vld [vmem:[#allocation76_spill] sm:$0xff] }
 0x52f   : > { %5360 = vmatmul.mubr.msk.f32.gmra.mrb[20].mxu1 %vm2277_vm13, %v4608_v32  ;;  %v4387_v63 = vsel %vm232_vm0, %v2787_v28, %v10333_v62  ;;  %v10334_v32 = vld [vmem:[#allocation82_spill] sm:$0xff] }
 0x530   : > { %v3676_v17 = vpop.permute.xlu1 %3675 }
 0x531   : > { %v5331_v22 = vpop.f32.mrb[0].mxu1  ;;  %v4056_v38 = vpop.permute.xlu0 %4055 }
 0x532   : > { %v4802_v15 = vadd.f32 %v5331_v22, %v9408_v31  ;;  %v4796_v59 = vpop.f32.mrb[1].mxu1  ;;  %v4545_v56 = vsel %vm2166_vm10, %v4513_v39, %v4056_v38  ;;  %v4419_v22 = vsel %vm2034_vm6, %v4387_v63, %v10334_v32  ;;  %v10344_v63 = vld [vmem:[#allocation47_spill] sm:$0xff] }
 0x533   : > { %v4797_v3 = vadd.f32 %v9408_v31, %v4796_v59  ;;  %v4451_v38 = vsel %vm2067_vm7, %v4419_v22, %v3676_v17  ;;  %v4388_v17 = vsel %vm232_vm0, %v10336_v10, %v10335_v19 }
 0x534   : > { %v4956_v55 = vadd.f32 %v4802_v15, %v10323_v37  ;;  %v4184_v48 = vpop.permute.xlu1 %4183 }
 0x535   : > { %v4955_v8 = vadd.f32 %v4797_v3, %v10324_v54  ;;  %v4058_v14 = vpop.permute.xlu0 %4057  ;;  %v4577_v6 = vsel %vm2199_vm11, %v4545_v56, %v4184_v48 }
 0x536   : > { %v4988_v16 = vmax.f32 %v4956_v55, 0.0  ;;  %v4546_v29 = vsel %vm2166_vm10, %v4514_v2, %v4058_v14 }
 0x537   : > { %v4987_v12 = vmax.f32 %v4955_v8, 0.0 }
 0x538   : > { %5020 = vst.msk [vmem:[%s9418_s11 + $0x8] sm:$0xff] %vm232_vm0, %v4988_v16  ;;  %v3804_v4 = vpop.permute.xlu1 %3803  ;;  %v4420_v16 = vsel %vm2034_vm6, %v4388_v17, %v10337_v1 }
 0x539   : > { %5019 = vst.msk [vmem:[%s9418_s11] sm:$0xff] %vm232_vm0, %v4987_v12  ;;  %v3678_v57 = vpop.permute.xlu0 %3677  ;;  %v4483_v59 = vsel %vm2100_vm8, %v4451_v38, %v3804_v4  ;;  %v10345_v38 = vld [vmem:[#allocation152_spill] sm:$0xff] }
 0x53a   : > { %v4452_v43 = vsel %vm2067_vm7, %v4420_v16, %v3678_v57 }
 0x53c   : > { %v4312_v7 = vpop.permute.xlu1 %4311 }
 0x53d   : > { %v4609_v34 = vsel %vm2232_vm12, %v4577_v6, %v4312_v7  ;;  %v4186_v40 = vpop.permute.xlu0 %4185 }
 0x53e   : > { %5362 = vmatprep.mubr.msk.f32.mxu1 %vm2277_vm13, %v4609_v34  ;;  %v4578_v58 = vsel %vm2199_vm11, %v4546_v29, %v4186_v40  ;;  %v10338_v34 = vld [vmem:[#allocation9_spill] sm:$0xff] }
 0x540   : > { %v3932_v27 = vpop.permute.xlu1 %3931 }
 0x541   : > { %v3806_v61 = vpop.permute.xlu0 %3805  ;;  %v4515_v37 = vsel %vm2133_vm9, %v4483_v59, %v3932_v27  ;;  %v10346_v59 = vld [vmem:[#allocation11_spill] sm:$0xff] }
 0x542   : > { %v4484_v4 = vsel %vm2100_vm8, %v4452_v43, %v3806_v61 }
 0x544   : > { %v3934_v18 = vpop.permute.xlu1 %3933 }
 0x545   : > { %v5334_v11 = vpop.f32.mrb[2].mxu1  ;;  %v4314_v52 = vpop.permute.xlu0 %4313  ;;  %v4516_v56 = vsel %vm2133_vm9, %v4484_v4, %v3934_v18  ;;  %v10340_v18 = vld [vmem:[#allocation52_spill] sm:$0xff] }
 0x546   : > { %v4812_v20 = vadd.f32 %v5334_v11, %v9408_v31  ;;  %v4610_v21 = vsel %vm2232_vm12, %v4578_v58, %v4314_v52  ;;  %v4806_v41 = vpop.f32.mrb[3].mxu1  ;;  %v2789_v58 = vsel %vm228_vm4, 0.0, %v10340_v18  ;;  %v10341_v52 = vld [vmem:[#allocation74_spill] sm:$0xff] }
 0x547   : > { %v4807_v51 = vadd.f32 %v9408_v31, %v4806_v41  ;;  %5363 = vmatmul.mubr.msk.f32.gmra.mrb[22].mxu1 %vm2277_vm13, %v4610_v21  ;;  %v10342_v21 = vld [vmem:[#allocation123_spill] sm:$0xff] }
 0x548   : > { %v4958_v33 = vadd.f32 %v4812_v20, %v10330_v50  ;;  %v3680_v36 = vpop.permute.xlu1 %3679  ;;  %v4389_v20 = vsel %vm232_vm0, %v2789_v58, %v10341_v52 }
 0x549   : > { %v4957_v26 = vadd.f32 %v4807_v51, %v10331_v45  ;;  %v4060_v35 = vpop.permute.xlu0 %4059  ;;  %v4421_v41 = vsel %vm2034_vm6, %v4389_v20, %v10342_v21  ;;  %v10352_v20 = vld [vmem:[#allocation10_spill] sm:$0xff] }
 0x54a   : > { %v4990_v49 = vmax.f32 %v4958_v33, 0.0  ;;  %v4547_v55 = vsel %vm2166_vm10, %v4515_v37, %v4060_v35  ;;  %v4453_v51 = vsel %vm2067_vm7, %v4421_v41, %v3680_v36  ;;  %v10343_v36 = vld [vmem:[#allocation65_spill] sm:$0xff] }
 0x54b   : > { %v4989_v30 = vmax.f32 %v4957_v26, 0.0  ;;  %v4390_v32 = vsel %vm232_vm0, %v10344_v63, %v10343_v36 }
 0x54c   : > { %5022 = vst.msk [vmem:[%s9418_s11 + $0x18] sm:$0xff] %vm232_vm0, %v4990_v49  ;;  %v4188_v53 = vpop.permute.xlu1 %4187 }
 0x54d   : > { %5021 = vst.msk [vmem:[%s9418_s11 + $0x10] sm:$0xff] %vm232_vm0, %v4989_v30  ;;  %v4062_v42 = vpop.permute.xlu0 %4061  ;;  %v4579_v48 = vsel %vm2199_vm11, %v4547_v55, %v4188_v53 }
 0x54e   : > { %v4548_v7 = vsel %vm2166_vm10, %v4516_v56, %v4062_v42 }
 0x550   : > { %v3808_v15 = vpop.permute.xlu1 %3807 }
 0x551   : > { %v3682_v3 = vpop.permute.xlu0 %3681  ;;  %v4485_v33 = vsel %vm2100_vm8, %v4453_v51, %v3808_v15  ;;  %v4422_v15 = vsel %vm2034_vm6, %v4390_v32, %v10345_v38 }
 0x554   : > { %v4316_v54 = vpop.permute.xlu1 %4315 }
 0x555   : > { %v4611_v8 = vsel %vm2232_vm12, %v4579_v48, %v4316_v54  ;;  %v4190_v14 = vpop.permute.xlu0 %4189  ;;  %v4454_v48 = vsel %vm2067_vm7, %v4422_v15, %v3682_v3  ;;  %v10347_v54 = vld [vmem:[#allocation8_spill] sm:$0xff] }
 0x556   : > { %5365 = vmatprep.mubr.msk.f32.mxu1 %vm2277_vm13, %v4611_v8  ;;  %v4580_v57 = vsel %vm2199_vm11, %v4548_v7, %v4190_v14  ;;  %v10349_v7 = vld [vmem:[#allocation161_spill] sm:$0xff] }
 0x558   : > { %v3936_v0 = vpop.permute.xlu1 %3935 }
 0x559   : > { %v3810_v12 = vpop.permute.xlu0 %3809  ;;  %v5337_v25 = vpop.f32.mrb[4].mxu1  ;;  %v4517_v26 = vsel %vm2133_vm9, %v4485_v33, %v3936_v0  ;;  %v10353_v33 = vld [vmem:[#allocation119_spill] sm:$0xff] }
 0x55a   : > { %v4822_v47 = vadd.f32 %v5337_v25, %v9408_v31  ;;  %v4816_v39 = vpop.f32.mrb[5].mxu1  ;;  %v4486_v19 = vsel %vm2100_vm8, %v4454_v48, %v3810_v12  ;;  %v10357_v48 = vld [vmem:[#allocation37_spill] sm:$0xff] }
 0x55b   : > { %v4817_v6 = vadd.f32 %v9408_v31, %v4816_v39  ;;  %v10348_v39 = vld [vmem:[#allocation56_spill] sm:$0xff] }
 0x55c   : > { %v4960_v40 = vadd.f32 %v4822_v47, %v10338_v34  ;;  %v3938_v46 = vpop.permute.xlu1 %3937  ;;  %v2791_v56 = vsel %vm228_vm4, 0.0, %v10348_v39 }
 0x55d   : > { %v4959_v24 = vadd.f32 %v4817_v6, %v10339_v9  ;;  %v4318_v23 = vpop.permute.xlu0 %4317  ;;  %v4518_v17 = vsel %vm2133_vm9, %v4486_v19, %v3938_v46  ;;  %v4391_v34 = vsel %vm232_vm0, %v2791_v56, %v10349_v7 }
 0x55e   : > { %v4992_v27 = vmax.f32 %v4960_v40, 0.0  ;;  %v4612_v44 = vsel %vm2232_vm12, %v4580_v57, %v4318_v23  ;;  %v10350_v40 = vld [vmem:[#allocation151_spill] sm:$0xff] }
 0x55f   : > { %v4991_v61 = vmax.f32 %v4959_v24, 0.0  ;;  %5366 = vmatmul.mubr.msk.f32.gmra.mrb[24].mxu1 %vm2277_vm13, %v4612_v44  ;;  %v4423_v46 = vsel %vm2034_vm6, %v4391_v34, %v10350_v40  ;;  %v10362_v40 = vld [vmem:[#allocation15_spill] sm:$0xff] }
 0x560   : > { %5024 = vst.msk [vmem:[%s9418_s11 + $0x28] sm:$0xff] %vm232_vm0, %v4992_v27  ;;  %v3684_v13 = vpop.permute.xlu1 %3683 }
 0x561   : > { %5023 = vst.msk [vmem:[%s9418_s11 + $0x20] sm:$0xff] %vm232_vm0, %v4991_v61  ;;  %v4064_v2 = vpop.permute.xlu0 %4063  ;;  %v4455_v57 = vsel %vm2067_vm7, %v4423_v46, %v3684_v13 }
 0x562   : > { %v4549_v35 = vsel %vm2166_vm10, %v4517_v26, %v4064_v2  ;;  %v10354_v26 = vld [vmem:[#allocation58_spill] sm:$0xff] }
 0x564   : > { %v4192_v29 = vpop.permute.xlu1 %4191 }
 0x565   : > { %v4066_v11 = vpop.permute.xlu0 %4065  ;;  %v4581_v49 = vsel %vm2199_vm11, %v4549_v35, %v4192_v29  ;;  %v4392_v35 = vsel %vm232_vm0, %v10354_v26, %v10353_v33 }
 0x566   : > { %v4550_v16 = vsel %vm2166_vm10, %v4518_v17, %v4066_v11  ;;  %v10351_v11 = vld [vmem:[#allocation13_spill] sm:$0xff] }
 0x568   : > { %v3812_v50 = vpop.permute.xlu1 %3811 }
 0x569   : > { %v3686_v45 = vpop.permute.xlu0 %3685  ;;  %v4487_v24 = vsel %vm2100_vm8, %v4455_v57, %v3812_v50 }
 0x56c   : > { %v4320_v30 = vpop.permute.xlu1 %4319 }
 0x56d   : > { %v4613_v53 = vsel %vm2232_vm12, %v4581_v49, %v4320_v30  ;;  %v4194_v60 = vpop.permute.xlu0 %4193  ;;  %v5340_v28 = vpop.f32.mrb[6].mxu1  ;;  %v10355_v30 = vld [vmem:[#allocation165_spill] sm:$0xff] }
 0x56e   : > { %v4832_v42 = vadd.f32 %v5340_v28, %v9408_v31  ;;  %v4826_v62 = vpop.f32.mrb[7].mxu1  ;;  %5368 = vmatprep.mubr.msk.f32.mxu1 %vm2277_vm13, %v4613_v53  ;;  %v4582_v43 = vsel %vm2199_vm11, %v4550_v16, %v4194_v60  ;;  %v4424_v53 = vsel %vm2034_vm6, %v4392_v35, %v10355_v30  ;;  %v10361_v16 = vld [vmem:[#allocation164_spill] sm:$0xff] }
 0x56f   : > { %v4827_v22 = vadd.f32 %v9408_v31, %v4826_v62  ;;  %v4456_v28 = vsel %vm2067_vm7, %v4424_v53, %v3686_v45  ;;  %v10356_v45 = vld [vmem:[#allocation54_spill] sm:$0xff] }
 0x570   : > { %v4962_v37 = vadd.f32 %v4832_v42, %v10346_v59  ;;  %v3940_v55 = vpop.permute.xlu1 %3939 }
 0x571   : > { %v4961_v8 = vadd.f32 %v4827_v22, %v10347_v54  ;;  %v3814_v14 = vpop.permute.xlu0 %3813  ;;  %v4519_v44 = vsel %vm2133_vm9, %v4487_v24, %v3940_v55  ;;  %v2793_v55 = vsel %vm228_vm4, 0.0, %v10356_v45  ;;  %v10369_v45 = vld [vmem:[#allocation20_spill] sm:$0xff] }
 0x572   : > { %v4994_v10 = vmax.f32 %v4962_v37, 0.0  ;;  %v4488_v62 = vsel %vm2100_vm8, %v4456_v28, %v3814_v14  ;;  %v4393_v54 = vsel %vm232_vm0, %v2793_v55, %v10357_v48  ;;  %v10359_v14 = vld [vmem:[#allocation64_spill] sm:$0xff] }
 0x573   : > { %v4993_v1 = vmax.f32 %v4961_v8, 0.0  ;;  %v10358_v8 = vld [vmem:[#allocation147_spill] sm:$0xff] }
 0x574   : > { %5026 = vst.msk [vmem:[%s9418_s11 + $0x38] sm:$0xff] %vm232_vm0, %v4994_v10  ;;  %v3942_v0 = vpop.permute.xlu1 %3941  ;;  %v4394_v19 = vsel %vm232_vm0, %v10359_v14, %v10358_v8  ;;  %v10360_v10 = vld [vmem:[#allocation184_spill] sm:$0xff] }
 0x575   : > { %5025 = vst.msk [vmem:[%s9418_s11 + $0x30] sm:$0xff] %vm232_vm0, %v4993_v1  ;;  %v4322_v25 = vpop.permute.xlu0 %4321  ;;  %v4520_v36 = vsel %vm2133_vm9, %v4488_v62, %v3942_v0  ;;  %v4425_v17 = vsel %vm2034_vm6, %v4393_v54, %v10360_v10  ;;  %v4426_v0 = vsel %vm2034_vm6, %v4394_v19, %v10361_v16  ;;  %v10371_v16 = vld [vmem:[#allocation22_spill] sm:$0xff] }
 0x576   : > { %v4614_v3 = vsel %vm2232_vm12, %v4582_v43, %v4322_v25 }
 0x577   : > { %5369 = vmatmul.mubr.msk.f32.gmra.mrb[26].mxu1 %vm2277_vm13, %v4614_v3 }
 0x578   : > { %v3688_v4 = vpop.permute.xlu1 %3687 }
 0x579   : > { %v4068_v12 = vpop.permute.xlu0 %4067  ;;  %v4457_v43 = vsel %vm2067_vm7, %v4425_v17, %v3688_v4  ;;  %v10370_v17 = vld [vmem:[#allocation25_spill] sm:$0xff] }
 0x57a   : > { %v4551_v29 = vsel %vm2166_vm10, %v4519_v44, %v4068_v12 }
 0x57c   : > { %v4196_v47 = vpop.permute.xlu1 %4195 }
 0x57d   : > { %v4070_v6 = vpop.permute.xlu0 %4069  ;;  %v4583_v58 = vsel %vm2199_vm11, %v4551_v29, %v4196_v47 }
 0x57e   : > { %v4552_v63 = vsel %vm2166_vm10, %v4520_v36, %v4070_v6 }
 0x580   : > { %v3816_v9 = vpop.permute.xlu1 %3815 }
 0x581   : > { %v3690_v23 = vpop.permute.xlu0 %3689  ;;  %v5343_v27 = vpop.f32.mrb[8].mxu1  ;;  %v4489_v5 = vsel %vm2100_vm8, %v4457_v43, %v3816_v9 }
 0x582   : > { %v4842_v61 = vadd.f32 %v5343_v27, %v9408_v31  ;;  %v4836_v2 = vpop.f32.mrb[9].mxu1  ;;  %v4458_v12 = vsel %vm2067_vm7, %v4426_v0, %v3690_v23  ;;  %v10363_v23 = vld [vmem:[#allocation12_spill] sm:$0xff] }
 0x583   : > { %v4837_v18 = vadd.f32 %v9408_v31, %v4836_v2 }
 0x584   : > { %v4964_v13 = vadd.f32 %v4842_v61, %v10351_v11  ;;  %v4324_v52 = vpop.permute.xlu1 %4323 }
 0x585   : > { %v4963_v21 = vadd.f32 %v4837_v18, %v10352_v20  ;;  %v4615_v41 = vsel %vm2232_vm12, %v4583_v58, %v4324_v52  ;;  %v4198_v51 = vpop.permute.xlu0 %4197 }
 0x586   : > { %v4996_v50 = vmax.f32 %v4964_v13, 0.0  ;;  %5371 = vmatprep.mubr.msk.f32.mxu1 %vm2277_vm13, %v4615_v41  ;;  %v4584_v22 = vsel %vm2199_vm11, %v4552_v63, %v4198_v51  ;;  %v10365_v51 = vld [vmem:[#allocation14_spill] sm:$0xff] }
 0x587   : > { %v4995_v49 = vmax.f32 %v4963_v21, 0.0  ;;  %v10364_v21 = vld [vmem:[#allocation17_spill] sm:$0xff] }
 0x588   : > { %5028 = vst.msk [vmem:[%s9418_s11 + $0x48] sm:$0xff] %vm232_vm0, %v4996_v50  ;;  %v3944_v60 = vpop.permute.xlu1 %3943 }
 0x589   : > { %5027 = vst.msk [vmem:[%s9418_s11 + $0x40] sm:$0xff] %vm232_vm0, %v4995_v49  ;;  %v3818_v42 = vpop.permute.xlu0 %3817  ;;  %v4521_v56 = vsel %vm2133_vm9, %v4489_v5, %v3944_v60  ;;  %v10366_v60 = vld [vmem:[#allocation21_spill] sm:$0xff] }
 0x58a   : > { %v4490_v6 = vsel %vm2100_vm8, %v4458_v12, %v3818_v42  ;;  %v10367_v42 = vld [vmem:[#allocation16_spill] sm:$0xff] }
 0x58c   : > { %v3946_v32 = vpop.permute.xlu1 %3945 }
 0x58d   : > { %v4326_v38 = vpop.permute.xlu0 %4325  ;;  %v4522_v34 = vsel %vm2133_vm9, %v4490_v6, %v3946_v32  ;;  %v10373_v6 = vld [vmem:[#allocation24_spill] sm:$0xff] }
 0x58e   : > { %v4616_v15 = vsel %vm2232_vm12, %v4584_v22, %v4326_v38 }
 0x58f   : > { %5372 = vmatmul.mubr.msk.f32.gmra.mrb[28].mxu1 %vm2277_vm13, %v4616_v15 }
 0x590   : > { %v4074_v59 = vpop.permute.xlu1 %4073 }
 0x591   : > { %v4072_v37 = vpop.permute.xlu0 %4071  ;;  %v4554_v9 = vsel %vm2166_vm10, %v4522_v34, %v4074_v59  ;;  %v10368_v59 = vld [vmem:[#allocation23_spill] sm:$0xff] }
 0x592   : > { %v4553_v4 = vsel %vm2166_vm10, %v4521_v56, %v4072_v37 }
 0x594   : > { %v4202_v1 = vpop.permute.xlu1 %4201 }
 0x595   : > { %v4200_v25 = vpop.permute.xlu0 %4199  ;;  %v5346_v3 = vpop.f32.mrb[10].mxu1  ;;  %v4586_v61 = vsel %vm2199_vm11, %v4554_v9, %v4202_v1 }
 0x596   : > { %v4852_v47 = vadd.f32 %v5346_v3, %v9408_v31  ;;  %v4846_v39 = vpop.f32.mrb[11].mxu1  ;;  %v4585_v24 = vsel %vm2199_vm11, %v4553_v4, %v4200_v25 }
 0x597   : > { %v4847_v7 = vadd.f32 %v9408_v31, %v4846_v39  ;;  %v10372_v39 = vld [vmem:[#allocation27_spill] sm:$0xff] }
 0x598   : > { %v4966_v46 = vadd.f32 %v4852_v47, %v10362_v40  ;;  %v4330_v57 = vpop.permute.xlu1 %4329 }
 0x599   : > { %v4965_v27 = vadd.f32 %v4847_v7, %v10363_v23  ;;  %v4328_v44 = vpop.permute.xlu0 %4327  ;;  %v4618_v58 = vsel %vm2232_vm12, %v4586_v61, %v4330_v57 }
 0x59a   : > { %v4998_v2 = vmax.f32 %v4966_v46, 0.0  ;;  %v4617_v29 = vsel %vm2232_vm12, %v4585_v24, %v4328_v44  ;;  %v10374_v24 = vld [vmem:[#allocation29_spill] sm:$0xff] }
 0x59b   : > { %v4997_v18 = vmax.f32 %v4965_v27, 0.0  ;;  %5374 = vmatprep.mubr.msk.f32.mxu1 %vm2277_vm13, %v4617_v29  ;;  %v10375_v27 = vld [vmem:[#allocation26_spill] sm:$0xff] }
 0x59c   : > { %5030 = vst.msk [vmem:[%s9418_s11 + $0x58] sm:$0xff] %vm232_vm0, %v4998_v2  ;;  %5375 = vmatmul.mubr.msk.f32.gmra.mrb[30].mxu1 %vm2277_vm13, %v4618_v58 }
 0x59d   : > { %5029 = vst.msk [vmem:[%s9418_s11 + $0x50] sm:$0xff] %vm232_vm0, %v4997_v18 }
 0x5a9   : > { %v5349_v11 = vpop.f32.mrb[12].mxu1 }
 0x5aa   : > { %v4862_v13 = vadd.f32 %v5349_v11, %v9408_v31  ;;  %v4856_v52 = vpop.f32.mrb[13].mxu1 }
 0x5ab   : > { %v4857_v20 = vadd.f32 %v9408_v31, %v4856_v52 }
 0x5ac   : > { %v4968_v41 = vadd.f32 %v4862_v13, %v10364_v21  ;;  %v10376_v13 = vld [vmem:[#allocation31_spill] sm:$0xff] }
 0x5ad   : > { %v4967_v50 = vadd.f32 %v4857_v20, %v10365_v51  ;;  %v10377_v20 = vld [vmem:[#allocation28_spill] sm:$0xff] }
 0x5ae   : > { %v5000_v33 = vmax.f32 %v4968_v41, 0.0 }
 0x5af   : > { %v4999_v26 = vmax.f32 %v4967_v50, 0.0 }
 0x5b0   : > { %5032 = vst.msk [vmem:[%s9418_s11 + $0x68] sm:$0xff] %vm232_vm0, %v5000_v33 }
 0x5b1   : > { %5031 = vst.msk [vmem:[%s9418_s11 + $0x60] sm:$0xff] %vm232_vm0, %v4999_v26 }
 0x5bd   : > { %v5352_v35 = vpop.f32.mrb[14].mxu1 }
 0x5be   : > { %v4872_v49 = vadd.f32 %v5352_v35, %v9408_v31  ;;  %v4866_v30 = vpop.f32.mrb[15].mxu1 }
 0x5bf   : > { %v4867_v53 = vadd.f32 %v9408_v31, %v4866_v30 }
 0x5c0   : > { %v4970_v28 = vadd.f32 %v4872_v49, %v10366_v60  ;;  %v10378_v49 = vld [vmem:[#allocation33_spill] sm:$0xff] }
 0x5c1   : > { %v4969_v62 = vadd.f32 %v4867_v53, %v10367_v42  ;;  %v10379_v53 = vld [vmem:[#allocation30_spill] sm:$0xff] }
 0x5c2   : > { %v5002_v36 = vmax.f32 %v4970_v28, 0.0 }
 0x5c3   : > { %v5001_v63 = vmax.f32 %v4969_v62, 0.0 }
 0x5c4   : > { %5034 = vst.msk [vmem:[%s9418_s11 + $0x78] sm:$0xff] %vm232_vm0, %v5002_v36 }
 0x5c5   : > { %5033 = vst.msk [vmem:[%s9418_s11 + $0x70] sm:$0xff] %vm232_vm0, %v5001_v63 }
 0x5d1   : > { %v5355_v32 = vpop.f32.mrb[16].mxu1 }
 0x5d2   : > { %v4882_v22 = vadd.f32 %v5355_v32, %v9408_v31  ;;  %v4876_v38 = vpop.f32.mrb[17].mxu1 }
 0x5d3   : > { %v4877_v15 = vadd.f32 %v9408_v31, %v4876_v38 }
 0x5d4   : > { %v4972_v37 = vadd.f32 %v4882_v22, %v10368_v59  ;;  %v10380_v22 = vld [vmem:[#allocation34_spill] sm:$0xff] }
 0x5d5   : > { %v4971_v55 = vadd.f32 %v4877_v15, %v10369_v45  ;;  %v10381_v15 = vld [vmem:[#allocation32_spill] sm:$0xff] }
 0x5d6   : > { %v5004_v48 = vmax.f32 %v4972_v37, 0.0 }
 0x5d7   : > { %v5003_v54 = vmax.f32 %v4971_v55, 0.0 }
 0x5d8   : > { %5036 = vst.msk [vmem:[%s9418_s11 + $0x88] sm:$0xff] %vm232_vm0, %v5004_v48 }
 0x5d9   : > { %5035 = vst.msk [vmem:[%s9418_s11 + $0x80] sm:$0xff] %vm232_vm0, %v5003_v54 }
 0x5ea   : > { %v5358_v8 = vpop.f32.mrb[18].mxu1 }
 0x5eb   : > { %v4892_v14 = vadd.f32 %v5358_v8, %v9408_v31  ;;  %v4886_v19 = vpop.f32.mrb[19].mxu1 }
 0x5ec   : > { %v4887_v10 = vadd.f32 %v9408_v31, %v4886_v19 }
 0x5ed   : > { %v4974_v1 = vadd.f32 %v4892_v14, %v10370_v17  ;;  %v10382_v14 = vld [vmem:[#allocation36_spill] sm:$0xff] }
 0x5ee   : > { %v4973_v0 = vadd.f32 %v4887_v10, %v10371_v16  ;;  %v10383_v10 = vld [vmem:[#allocation35_spill] sm:$0xff] }
 0x5ef   : > { %v5006_v43 = vmax.f32 %v4974_v1, 0.0 }
 0x5f0   : > { %v5005_v25 = vmax.f32 %v4973_v0, 0.0 }
 0x5f1   : > { %5038 = vst.msk [vmem:[%s9418_s11 + $0x98] sm:$0xff] %vm232_vm0, %v5006_v43 }
 0x5f2   : > { %5037 = vst.msk [vmem:[%s9418_s11 + $0x90] sm:$0xff] %vm232_vm0, %v5005_v25 }
 0x602   : > { %v5361_v3 = vpop.f32.mrb[20].mxu1 }
 0x603   : > { %v4902_v5 = vadd.f32 %v5361_v3, %v9408_v31  ;;  %v4896_v12 = vpop.f32.mrb[21].mxu1 }
 0x604   : > { %v4897_v47 = vadd.f32 %v9408_v31, %v4896_v12 }
 0x605   : > { %v4976_v56 = vadd.f32 %v4902_v5, %v10372_v39 }
 0x606   : > { %v4975_v7 = vadd.f32 %v4897_v47, %v10373_v6 }
 0x607   : > { %v5008_v34 = vmax.f32 %v4976_v56, 0.0 }
 0x608   : > { %v5007_v4 = vmax.f32 %v4975_v7, 0.0 }
 0x609   : > { %5040 = vst.msk [vmem:[%s9418_s11 + $0xa8] sm:$0xff] %vm232_vm0, %v5008_v34 }
 0x60a   : > { %5039 = vst.msk [vmem:[%s9418_s11 + $0xa0] sm:$0xff] %vm232_vm0, %v5007_v4 }
 0x61a   : > { %v5364_v40 = vpop.f32.mrb[22].mxu1 }
 0x61b   : > { %v4912_v46 = vadd.f32 %v5364_v40, %v9408_v31  ;;  %v4906_v57 = vpop.f32.mrb[23].mxu1 }
 0x61c   : > { %v4907_v9 = vadd.f32 %v9408_v31, %v4906_v57 }
 0x61d   : > { %v4978_v23 = vadd.f32 %v4912_v46, %v10374_v24 }
 0x61e   : > { %v4977_v44 = vadd.f32 %v4907_v9, %v10375_v27 }
 0x61f   : > { %v5010_v61 = vmax.f32 %v4978_v23, 0.0 }
 0x620   : > { %v5009_v2 = vmax.f32 %v4977_v44, 0.0 }
 0x621   : > { %5042 = vst.msk [vmem:[%s9418_s11 + $0xb8] sm:$0xff] %vm232_vm0, %v5010_v61 }
 0x622   : > { %5041 = vst.msk [vmem:[%s9418_s11 + $0xb0] sm:$0xff] %vm232_vm0, %v5009_v2 }
 0x632   : > { %v5367_v29 = vpop.f32.mrb[24].mxu1 }
 0x633   : > { %v4922_v18 = vadd.f32 %v5367_v29, %v9408_v31  ;;  %v4916_v58 = vpop.f32.mrb[25].mxu1 }
 0x634   : > { %v4917_v11 = vadd.f32 %v9408_v31, %v4916_v58 }
 0x635   : > { %v4980_v52 = vadd.f32 %v4922_v18, %v10376_v13 }
 0x636   : > { %v4979_v21 = vadd.f32 %v4917_v11, %v10377_v20 }
 0x637   : > { %v5012_v41 = vmax.f32 %v4980_v52, 0.0 }
 0x638   : > { %v5011_v51 = vmax.f32 %v4979_v21, 0.0 }
 0x639   : > { %5044 = vst.msk [vmem:[%s9418_s11 + $0xc8] sm:$0xff] %vm232_vm0, %v5012_v41 }
 0x63a   : > { %5043 = vst.msk [vmem:[%s9418_s11 + $0xc0] sm:$0xff] %vm232_vm0, %v5011_v51 }
 0x64a   : > { %v5370_v50 = vpop.f32.mrb[26].mxu1 }
 0x64b   : > { %v4932_v33 = vadd.f32 %v5370_v50, %v9408_v31  ;;  %v4926_v26 = vpop.f32.mrb[27].mxu1 }
 0x64c   : > { %v4927_v35 = vadd.f32 %v9408_v31, %v4926_v26 }
 0x64d   : > { %v4982_v30 = vadd.f32 %v4932_v33, %v10378_v49 }
 0x64e   : > { %v4981_v60 = vadd.f32 %v4927_v35, %v10379_v53 }
 0x64f   : > { %v5014_v28 = vmax.f32 %v4982_v30, 0.0 }
 0x650   : > { %v5013_v42 = vmax.f32 %v4981_v60, 0.0 }
 0x651   : > { %5046 = vst.msk [vmem:[%s9418_s11 + $0xd8] sm:$0xff] %vm232_vm0, %v5014_v28 }
 0x652   : > { %5045 = vst.msk [vmem:[%s9418_s11 + $0xd0] sm:$0xff] %vm232_vm0, %v5013_v42 }
 0x662   : > { %v5373_v62 = vpop.f32.mrb[28].mxu1 }
 0x663   : > { %v4942_v36 = vadd.f32 %v5373_v62, %v9408_v31  ;;  %v4936_v63 = vpop.f32.mrb[29].mxu1 }
 0x664   : > { %v4937_v32 = vadd.f32 %v9408_v31, %v4936_v63 }
 0x665   : > { %v4984_v38 = vadd.f32 %v4942_v36, %v10380_v22 }
 0x666   : > { %v4983_v59 = vadd.f32 %v4937_v32, %v10381_v15 }
 0x667   : > { %v5016_v37 = vmax.f32 %v4984_v38, 0.0 }
 0x668   : > { %v5015_v45 = vmax.f32 %v4983_v59, 0.0 }
 0x669   : > { %5048 = vst.msk [vmem:[%s9418_s11 + $0xe8] sm:$0xff] %vm232_vm0, %v5016_v37 }
 0x66a   : > { %5047 = vst.msk [vmem:[%s9418_s11 + $0xe0] sm:$0xff] %vm232_vm0, %v5015_v45 }
 0x66f   : > { %v5376_v55 = vpop.f32.mrb[30].mxu1 }
 0x670   : > { %v4952_v48 = vadd.f32 %v5376_v55, %v9408_v31  ;;  %v4946_v54 = vpop.f32.mrb[31].mxu1 }
 0x671   : > { %v4947_v8 = vadd.f32 %v9408_v31, %v4946_v54 }
 0x672   : > { %v4986_v19 = vadd.f32 %v4952_v48, %v10382_v14 }
 0x673   : > { %v4985_v17 = vadd.f32 %v4947_v8, %v10383_v10 }
 0x674   : > { %v5018_v1 = vmax.f32 %v4986_v19, 0.0 }
 0x675   : > { %v5017_v16 = vmax.f32 %v4985_v17, 0.0 }
 0x676   : > { %5050 = vst.msk [vmem:[%s9418_s11 + $0xf8] sm:$0xff] %vm232_vm0, %v5018_v1 }
 0x677   : > { %5049 = vst.msk [vmem:[%s9418_s11 + $0xf0] sm:$0xff] %vm232_vm0, %v5017_v16 }
 0x678 PF: > { %s15_s18 = sadd.s32 1, %s5430_s18  }
 0x679   : > { %p12_p4 = scmp.ge.s32.totalorder %s15_s18, 4  }
 0x67b   :  { %14 = sbr.rel (!%p12_p4) target bundleno = 1 (0x1), region = 73 }

</bundles_post_ra>
